<compile_context>
chip_gen: v5e
topology: v5e:2x2
jax: 0.10.0
libtpu: 0.0.40
codegen_flags: <defaults>
</compile_context>

<pallas_src>
import functools
import math

import jax
import jax.numpy as jnp
from jax.experimental import pallas as pl
from jax.experimental.pallas import tpu as pltpu


# ----------------------------- fused Pallas kernel -----------------------------

def _gru_att_kernel(
    x_attn_ref,    # (B*T, E)      f32  rows (b,t), lanes (node,feat)  Q=K=V input
    x_base_ref,    # (N*B*T, D)    f32  rows (node,b,t)                raw GRU feats
    w_qkv_ref,     # (E, 3E)       bf16 fused in_proj weight (transposed)
    b_qkv_ref,     # (1, 3E)       f32
    m_head_ref,    # (E, H)        bf16 head-membership matrix
    m_head_t_ref,  # (H, E)        bf16
    w_o_ref,       # (E, E)        bf16 out_proj weight (transposed)
    b_o_ref,       # (1, E)        f32
    w_ih_ref,      # (2D, 3*hid)   bf16 full GRU W_ih^T (raw rows || attention rows)
    b_ih_ref,      # (1, 3*hid)    f32
    w_hh_ref,      # (hid, 3*hid)  bf16
    b_hh_ref,      # (1, 3*hid)    f32
    w_p_ref,       # (T*hid, T*out_dim) bf16  time-block-diagonal projection
    b_p_ref,       # (1, T*out_dim) f32
    o_ref,         # (N*B, T*out_dim) f32
    *, batch, n_nodes, seq_len, attn_dim, embed_dim, hidden, scale):
  B, N, T = batch, n_nodes, seq_len
  D, E, hid = attn_dim, embed_dim, hidden
  bf16 = jnp.bfloat16
  f32 = jnp.float32

  # ------------- fused QKV projection for all batches (one matmul) -------------
  x_attn = x_attn_ref[...]
  qkv = jnp.dot(x_attn.astype(bf16), w_qkv_ref[...],
                preferred_element_type=f32) + b_qkv_ref[...]            # (B*T, 3E)

  # ------ multi-head self-attention, all heads via head-membership matmuls -----
  m_head = m_head_ref[...]
  m_head_t = m_head_t_ref[...]
  ctx_all = []
  for b in range(B):                                   # B is tiny and static
    qkv_b = qkv[b * T:(b + 1) * T]                     # (T, 3E)
    q = qkv_b[:, :E] * scale
    k = qkv_b[:, E:2 * E]
    v = qkv_b[:, 2 * E:]
    qk = q[:, None, :] * k[None, :, :]                                  # (T,T,E)
    s = jnp.dot(qk.reshape(T * T, E).astype(bf16), m_head,
                preferred_element_type=f32).reshape(T, T, -1)           # (T,T,H)
    s = s - jnp.max(s, axis=1, keepdims=True)
    p = jnp.exp(s)
    p = p / jnp.sum(p, axis=1, keepdims=True)          # exact softmax over keys
    pe = jnp.dot(p.reshape(T * T, -1).astype(bf16), m_head_t,
                 preferred_element_type=f32).reshape(T, T, E)
    ctx_all.append(jnp.sum(pe * v[None, :, :], axis=1))                 # (T,E)
  ctx = jnp.concatenate(ctx_all, axis=0)                                # (B*T,E)
  att = jnp.dot(ctx.astype(bf16), w_o_ref[...],
                preferred_element_type=f32) + b_o_ref[...]              # (B*T,E)

  # --- relayout attention output to GRU row order (node,b,t), values only ---
  att_rows = jnp.concatenate([att[:, n * D:(n + 1) * D] for n in range(N)],
                             axis=0)                                    # (N*B*T,D)

  # ----- GRU input pre-activations: single fused matmul, kept in vregs -----
  xin = jnp.concatenate([x_base_ref[...], att_rows], axis=-1)           # (N*B*T,2D)
  gi = jnp.dot(xin.astype(bf16), w_ih_ref[...],
               preferred_element_type=f32) + b_ih_ref[...]              # (N*B*T,3h)
  gi = gi.reshape(N * B, T, 3 * hid)       # leading-dim split only (layout-free)

  # -------------- GRU recurrence: only h @ W_hh on the serial chain ------------
  w_hh = w_hh_ref[...]                     # hoisted once
  b_hh = b_hh_ref[...]
  h = jnp.zeros((N * B, hid), f32)
  hs = []
  for t in range(T):                       # static unroll, T is small
    gi_t = gi[:, t, :]                                                  # (N*B,3h)
    gh = jnp.dot(h.astype(bf16), w_hh, preferred_element_type=f32) + b_hh
    r = jax.nn.sigmoid(gi_t[:, :hid] + gh[:, :hid])
    z = jax.nn.sigmoid(gi_t[:, hid:2 * hid] + gh[:, hid:2 * hid])
    g = jnp.tanh(gi_t[:, 2 * hid:] + r * gh[:, 2 * hid:])
    h = (1.0 - z) * g + z * h
    hs.append(h)

  # ----------- final projection + ReLU, lane-dense single output store ---------
  dec = jnp.concatenate(hs, axis=-1)                                    # (N*B,T*hid)
  y = jnp.dot(dec.astype(bf16), w_p_ref[...],
              preferred_element_type=f32) + b_p_ref[...]                # (N*B,T*od)
  o_ref[...] = jnp.maximum(y, 0.0)


# ------------------------------- model forward --------------------------------

def gru_att_forward(params, x_enc, settings):
  B, N, T, _ = x_enc.shape
  id_emb_dim = 8
  D = id_emb_dim + settings['var_len'] - 1          # attn_in_dim
  H = D                                             # num_heads
  E = D * N                                         # embed_dim
  Dh = E // H                                       # head_dim (== N)
  hid = settings['hidden_dims']
  out_dim = int(math.ceil(settings['output_len'] / settings['input_len']))
  cut_len = settings['output_len'] // out_dim

  # Embedding gather + feature concat: cheap pre-kernel glue.
  turb_idx = x_enc[..., 0].astype(jnp.int32)
  turb_emb = jnp.take(params['id_emb'], turb_idx, axis=0)               # (B,N,T,8)
  x = jnp.concatenate([turb_emb, x_enc[..., 1:]], axis=-1)              # (B,N,T,D)
  x = x.astype(jnp.float32)

  # Two free wrapper-side layouts of the same features.
  x_attn = jnp.transpose(x, (0, 2, 1, 3)).reshape(B * T, E)     # rows (b,t)
  x_base = jnp.transpose(x, (1, 0, 2, 3)).reshape(N * B * T, D)  # rows (n,b,t)

  # head h owns E-columns [h*Dh, (h+1)*Dh) — matches PyTorch head split.
  m_head = jnp.repeat(jnp.eye(H, dtype=jnp.float32), Dh, axis=0)        # (E, H)

  # Time-block-diagonal projection weight (one matmul, lane-dense output).
  w_p_time = jnp.kron(jnp.eye(T, dtype=jnp.float32), params['w_p'].T)   # (T*hid,T*od)
  b_p_time = jnp.tile(params['b_p'], T)                                 # (T*od,)

  bf = lambda a: jnp.asarray(a, jnp.bfloat16)
  row = lambda a: jnp.asarray(a, jnp.float32).reshape(1, -1)

  kernel = functools.partial(
      _gru_att_kernel, batch=B, n_nodes=N, seq_len=T, attn_dim=D,
      embed_dim=E, hidden=hid, scale=1.0 / math.sqrt(Dh))

  vmem = pl.BlockSpec(memory_space=pltpu.MemorySpace.VMEM)

  y = pl.pallas_call(
      kernel,
      out_shape=jax.ShapeDtypeStruct((N * B, T * out_dim), jnp.float32),
      in_specs=[vmem] * 14,
      out_specs=vmem,
  )(
      x_attn, x_base,
      bf(params['in_proj_w'].T), row(params['in_proj_b']),
      bf(m_head), bf(m_head.T),
      bf(params['out_proj_w'].T), row(params['out_proj_b']),
      bf(params['w_ih'].T), row(params['b_ih']),
      bf(params['w_hh'].T), row(params['b_hh']),
      bf(w_p_time), row(b_p_time),
  )

  # rows are (node, batch); columns are (t, out_dim). Keep last cut_len steps.
  y = y[:, (T - cut_len) * out_dim:]
  y = y.reshape(N, B, cut_len * out_dim).transpose(1, 0, 2)             # (B,N,L_out)
  return y


# ------------------------------- parameter init --------------------------------

def init_params(key, settings):
  N = settings['capacity']
  id_emb_dim = 8
  D = id_emb_dim + settings['var_len'] - 1
  E = D * N
  hid = settings['hidden_dims']
  gru_in = 2 * D if settings['is_attention'] else D
  out_dim = int(math.ceil(settings['output_len'] / settings['input_len']))

  ks = jax.random.split(key, 11)

  def u(k, shape, scale=0.1):
    return jax.random.uniform(k, shape, jnp.float32, -scale, scale)

  return {
      'id_emb': u(ks[0], (N + 1, id_emb_dim)),
      'in_proj_w': u(ks[1], (3 * E, E)),        # torch in_proj_weight (3E, E)
      'in_proj_b': u(ks[2], (3 * E,)),
      'out_proj_w': u(ks[3], (E, E)),
      'out_proj_b': u(ks[4], (E,)),
      'w_ih': u(ks[5], (3 * hid, gru_in)),      # torch weight_ih_l0
      'b_ih': u(ks[6], (3 * hid,)),
      'w_hh': u(ks[7], (3 * hid, hid)),         # torch weight_hh_l0
      'b_hh': u(ks[8], (3 * hid,)),
      'w_p': u(ks[9], (out_dim, hid)),          # final Linear(hidden, out_dim)
      'b_p': u(ks[10], (out_dim,)),
  }


# ------------------------------------ main --------------------------------------

if __name__ == "__main__":
  settings = {
      'input_len': 8, 'output_len': 8, 'var_len': 5, 'capacity': 4,
      'nhead': 2, 'dropout_proj': 0.0, 'dropout_att': 0.0,
      'is_attention': True, 'attention_mod': 'self', 'projection_mod': 'linear',
      'hidden_dims': 32, 'cat_var_len': 3, 'day_len': 144, 'num_layers': 1,
  }
  key = jax.random.PRNGKey(0)
  k_param, k_x = jax.random.split(key)
  params = init_params(k_param, settings)

  B, N, T, F = 2, settings['capacity'], settings['input_len'], settings['var_len']
  # x_enc feature layout: [turbine_id, weekday_id, time_id, other floats...]
  turb = jnp.broadcast_to(jnp.arange(N, dtype=jnp.float32)[None, :, None], (B, N, T))
  wk_id = jnp.broadcast_to((jnp.arange(T) % 7).astype(jnp.float32)[None, None, :], (B, N, T))
  t_id = jnp.broadcast_to((jnp.arange(T) % settings['day_len']).astype(jnp.float32)[None, None, :], (B, N, T))
  rest = jax.random.normal(k_x, (B, N, T, F - 3), jnp.float32)
  x_enc = jnp.concatenate(
      [turb[..., None], wk_id[..., None], t_id[..., None], rest], axis=-1
  )  # (2, 4, 8, 5)

  fwd = jax.jit(lambda p, xe: gru_att_forward(p, xe, settings))
  out = jax.block_until_ready(fwd(params, x_enc))
  assert out.shape == (B, N, settings['output_len']), out.shape
  assert bool(jnp.all(jnp.isfinite(out)))
  print("KERNEL_OK")
</pallas_src>

<mosaic_0001>
module attributes {stable_mosaic.version = 11 : i64} {
  func.func @_gru_att_kernel(%arg0: memref<16x48xf32, #tpu.memory_space<vmem>>, %arg1: memref<64x12xf32, #tpu.memory_space<vmem>>, %arg2: memref<48x144xbf16, #tpu.memory_space<vmem>>, %arg3: memref<1x144xf32, #tpu.memory_space<vmem>>, %arg4: memref<48x12xbf16, #tpu.memory_space<vmem>>, %arg5: memref<12x48xbf16, #tpu.memory_space<vmem>>, %arg6: memref<48x48xbf16, #tpu.memory_space<vmem>>, %arg7: memref<1x48xf32, #tpu.memory_space<vmem>>, %arg8: memref<24x96xbf16, #tpu.memory_space<vmem>>, %arg9: memref<1x96xf32, #tpu.memory_space<vmem>>, %arg10: memref<32x96xbf16, #tpu.memory_space<vmem>>, %arg11: memref<1x96xf32, #tpu.memory_space<vmem>>, %arg12: memref<256x8xbf16, #tpu.memory_space<vmem>>, %arg13: memref<1x8xf32, #tpu.memory_space<vmem>>, %arg14: memref<8x8xf32, #tpu.memory_space<vmem>>) attributes {dimension_semantics = [], scalar_prefetch = 0 : i64, scratch_operands = 0 : i64, tpu.core_type = #tpu.core_type<tc>} {
    %c0 = arith.constant 0 : index
    %c0_0 = arith.constant 0 : index
    %0 = vector.load %arg0[%c0, %c0_0] : memref<16x48xf32, #tpu.memory_space<vmem>>, vector<16x48xf32>
    %1 = arith.truncf %0 : vector<16x48xf32> to vector<16x48xbf16>
    %c0_1 = arith.constant 0 : index
    %c0_2 = arith.constant 0 : index
    %2 = vector.load %arg2[%c0_1, %c0_2] : memref<48x144xbf16, #tpu.memory_space<vmem>>, vector<48x144xbf16>
    %cst = arith.constant dense<0.000000e+00> : vector<16x144xf32>
    %3 = tpu.matmul %1, %2, %cst {dimension_numbers = #tpu.dot_dimension_numbers<[1], [0], [0], [1], [0, 0, 1, 1], [], []>} : vector<16x48xbf16>, vector<48x144xbf16>, vector<16x144xf32> -> vector<16x144xf32>
    %c0_3 = arith.constant 0 : index
    %c0_4 = arith.constant 0 : index
    %4 = vector.load %arg3[%c0_3, %c0_4] : memref<1x144xf32, #tpu.memory_space<vmem>>, vector<1x144xf32>
    %5 = vector.broadcast %4 : vector<1x144xf32> to vector<16x144xf32>
    %6 = arith.addf %3, %5 : vector<16x144xf32>
    %c0_5 = arith.constant 0 : index
    %c0_6 = arith.constant 0 : index
    %7 = vector.load %arg4[%c0_5, %c0_6] : memref<48x12xbf16, #tpu.memory_space<vmem>>, vector<48x12xbf16>
    %c0_7 = arith.constant 0 : index
    %c0_8 = arith.constant 0 : index
    %8 = vector.load %arg5[%c0_7, %c0_8] : memref<12x48xbf16, #tpu.memory_space<vmem>>, vector<12x48xbf16>
    %9 = vector.extract_strided_slice %6 {offsets = [0, 0], sizes = [8, 144], strides = [1, 1]} : vector<16x144xf32> to vector<8x144xf32>
    %10 = vector.extract_strided_slice %9 {offsets = [0, 0], sizes = [8, 48], strides = [1, 1]} : vector<8x144xf32> to vector<8x48xf32>
    %cst_9 = arith.constant 5.000000e-01 : f32
    %11 = vector.broadcast %cst_9 : f32 to vector<8x48xf32>
    %12 = arith.mulf %10, %11 : vector<8x48xf32>
    %13 = vector.extract_strided_slice %9 {offsets = [0, 48], sizes = [8, 48], strides = [1, 1]} : vector<8x144xf32> to vector<8x48xf32>
    %14 = vector.extract_strided_slice %9 {offsets = [0, 96], sizes = [8, 48], strides = [1, 1]} : vector<8x144xf32> to vector<8x48xf32>
    %15 = vector.shape_cast %12 : vector<8x48xf32> to vector<8x1x48xf32>
    %16 = vector.shape_cast %13 : vector<8x48xf32> to vector<1x8x48xf32>
    %17 = vector.broadcast %15 : vector<8x1x48xf32> to vector<8x8x48xf32>
    %18 = vector.broadcast %16 : vector<1x8x48xf32> to vector<8x8x48xf32>
    %19 = arith.mulf %17, %18 : vector<8x8x48xf32>
    %20 = vector.shape_cast %19 : vector<8x8x48xf32> to vector<64x48xf32>
    %21 = arith.truncf %20 : vector<64x48xf32> to vector<64x48xbf16>
    %cst_10 = arith.constant dense<0.000000e+00> : vector<64x12xf32>
    %22 = tpu.matmul %21, %7, %cst_10 {dimension_numbers = #tpu.dot_dimension_numbers<[1], [0], [0], [1], [0, 0, 1, 1], [], []>} : vector<64x48xbf16>, vector<48x12xbf16>, vector<64x12xf32> -> vector<64x12xf32>
    %23 = vector.shape_cast %22 : vector<64x12xf32> to vector<8x8x12xf32>
    %cst_11 = arith.constant dense<0xFF800000> : vector<8x12xf32>
    %24 = vector.multi_reduction <maximumf>, %23, %cst_11 [1] : vector<8x8x12xf32> to vector<8x12xf32>
    %25 = vector.shape_cast %24 : vector<8x12xf32> to vector<8x1x12xf32>
    %26 = vector.broadcast %25 : vector<8x1x12xf32> to vector<8x8x12xf32>
    %27 = arith.subf %23, %26 : vector<8x8x12xf32>
    %28 = math.exp %27 : vector<8x8x12xf32>
    %cst_12 = arith.constant dense<0.000000e+00> : vector<8x12xf32>
    %29 = vector.multi_reduction <add>, %28, %cst_12 [1] : vector<8x8x12xf32> to vector<8x12xf32>
    %30 = vector.shape_cast %29 : vector<8x12xf32> to vector<8x1x12xf32>
    %31 = vector.broadcast %30 : vector<8x1x12xf32> to vector<8x8x12xf32>
    %32 = arith.divf %28, %31 : vector<8x8x12xf32>
    %33 = vector.shape_cast %32 : vector<8x8x12xf32> to vector<64x12xf32>
    %34 = arith.truncf %33 : vector<64x12xf32> to vector<64x12xbf16>
    %cst_13 = arith.constant dense<0.000000e+00> : vector<64x48xf32>
    %35 = tpu.matmul %34, %8, %cst_13 {dimension_numbers = #tpu.dot_dimension_numbers<[1], [0], [0], [1], [0, 0, 1, 1], [], []>} : vector<64x12xbf16>, vector<12x48xbf16>, vector<64x48xf32> -> vector<64x48xf32>
    %36 = vector.shape_cast %35 : vector<64x48xf32> to vector<8x8x48xf32>
    %37 = vector.shape_cast %14 : vector<8x48xf32> to vector<1x8x48xf32>
    %38 = vector.broadcast %37 : vector<1x8x48xf32> to vector<8x8x48xf32>
    %39 = arith.mulf %36, %38 : vector<8x8x48xf32>
    %cst_14 = arith.constant dense<0.000000e+00> : vector<8x48xf32>
    %40 = vector.multi_reduction <add>, %39, %cst_14 [1] : vector<8x8x48xf32> to vector<8x48xf32>
    %41 = vector.extract_strided_slice %6 {offsets = [8, 0], sizes = [8, 144], strides = [1, 1]} : vector<16x144xf32> to vector<8x144xf32>
    %42 = vector.extract_strided_slice %41 {offsets = [0, 0], sizes = [8, 48], strides = [1, 1]} : vector<8x144xf32> to vector<8x48xf32>
    %cst_15 = arith.constant 5.000000e-01 : f32
    %43 = vector.broadcast %cst_15 : f32 to vector<8x48xf32>
    %44 = arith.mulf %42, %43 : vector<8x48xf32>
    %45 = vector.extract_strided_slice %41 {offsets = [0, 48], sizes = [8, 48], strides = [1, 1]} : vector<8x144xf32> to vector<8x48xf32>
    %46 = vector.extract_strided_slice %41 {offsets = [0, 96], sizes = [8, 48], strides = [1, 1]} : vector<8x144xf32> to vector<8x48xf32>
    %47 = vector.shape_cast %44 : vector<8x48xf32> to vector<8x1x48xf32>
    %48 = vector.shape_cast %45 : vector<8x48xf32> to vector<1x8x48xf32>
    %49 = vector.broadcast %47 : vector<8x1x48xf32> to vector<8x8x48xf32>
    %50 = vector.broadcast %48 : vector<1x8x48xf32> to vector<8x8x48xf32>
    %51 = arith.mulf %49, %50 : vector<8x8x48xf32>
    %52 = vector.shape_cast %51 : vector<8x8x48xf32> to vector<64x48xf32>
    %53 = arith.truncf %52 : vector<64x48xf32> to vector<64x48xbf16>
    %cst_16 = arith.constant dense<0.000000e+00> : vector<64x12xf32>
    %54 = tpu.matmul %53, %7, %cst_16 {dimension_numbers = #tpu.dot_dimension_numbers<[1], [0], [0], [1], [0, 0, 1, 1], [], []>} : vector<64x48xbf16>, vector<48x12xbf16>, vector<64x12xf32> -> vector<64x12xf32>
    %55 = vector.shape_cast %54 : vector<64x12xf32> to vector<8x8x12xf32>
    %cst_17 = arith.constant dense<0xFF800000> : vector<8x12xf32>
    %56 = vector.multi_reduction <maximumf>, %55, %cst_17 [1] : vector<8x8x12xf32> to vector<8x12xf32>
    %57 = vector.shape_cast %56 : vector<8x12xf32> to vector<8x1x12xf32>
    %58 = vector.broadcast %57 : vector<8x1x12xf32> to vector<8x8x12xf32>
    %59 = arith.subf %55, %58 : vector<8x8x12xf32>
    %60 = math.exp %59 : vector<8x8x12xf32>
    %cst_18 = arith.constant dense<0.000000e+00> : vector<8x12xf32>
    %61 = vector.multi_reduction <add>, %60, %cst_18 [1] : vector<8x8x12xf32> to vector<8x12xf32>
    %62 = vector.shape_cast %61 : vector<8x12xf32> to vector<8x1x12xf32>
    %63 = vector.broadcast %62 : vector<8x1x12xf32> to vector<8x8x12xf32>
    %64 = arith.divf %60, %63 : vector<8x8x12xf32>
    %65 = vector.shape_cast %64 : vector<8x8x12xf32> to vector<64x12xf32>
    %66 = arith.truncf %65 : vector<64x12xf32> to vector<64x12xbf16>
    %cst_19 = arith.constant dense<0.000000e+00> : vector<64x48xf32>
    %67 = tpu.matmul %66, %8, %cst_19 {dimension_numbers = #tpu.dot_dimension_numbers<[1], [0], [0], [1], [0, 0, 1, 1], [], []>} : vector<64x12xbf16>, vector<12x48xbf16>, vector<64x48xf32> -> vector<64x48xf32>
    %68 = vector.shape_cast %67 : vector<64x48xf32> to vector<8x8x48xf32>
    %69 = vector.shape_cast %46 : vector<8x48xf32> to vector<1x8x48xf32>
    %70 = vector.broadcast %69 : vector<1x8x48xf32> to vector<8x8x48xf32>
    %71 = arith.mulf %68, %70 : vector<8x8x48xf32>
    %cst_20 = arith.constant dense<0.000000e+00> : vector<8x48xf32>
    %72 = vector.multi_reduction <add>, %71, %cst_20 [1] : vector<8x8x48xf32> to vector<8x48xf32>
    %73 = tpu.concatenate %40, %72 in 0 : vector<8x48xf32>, vector<8x48xf32> -> vector<16x48xf32>
    %74 = arith.truncf %73 : vector<16x48xf32> to vector<16x48xbf16>
    %c0_21 = arith.constant 0 : index
    %c0_22 = arith.constant 0 : index
    %75 = vector.load %arg6[%c0_21, %c0_22] : memref<48x48xbf16, #tpu.memory_space<vmem>>, vector<48x48xbf16>
    %cst_23 = arith.constant dense<0.000000e+00> : vector<16x48xf32>
    %76 = tpu.matmul %74, %75, %cst_23 {dimension_numbers = #tpu.dot_dimension_numbers<[1], [0], [0], [1], [0, 0, 1, 1], [], []>} : vector<16x48xbf16>, vector<48x48xbf16>, vector<16x48xf32> -> vector<16x48xf32>
    %c0_24 = arith.constant 0 : index
    %c0_25 = arith.constant 0 : index
    %77 = vector.load %arg7[%c0_24, %c0_25] : memref<1x48xf32, #tpu.memory_space<vmem>>, vector<1x48xf32>
    %78 = vector.broadcast %77 : vector<1x48xf32> to vector<16x48xf32>
    %79 = arith.addf %76, %78 : vector<16x48xf32>
    %80 = vector.extract_strided_slice %79 {offsets = [0, 0], sizes = [16, 12], strides = [1, 1]} : vector<16x48xf32> to vector<16x12xf32>
    %81 = vector.extract_strided_slice %79 {offsets = [0, 12], sizes = [16, 12], strides = [1, 1]} : vector<16x48xf32> to vector<16x12xf32>
    %82 = vector.extract_strided_slice %79 {offsets = [0, 24], sizes = [16, 12], strides = [1, 1]} : vector<16x48xf32> to vector<16x12xf32>
    %83 = vector.extract_strided_slice %79 {offsets = [0, 36], sizes = [16, 12], strides = [1, 1]} : vector<16x48xf32> to vector<16x12xf32>
    %84 = tpu.concatenate %80, %81, %82, %83 in 0 : vector<16x12xf32>, vector<16x12xf32>, vector<16x12xf32>, vector<16x12xf32> -> vector<64x12xf32>
    %c0_26 = arith.constant 0 : index
    %c0_27 = arith.constant 0 : index
    %85 = vector.load %arg1[%c0_26, %c0_27] : memref<64x12xf32, #tpu.memory_space<vmem>>, vector<64x12xf32>
    %86 = tpu.concatenate %85, %84 in 1 : vector<64x12xf32>, vector<64x12xf32> -> vector<64x24xf32>
    %87 = arith.truncf %86 : vector<64x24xf32> to vector<64x24xbf16>
    %c0_28 = arith.constant 0 : index
    %c0_29 = arith.constant 0 : index
    %88 = vector.load %arg8[%c0_28, %c0_29] : memref<24x96xbf16, #tpu.memory_space<vmem>>, vector<24x96xbf16>
    %cst_30 = arith.constant dense<0.000000e+00> : vector<64x96xf32>
    %89 = tpu.matmul %87, %88, %cst_30 {dimension_numbers = #tpu.dot_dimension_numbers<[1], [0], [0], [1], [0, 0, 1, 1], [], []>} : vector<64x24xbf16>, vector<24x96xbf16>, vector<64x96xf32> -> vector<64x96xf32>
    %c0_31 = arith.constant 0 : index
    %c0_32 = arith.constant 0 : index
    %90 = vector.load %arg9[%c0_31, %c0_32] : memref<1x96xf32, #tpu.memory_space<vmem>>, vector<1x96xf32>
    %91 = vector.broadcast %90 : vector<1x96xf32> to vector<64x96xf32>
    %92 = arith.addf %89, %91 : vector<64x96xf32>
    %93 = vector.shape_cast %92 : vector<64x96xf32> to vector<8x8x96xf32>
    %c0_33 = arith.constant 0 : index
    %c0_34 = arith.constant 0 : index
    %94 = vector.load %arg10[%c0_33, %c0_34] : memref<32x96xbf16, #tpu.memory_space<vmem>>, vector<32x96xbf16>
    %c0_35 = arith.constant 0 : index
    %c0_36 = arith.constant 0 : index
    %95 = vector.load %arg11[%c0_35, %c0_36] : memref<1x96xf32, #tpu.memory_space<vmem>>, vector<1x96xf32>
    %cst_37 = arith.constant 0.000000e+00 : f32
    %96 = vector.broadcast %cst_37 : f32 to vector<8x32xf32>
    %97 = vector.extract_strided_slice %93 {offsets = [0, 0, 0], sizes = [8, 1, 96], strides = [1, 1, 1]} : vector<8x8x96xf32> to vector<8x1x96xf32>
    %98 = vector.shape_cast %97 : vector<8x1x96xf32> to vector<8x96xf32>
    %99 = arith.truncf %96 : vector<8x32xf32> to vector<8x32xbf16>
    %cst_38 = arith.constant dense<0.000000e+00> : vector<8x96xf32>
    %100 = tpu.matmul %99, %94, %cst_38 {dimension_numbers = #tpu.dot_dimension_numbers<[1], [0], [0], [1], [0, 0, 1, 1], [], []>} : vector<8x32xbf16>, vector<32x96xbf16>, vector<8x96xf32> -> vector<8x96xf32>
    %101 = vector.broadcast %95 : vector<1x96xf32> to vector<8x96xf32>
    %102 = arith.addf %100, %101 : vector<8x96xf32>
    %103 = vector.extract_strided_slice %98 {offsets = [0, 0], sizes = [8, 32], strides = [1, 1]} : vector<8x96xf32> to vector<8x32xf32>
    %104 = vector.extract_strided_slice %102 {offsets = [0, 0], sizes = [8, 32], strides = [1, 1]} : vector<8x96xf32> to vector<8x32xf32>
    %105 = arith.addf %103, %104 : vector<8x32xf32>
    %106 = arith.negf %105 : vector<8x32xf32>
    %107 = math.exp %106 : vector<8x32xf32>
    %cst_39 = arith.constant 1.000000e+00 : f32
    %108 = vector.broadcast %cst_39 : f32 to vector<8x32xf32>
    %109 = arith.addf %108, %107 : vector<8x32xf32>
    %110 = arith.divf %108, %109 : vector<8x32xf32>
    %111 = vector.extract_strided_slice %98 {offsets = [0, 32], sizes = [8, 32], strides = [1, 1]} : vector<8x96xf32> to vector<8x32xf32>
    %112 = vector.extract_strided_slice %102 {offsets = [0, 32], sizes = [8, 32], strides = [1, 1]} : vector<8x96xf32> to vector<8x32xf32>
    %113 = arith.addf %111, %112 : vector<8x32xf32>
    %114 = arith.negf %113 : vector<8x32xf32>
    %115 = math.exp %114 : vector<8x32xf32>
    %cst_40 = arith.constant 1.000000e+00 : f32
    %116 = vector.broadcast %cst_40 : f32 to vector<8x32xf32>
    %117 = arith.addf %116, %115 : vector<8x32xf32>
    %118 = arith.divf %116, %117 : vector<8x32xf32>
    %119 = vector.extract_strided_slice %98 {offsets = [0, 64], sizes = [8, 32], strides = [1, 1]} : vector<8x96xf32> to vector<8x32xf32>
    %120 = vector.extract_strided_slice %102 {offsets = [0, 64], sizes = [8, 32], strides = [1, 1]} : vector<8x96xf32> to vector<8x32xf32>
    %121 = arith.mulf %110, %120 : vector<8x32xf32>
    %122 = arith.addf %119, %121 : vector<8x32xf32>
    %123 = math.tanh %122 : vector<8x32xf32>
    %cst_41 = arith.constant 1.000000e+00 : f32
    %124 = vector.broadcast %cst_41 : f32 to vector<8x32xf32>
    %125 = arith.subf %124, %118 : vector<8x32xf32>
    %126 = arith.mulf %125, %123 : vector<8x32xf32>
    %127 = arith.mulf %118, %96 : vector<8x32xf32>
    %128 = arith.addf %126, %127 : vector<8x32xf32>
    %129 = vector.extract_strided_slice %93 {offsets = [0, 1, 0], sizes = [8, 1, 96], strides = [1, 1, 1]} : vector<8x8x96xf32> to vector<8x1x96xf32>
    %130 = vector.shape_cast %129 : vector<8x1x96xf32> to vector<8x96xf32>
    %131 = arith.truncf %128 : vector<8x32xf32> to vector<8x32xbf16>
    %cst_42 = arith.constant dense<0.000000e+00> : vector<8x96xf32>
    %132 = tpu.matmul %131, %94, %cst_42 {dimension_numbers = #tpu.dot_dimension_numbers<[1], [0], [0], [1], [0, 0, 1, 1], [], []>} : vector<8x32xbf16>, vector<32x96xbf16>, vector<8x96xf32> -> vector<8x96xf32>
    %133 = vector.broadcast %95 : vector<1x96xf32> to vector<8x96xf32>
    %134 = arith.addf %132, %133 : vector<8x96xf32>
    %135 = vector.extract_strided_slice %130 {offsets = [0, 0], sizes = [8, 32], strides = [1, 1]} : vector<8x96xf32> to vector<8x32xf32>
    %136 = vector.extract_strided_slice %134 {offsets = [0, 0], sizes = [8, 32], strides = [1, 1]} : vector<8x96xf32> to vector<8x32xf32>
    %137 = arith.addf %135, %136 : vector<8x32xf32>
    %138 = arith.negf %137 : vector<8x32xf32>
    %139 = math.exp %138 : vector<8x32xf32>
    %cst_43 = arith.constant 1.000000e+00 : f32
    %140 = vector.broadcast %cst_43 : f32 to vector<8x32xf32>
    %141 = arith.addf %140, %139 : vector<8x32xf32>
    %142 = arith.divf %140, %141 : vector<8x32xf32>
    %143 = vector.extract_strided_slice %130 {offsets = [0, 32], sizes = [8, 32], strides = [1, 1]} : vector<8x96xf32> to vector<8x32xf32>
    %144 = vector.extract_strided_slice %134 {offsets = [0, 32], sizes = [8, 32], strides = [1, 1]} : vector<8x96xf32> to vector<8x32xf32>
    %145 = arith.addf %143, %144 : vector<8x32xf32>
    %146 = arith.negf %145 : vector<8x32xf32>
    %147 = math.exp %146 : vector<8x32xf32>
    %cst_44 = arith.constant 1.000000e+00 : f32
    %148 = vector.broadcast %cst_44 : f32 to vector<8x32xf32>
    %149 = arith.addf %148, %147 : vector<8x32xf32>
    %150 = arith.divf %148, %149 : vector<8x32xf32>
    %151 = vector.extract_strided_slice %130 {offsets = [0, 64], sizes = [8, 32], strides = [1, 1]} : vector<8x96xf32> to vector<8x32xf32>
    %152 = vector.extract_strided_slice %134 {offsets = [0, 64], sizes = [8, 32], strides = [1, 1]} : vector<8x96xf32> to vector<8x32xf32>
    %153 = arith.mulf %142, %152 : vector<8x32xf32>
    %154 = arith.addf %151, %153 : vector<8x32xf32>
    %155 = math.tanh %154 : vector<8x32xf32>
    %cst_45 = arith.constant 1.000000e+00 : f32
    %156 = vector.broadcast %cst_45 : f32 to vector<8x32xf32>
    %157 = arith.subf %156, %150 : vector<8x32xf32>
    %158 = arith.mulf %157, %155 : vector<8x32xf32>
    %159 = arith.mulf %150, %128 : vector<8x32xf32>
    %160 = arith.addf %158, %159 : vector<8x32xf32>
    %161 = vector.extract_strided_slice %93 {offsets = [0, 2, 0], sizes = [8, 1, 96], strides = [1, 1, 1]} : vector<8x8x96xf32> to vector<8x1x96xf32>
    %162 = vector.shape_cast %161 : vector<8x1x96xf32> to vector<8x96xf32>
    %163 = arith.truncf %160 : vector<8x32xf32> to vector<8x32xbf16>
    %cst_46 = arith.constant dense<0.000000e+00> : vector<8x96xf32>
    %164 = tpu.matmul %163, %94, %cst_46 {dimension_numbers = #tpu.dot_dimension_numbers<[1], [0], [0], [1], [0, 0, 1, 1], [], []>} : vector<8x32xbf16>, vector<32x96xbf16>, vector<8x96xf32> -> vector<8x96xf32>
    %165 = vector.broadcast %95 : vector<1x96xf32> to vector<8x96xf32>
    %166 = arith.addf %164, %165 : vector<8x96xf32>
    %167 = vector.extract_strided_slice %162 {offsets = [0, 0], sizes = [8, 32], strides = [1, 1]} : vector<8x96xf32> to vector<8x32xf32>
    %168 = vector.extract_strided_slice %166 {offsets = [0, 0], sizes = [8, 32], strides = [1, 1]} : vector<8x96xf32> to vector<8x32xf32>
    %169 = arith.addf %167, %168 : vector<8x32xf32>
    %170 = arith.negf %169 : vector<8x32xf32>
    %171 = math.exp %170 : vector<8x32xf32>
    %cst_47 = arith.constant 1.000000e+00 : f32
    %172 = vector.broadcast %cst_47 : f32 to vector<8x32xf32>
    %173 = arith.addf %172, %171 : vector<8x32xf32>
    %174 = arith.divf %172, %173 : vector<8x32xf32>
    %175 = vector.extract_strided_slice %162 {offsets = [0, 32], sizes = [8, 32], strides = [1, 1]} : vector<8x96xf32> to vector<8x32xf32>
    %176 = vector.extract_strided_slice %166 {offsets = [0, 32], sizes = [8, 32], strides = [1, 1]} : vector<8x96xf32> to vector<8x32xf32>
    %177 = arith.addf %175, %176 : vector<8x32xf32>
    %178 = arith.negf %177 : vector<8x32xf32>
    %179 = math.exp %178 : vector<8x32xf32>
    %cst_48 = arith.constant 1.000000e+00 : f32
    %180 = vector.broadcast %cst_48 : f32 to vector<8x32xf32>
    %181 = arith.addf %180, %179 : vector<8x32xf32>
    %182 = arith.divf %180, %181 : vector<8x32xf32>
    %183 = vector.extract_strided_slice %162 {offsets = [0, 64], sizes = [8, 32], strides = [1, 1]} : vector<8x96xf32> to vector<8x32xf32>
    %184 = vector.extract_strided_slice %166 {offsets = [0, 64], sizes = [8, 32], strides = [1, 1]} : vector<8x96xf32> to vector<8x32xf32>
    %185 = arith.mulf %174, %184 : vector<8x32xf32>
    %186 = arith.addf %183, %185 : vector<8x32xf32>
    %187 = math.tanh %186 : vector<8x32xf32>
    %cst_49 = arith.constant 1.000000e+00 : f32
    %188 = vector.broadcast %cst_49 : f32 to vector<8x32xf32>
    %189 = arith.subf %188, %182 : vector<8x32xf32>
    %190 = arith.mulf %189, %187 : vector<8x32xf32>
    %191 = arith.mulf %182, %160 : vector<8x32xf32>
    %192 = arith.addf %190, %191 : vector<8x32xf32>
    %193 = vector.extract_strided_slice %93 {offsets = [0, 3, 0], sizes = [8, 1, 96], strides = [1, 1, 1]} : vector<8x8x96xf32> to vector<8x1x96xf32>
    %194 = vector.shape_cast %193 : vector<8x1x96xf32> to vector<8x96xf32>
    %195 = arith.truncf %192 : vector<8x32xf32> to vector<8x32xbf16>
    %cst_50 = arith.constant dense<0.000000e+00> : vector<8x96xf32>
    %196 = tpu.matmul %195, %94, %cst_50 {dimension_numbers = #tpu.dot_dimension_numbers<[1], [0], [0], [1], [0, 0, 1, 1], [], []>} : vector<8x32xbf16>, vector<32x96xbf16>, vector<8x96xf32> -> vector<8x96xf32>
    %197 = vector.broadcast %95 : vector<1x96xf32> to vector<8x96xf32>
    %198 = arith.addf %196, %197 : vector<8x96xf32>
    %199 = vector.extract_strided_slice %194 {offsets = [0, 0], sizes = [8, 32], strides = [1, 1]} : vector<8x96xf32> to vector<8x32xf32>
    %200 = vector.extract_strided_slice %198 {offsets = [0, 0], sizes = [8, 32], strides = [1, 1]} : vector<8x96xf32> to vector<8x32xf32>
    %201 = arith.addf %199, %200 : vector<8x32xf32>
    %202 = arith.negf %201 : vector<8x32xf32>
    %203 = math.exp %202 : vector<8x32xf32>
    %cst_51 = arith.constant 1.000000e+00 : f32
    %204 = vector.broadcast %cst_51 : f32 to vector<8x32xf32>
    %205 = arith.addf %204, %203 : vector<8x32xf32>
    %206 = arith.divf %204, %205 : vector<8x32xf32>
    %207 = vector.extract_strided_slice %194 {offsets = [0, 32], sizes = [8, 32], strides = [1, 1]} : vector<8x96xf32> to vector<8x32xf32>
    %208 = vector.extract_strided_slice %198 {offsets = [0, 32], sizes = [8, 32], strides = [1, 1]} : vector<8x96xf32> to vector<8x32xf32>
    %209 = arith.addf %207, %208 : vector<8x32xf32>
    %210 = arith.negf %209 : vector<8x32xf32>
    %211 = math.exp %210 : vector<8x32xf32>
    %cst_52 = arith.constant 1.000000e+00 : f32
    %212 = vector.broadcast %cst_52 : f32 to vector<8x32xf32>
    %213 = arith.addf %212, %211 : vector<8x32xf32>
    %214 = arith.divf %212, %213 : vector<8x32xf32>
    %215 = vector.extract_strided_slice %194 {offsets = [0, 64], sizes = [8, 32], strides = [1, 1]} : vector<8x96xf32> to vector<8x32xf32>
    %216 = vector.extract_strided_slice %198 {offsets = [0, 64], sizes = [8, 32], strides = [1, 1]} : vector<8x96xf32> to vector<8x32xf32>
    %217 = arith.mulf %206, %216 : vector<8x32xf32>
    %218 = arith.addf %215, %217 : vector<8x32xf32>
    %219 = math.tanh %218 : vector<8x32xf32>
    %cst_53 = arith.constant 1.000000e+00 : f32
    %220 = vector.broadcast %cst_53 : f32 to vector<8x32xf32>
    %221 = arith.subf %220, %214 : vector<8x32xf32>
    %222 = arith.mulf %221, %219 : vector<8x32xf32>
    %223 = arith.mulf %214, %192 : vector<8x32xf32>
    %224 = arith.addf %222, %223 : vector<8x32xf32>
    %225 = vector.extract_strided_slice %93 {offsets = [0, 4, 0], sizes = [8, 1, 96], strides = [1, 1, 1]} : vector<8x8x96xf32> to vector<8x1x96xf32>
    %226 = vector.shape_cast %225 : vector<8x1x96xf32> to vector<8x96xf32>
    %227 = arith.truncf %224 : vector<8x32xf32> to vector<8x32xbf16>
    %cst_54 = arith.constant dense<0.000000e+00> : vector<8x96xf32>
    %228 = tpu.matmul %227, %94, %cst_54 {dimension_numbers = #tpu.dot_dimension_numbers<[1], [0], [0], [1], [0, 0, 1, 1], [], []>} : vector<8x32xbf16>, vector<32x96xbf16>, vector<8x96xf32> -> vector<8x96xf32>
    %229 = vector.broadcast %95 : vector<1x96xf32> to vector<8x96xf32>
    %230 = arith.addf %228, %229 : vector<8x96xf32>
    %231 = vector.extract_strided_slice %226 {offsets = [0, 0], sizes = [8, 32], strides = [1, 1]} : vector<8x96xf32> to vector<8x32xf32>
    %232 = vector.extract_strided_slice %230 {offsets = [0, 0], sizes = [8, 32], strides = [1, 1]} : vector<8x96xf32> to vector<8x32xf32>
    %233 = arith.addf %231, %232 : vector<8x32xf32>
    %234 = arith.negf %233 : vector<8x32xf32>
    %235 = math.exp %234 : vector<8x32xf32>
    %cst_55 = arith.constant 1.000000e+00 : f32
    %236 = vector.broadcast %cst_55 : f32 to vector<8x32xf32>
    %237 = arith.addf %236, %235 : vector<8x32xf32>
    %238 = arith.divf %236, %237 : vector<8x32xf32>
    %239 = vector.extract_strided_slice %226 {offsets = [0, 32], sizes = [8, 32], strides = [1, 1]} : vector<8x96xf32> to vector<8x32xf32>
    %240 = vector.extract_strided_slice %230 {offsets = [0, 32], sizes = [8, 32], strides = [1, 1]} : vector<8x96xf32> to vector<8x32xf32>
    %241 = arith.addf %239, %240 : vector<8x32xf32>
    %242 = arith.negf %241 : vector<8x32xf32>
    %243 = math.exp %242 : vector<8x32xf32>
    %cst_56 = arith.constant 1.000000e+00 : f32
    %244 = vector.broadcast %cst_56 : f32 to vector<8x32xf32>
    %245 = arith.addf %244, %243 : vector<8x32xf32>
    %246 = arith.divf %244, %245 : vector<8x32xf32>
    %247 = vector.extract_strided_slice %226 {offsets = [0, 64], sizes = [8, 32], strides = [1, 1]} : vector<8x96xf32> to vector<8x32xf32>
    %248 = vector.extract_strided_slice %230 {offsets = [0, 64], sizes = [8, 32], strides = [1, 1]} : vector<8x96xf32> to vector<8x32xf32>
    %249 = arith.mulf %238, %248 : vector<8x32xf32>
    %250 = arith.addf %247, %249 : vector<8x32xf32>
    %251 = math.tanh %250 : vector<8x32xf32>
    %cst_57 = arith.constant 1.000000e+00 : f32
    %252 = vector.broadcast %cst_57 : f32 to vector<8x32xf32>
    %253 = arith.subf %252, %246 : vector<8x32xf32>
    %254 = arith.mulf %253, %251 : vector<8x32xf32>
    %255 = arith.mulf %246, %224 : vector<8x32xf32>
    %256 = arith.addf %254, %255 : vector<8x32xf32>
    %257 = vector.extract_strided_slice %93 {offsets = [0, 5, 0], sizes = [8, 1, 96], strides = [1, 1, 1]} : vector<8x8x96xf32> to vector<8x1x96xf32>
    %258 = vector.shape_cast %257 : vector<8x1x96xf32> to vector<8x96xf32>
    %259 = arith.truncf %256 : vector<8x32xf32> to vector<8x32xbf16>
    %cst_58 = arith.constant dense<0.000000e+00> : vector<8x96xf32>
    %260 = tpu.matmul %259, %94, %cst_58 {dimension_numbers = #tpu.dot_dimension_numbers<[1], [0], [0], [1], [0, 0, 1, 1], [], []>} : vector<8x32xbf16>, vector<32x96xbf16>, vector<8x96xf32> -> vector<8x96xf32>
    %261 = vector.broadcast %95 : vector<1x96xf32> to vector<8x96xf32>
    %262 = arith.addf %260, %261 : vector<8x96xf32>
    %263 = vector.extract_strided_slice %258 {offsets = [0, 0], sizes = [8, 32], strides = [1, 1]} : vector<8x96xf32> to vector<8x32xf32>
    %264 = vector.extract_strided_slice %262 {offsets = [0, 0], sizes = [8, 32], strides = [1, 1]} : vector<8x96xf32> to vector<8x32xf32>
    %265 = arith.addf %263, %264 : vector<8x32xf32>
    %266 = arith.negf %265 : vector<8x32xf32>
    %267 = math.exp %266 : vector<8x32xf32>
    %cst_59 = arith.constant 1.000000e+00 : f32
    %268 = vector.broadcast %cst_59 : f32 to vector<8x32xf32>
    %269 = arith.addf %268, %267 : vector<8x32xf32>
    %270 = arith.divf %268, %269 : vector<8x32xf32>
    %271 = vector.extract_strided_slice %258 {offsets = [0, 32], sizes = [8, 32], strides = [1, 1]} : vector<8x96xf32> to vector<8x32xf32>
    %272 = vector.extract_strided_slice %262 {offsets = [0, 32], sizes = [8, 32], strides = [1, 1]} : vector<8x96xf32> to vector<8x32xf32>
    %273 = arith.addf %271, %272 : vector<8x32xf32>
    %274 = arith.negf %273 : vector<8x32xf32>
    %275 = math.exp %274 : vector<8x32xf32>
    %cst_60 = arith.constant 1.000000e+00 : f32
    %276 = vector.broadcast %cst_60 : f32 to vector<8x32xf32>
    %277 = arith.addf %276, %275 : vector<8x32xf32>
    %278 = arith.divf %276, %277 : vector<8x32xf32>
    %279 = vector.extract_strided_slice %258 {offsets = [0, 64], sizes = [8, 32], strides = [1, 1]} : vector<8x96xf32> to vector<8x32xf32>
    %280 = vector.extract_strided_slice %262 {offsets = [0, 64], sizes = [8, 32], strides = [1, 1]} : vector<8x96xf32> to vector<8x32xf32>
    %281 = arith.mulf %270, %280 : vector<8x32xf32>
    %282 = arith.addf %279, %281 : vector<8x32xf32>
    %283 = math.tanh %282 : vector<8x32xf32>
    %cst_61 = arith.constant 1.000000e+00 : f32
    %284 = vector.broadcast %cst_61 : f32 to vector<8x32xf32>
    %285 = arith.subf %284, %278 : vector<8x32xf32>
    %286 = arith.mulf %285, %283 : vector<8x32xf32>
    %287 = arith.mulf %278, %256 : vector<8x32xf32>
    %288 = arith.addf %286, %287 : vector<8x32xf32>
    %289 = vector.extract_strided_slice %93 {offsets = [0, 6, 0], sizes = [8, 1, 96], strides = [1, 1, 1]} : vector<8x8x96xf32> to vector<8x1x96xf32>
    %290 = vector.shape_cast %289 : vector<8x1x96xf32> to vector<8x96xf32>
    %291 = arith.truncf %288 : vector<8x32xf32> to vector<8x32xbf16>
    %cst_62 = arith.constant dense<0.000000e+00> : vector<8x96xf32>
    %292 = tpu.matmul %291, %94, %cst_62 {dimension_numbers = #tpu.dot_dimension_numbers<[1], [0], [0], [1], [0, 0, 1, 1], [], []>} : vector<8x32xbf16>, vector<32x96xbf16>, vector<8x96xf32> -> vector<8x96xf32>
    %293 = vector.broadcast %95 : vector<1x96xf32> to vector<8x96xf32>
    %294 = arith.addf %292, %293 : vector<8x96xf32>
    %295 = vector.extract_strided_slice %290 {offsets = [0, 0], sizes = [8, 32], strides = [1, 1]} : vector<8x96xf32> to vector<8x32xf32>
    %296 = vector.extract_strided_slice %294 {offsets = [0, 0], sizes = [8, 32], strides = [1, 1]} : vector<8x96xf32> to vector<8x32xf32>
    %297 = arith.addf %295, %296 : vector<8x32xf32>
    %298 = arith.negf %297 : vector<8x32xf32>
    %299 = math.exp %298 : vector<8x32xf32>
    %cst_63 = arith.constant 1.000000e+00 : f32
    %300 = vector.broadcast %cst_63 : f32 to vector<8x32xf32>
    %301 = arith.addf %300, %299 : vector<8x32xf32>
    %302 = arith.divf %300, %301 : vector<8x32xf32>
    %303 = vector.extract_strided_slice %290 {offsets = [0, 32], sizes = [8, 32], strides = [1, 1]} : vector<8x96xf32> to vector<8x32xf32>
    %304 = vector.extract_strided_slice %294 {offsets = [0, 32], sizes = [8, 32], strides = [1, 1]} : vector<8x96xf32> to vector<8x32xf32>
    %305 = arith.addf %303, %304 : vector<8x32xf32>
    %306 = arith.negf %305 : vector<8x32xf32>
    %307 = math.exp %306 : vector<8x32xf32>
    %cst_64 = arith.constant 1.000000e+00 : f32
    %308 = vector.broadcast %cst_64 : f32 to vector<8x32xf32>
    %309 = arith.addf %308, %307 : vector<8x32xf32>
    %310 = arith.divf %308, %309 : vector<8x32xf32>
    %311 = vector.extract_strided_slice %290 {offsets = [0, 64], sizes = [8, 32], strides = [1, 1]} : vector<8x96xf32> to vector<8x32xf32>
    %312 = vector.extract_strided_slice %294 {offsets = [0, 64], sizes = [8, 32], strides = [1, 1]} : vector<8x96xf32> to vector<8x32xf32>
    %313 = arith.mulf %302, %312 : vector<8x32xf32>
    %314 = arith.addf %311, %313 : vector<8x32xf32>
    %315 = math.tanh %314 : vector<8x32xf32>
    %cst_65 = arith.constant 1.000000e+00 : f32
    %316 = vector.broadcast %cst_65 : f32 to vector<8x32xf32>
    %317 = arith.subf %316, %310 : vector<8x32xf32>
    %318 = arith.mulf %317, %315 : vector<8x32xf32>
    %319 = arith.mulf %310, %288 : vector<8x32xf32>
    %320 = arith.addf %318, %319 : vector<8x32xf32>
    %321 = vector.extract_strided_slice %93 {offsets = [0, 7, 0], sizes = [8, 1, 96], strides = [1, 1, 1]} : vector<8x8x96xf32> to vector<8x1x96xf32>
    %322 = vector.shape_cast %321 : vector<8x1x96xf32> to vector<8x96xf32>
    %323 = arith.truncf %320 : vector<8x32xf32> to vector<8x32xbf16>
    %cst_66 = arith.constant dense<0.000000e+00> : vector<8x96xf32>
    %324 = tpu.matmul %323, %94, %cst_66 {dimension_numbers = #tpu.dot_dimension_numbers<[1], [0], [0], [1], [0, 0, 1, 1], [], []>} : vector<8x32xbf16>, vector<32x96xbf16>, vector<8x96xf32> -> vector<8x96xf32>
    %325 = vector.broadcast %95 : vector<1x96xf32> to vector<8x96xf32>
    %326 = arith.addf %324, %325 : vector<8x96xf32>
    %327 = vector.extract_strided_slice %322 {offsets = [0, 0], sizes = [8, 32], strides = [1, 1]} : vector<8x96xf32> to vector<8x32xf32>
    %328 = vector.extract_strided_slice %326 {offsets = [0, 0], sizes = [8, 32], strides = [1, 1]} : vector<8x96xf32> to vector<8x32xf32>
    %329 = arith.addf %327, %328 : vector<8x32xf32>
    %330 = arith.negf %329 : vector<8x32xf32>
    %331 = math.exp %330 : vector<8x32xf32>
    %cst_67 = arith.constant 1.000000e+00 : f32
    %332 = vector.broadcast %cst_67 : f32 to vector<8x32xf32>
    %333 = arith.addf %332, %331 : vector<8x32xf32>
    %334 = arith.divf %332, %333 : vector<8x32xf32>
    %335 = vector.extract_strided_slice %322 {offsets = [0, 32], sizes = [8, 32], strides = [1, 1]} : vector<8x96xf32> to vector<8x32xf32>
    %336 = vector.extract_strided_slice %326 {offsets = [0, 32], sizes = [8, 32], strides = [1, 1]} : vector<8x96xf32> to vector<8x32xf32>
    %337 = arith.addf %335, %336 : vector<8x32xf32>
    %338 = arith.negf %337 : vector<8x32xf32>
    %339 = math.exp %338 : vector<8x32xf32>
    %cst_68 = arith.constant 1.000000e+00 : f32
    %340 = vector.broadcast %cst_68 : f32 to vector<8x32xf32>
    %341 = arith.addf %340, %339 : vector<8x32xf32>
    %342 = arith.divf %340, %341 : vector<8x32xf32>
    %343 = vector.extract_strided_slice %322 {offsets = [0, 64], sizes = [8, 32], strides = [1, 1]} : vector<8x96xf32> to vector<8x32xf32>
    %344 = vector.extract_strided_slice %326 {offsets = [0, 64], sizes = [8, 32], strides = [1, 1]} : vector<8x96xf32> to vector<8x32xf32>
    %345 = arith.mulf %334, %344 : vector<8x32xf32>
    %346 = arith.addf %343, %345 : vector<8x32xf32>
    %347 = math.tanh %346 : vector<8x32xf32>
    %cst_69 = arith.constant 1.000000e+00 : f32
    %348 = vector.broadcast %cst_69 : f32 to vector<8x32xf32>
    %349 = arith.subf %348, %342 : vector<8x32xf32>
    %350 = arith.mulf %349, %347 : vector<8x32xf32>
    %351 = arith.mulf %342, %320 : vector<8x32xf32>
    %352 = arith.addf %350, %351 : vector<8x32xf32>
    %353 = tpu.concatenate %128, %160, %192, %224, %256, %288, %320, %352 in 1 : vector<8x32xf32>, vector<8x32xf32>, vector<8x32xf32>, vector<8x32xf32>, vector<8x32xf32>, vector<8x32xf32>, vector<8x32xf32>, vector<8x32xf32> -> vector<8x256xf32>
    %354 = arith.truncf %353 : vector<8x256xf32> to vector<8x256xbf16>
    %c0_70 = arith.constant 0 : index
    %c0_71 = arith.constant 0 : index
    %355 = vector.load %arg12[%c0_70, %c0_71] : memref<256x8xbf16, #tpu.memory_space<vmem>>, vector<256x8xbf16>
    %cst_72 = arith.constant dense<0.000000e+00> : vector<8x8xf32>
    %356 = tpu.matmul %354, %355, %cst_72 {dimension_numbers = #tpu.dot_dimension_numbers<[1], [0], [0], [1], [0, 0, 1, 1], [], []>} : vector<8x256xbf16>, vector<256x8xbf16>, vector<8x8xf32> -> vector<8x8xf32>
    %c0_73 = arith.constant 0 : index
    %c0_74 = arith.constant 0 : index
    %357 = vector.load %arg13[%c0_73, %c0_74] : memref<1x8xf32, #tpu.memory_space<vmem>>, vector<1x8xf32>
    %358 = vector.broadcast %357 : vector<1x8xf32> to vector<8x8xf32>
    %359 = arith.addf %356, %358 : vector<8x8xf32>
    %cst_75 = arith.constant 0.000000e+00 : f32
    %360 = vector.broadcast %cst_75 : f32 to vector<8x8xf32>
    %361 = arith.maximumf %359, %360 : vector<8x8xf32>
    %c0_76 = arith.constant 0 : index
    %c0_77 = arith.constant 0 : index
    %362 = vector.load %arg14[%c0_76, %c0_77] : memref<8x8xf32, #tpu.memory_space<vmem>>, vector<8x8xf32>
    tpu.vector_store %arg14[%c0_76, %c0_77], %361 {strides = array<i32>} : memref<8x8xf32, #tpu.memory_space<vmem>>, vector<8x8xf32>,
    return
  }
}

</mosaic_0001>

<bundles_post_ra>
// kernel: _lambda_.1
= control target key start
LH: loop header
LB: loop body
LE: loop exit
PB: predicated region body
PF: predicated region fallthrough
CT: control target
= control target key end

     0   :  { %vm93_vm0 = vcmask 392192   ;;  %s5506_s26 = smov 32   ;;  %vm233_vm1 = vcmask 97280   ;;  %vm511_vm2 = vcmask 1045504   ;;  %s5509_s29 = smov 12   ;;  %s8111_s2 = inlined_call_operand.vmem [shape: bf16[48,144], index: 2, kind: input, shape index: {}]   ;;  %s8112_s0 = inlined_call_operand.vmem [shape: f32[16,48], index: 0, kind: input, shape index: {}]   ;;  %s8113_s3 = inlined_call_operand.vmem [shape: f32[1,144], index: 3, kind: input, shape index: {}]   ;;  %s8114_s4 = inlined_call_operand.vmem [shape: bf16[48,12], index: 4, kind: input, shape index: {}]   ;;  %s8115_s5 = inlined_call_operand.vmem [shape: bf16[12,48], index: 5, kind: input, shape index: {}]   ;;  %s8116_s7 = inlined_call_operand.vmem [shape: f32[1,48], index: 7, kind: input, shape index: {}]   ;;  %s8117_s6 = inlined_call_operand.vmem [shape: bf16[48,48], index: 6, kind: input, shape index: {}]   ;;  %s8118_s10 = inlined_call_operand.vmem [shape: bf16[32,96], index: 10, kind: input, shape index: {}]   ;;  %s8119_s8 = inlined_call_operand.vmem [shape: bf16[24,96], index: 8, kind: input, shape index: {}]   ;;  %s8120_s11 = inlined_call_operand.vmem [shape: f32[1,96], index: 11, kind: input, shape index: {}]   ;;  %s8121_s9 = inlined_call_operand.vmem [shape: f32[1,96], index: 9, kind: input, shape index: {}]   ;;  %s8122_s1 = inlined_call_operand.vmem [shape: f32[64,12], index: 1, kind: input, shape index: {}]   ;;  %s8123_s12 = inlined_call_operand.vmem [shape: bf16[256,8], index: 12, kind: input, shape index: {}]   ;;  %s8124_s13 = inlined_call_operand.vmem [shape: f32[1,8], index: 13, kind: input, shape index: {}]   ;;  %s8125_s14 = inlined_call_operand.vmem [shape: f32[8,8], index: 14, kind: output, shape index: {}]  }
   0x1   :  { %v4764_v0 = vld [vmem:[%s8111_s2 + $0x20] sm:$0xf]  ;;  %v4973_v1 = vld [vmem:[%s8111_s2 + $0x24] sm:$0xf0]  ;;  %v4756_v2 = vld [vmem:[%s8111_s2 + $0x10] sm:$0xf] }
   0x2   :  { %v4765_v3 = vor.u32 %v4973_v1, %v4764_v0  ;;  %v4971_v4 = vld [vmem:[%s8111_s2 + $0x14] sm:$0xf0]  ;;  %v4972_v5 = vld [vmem:[%s8111_s2 + $0x24] sm:$0xf]  ;;  %v4766_v6 = vld [vmem:[%s8111_s2 + $0x28] sm:$0xf0] }
   0x3   :  { %v4757_v7 = vor.u32 %v4971_v4, %v4756_v2  ;;  %v4769_v8 = vor.u32 %v4972_v5, %v4766_v6  ;;  %v4970_v9 = vld [vmem:[%s8111_s2 + $0x14] sm:$0xf]  ;;  %v4758_v10 = vld [vmem:[%s8111_s2 + $0x18] sm:$0xf0]  ;;  %v4748_v11 = vld [vmem:[%s8111_s2] sm:$0xf] }
   0x4   :  { %102 = vmatpush.bf16.msra.mxu0 %v4765_v3  ;;  %v4969_v12 = vld [vmem:[%s8111_s2 + $0x4] sm:$0xf0]  ;;  %v4761_v13 = vor.u32 %v4970_v9, %v4758_v10  ;;  %v4968_v14 = vld [vmem:[%s8111_s2 + $0x4] sm:$0xf]  ;;  %v4750_v15 = vld [vmem:[%s8111_s2 + $0x8] sm:$0xf0] }
   0x5   :  { %116 = vmatpush.bf16.msra.mxu1 %v4769_v8  ;;  %v4749_v16 = vor.u32 %v4969_v12, %v4748_v11  ;;  %v48_v17 = vld [vmem:[%s8112_s0] sm:$0xff]  ;;  %v49_v18 = vld [vmem:[%s8112_s0 + $0x8] sm:$0xff]  ;;  %v4753_v19 = vor.u32 %v4968_v14, %v4750_v15  ;;  %s5507_s0 = smov 80   ;;  %v4976_v32 = vld [vmem:[%s8114_s4 + $0x10] sm:$0xff]  ;;  %s5510_s30 = smov 104  }
   0x6   :  { %v50_v20 = vpack.c.bf16 %v49_v18, %v48_v17  ;;  %v57_v21 = vld [vmem:[%s8113_s3] sm:$0x3]  ;;  %209 = vmatpush.bf16.msra.mxu2 %v4976_v32  ;;  %v4975_v33 = vld [vmem:[%s8114_s4 + $0x8] sm:$0xff]  ;;  %s5511_s15 = smov 116   ;;  %s5513_s21 = smov 64  }
   0x7   :  { %v59_v22 = vperm.slane %v57_v21, 0  ;;  %v60_v26 = vperm.slane %v57_v21, 1  ;;  %v4974_v34 = vld [vmem:[%s8114_s4] sm:$0xff]  ;;  %s5512_s4 = smov 92  }
   0x8   :  { %103 = vmatpush.bf16.msra.mxu0 %v4757_v7 }
   0x9   :  { %117 = vmatpush.bf16.msra.mxu1 %v4761_v13 }
   0xa   :  { %210 = vmatpush.bf16.msra.mxu2 %v4975_v33 }
   0xc   :  { %104 = vmatpush.bf16.msra.mxu0 %v4749_v16 }
   0xd   :  { %118 = vmatpush.bf16.msra.mxu1 %v4753_v19 }
   0xe   :  { %211 = vmatpush.bf16.msra.mxu2 %v4974_v34 }
   0xf   :  { %4770 = vmatmul.msk.bf16.vlgmr.msra.gmra.mxu0 %vm93_vm0, %v50_v20 }
  0x10   :  { %4771 = vmatmul.msk.bf16.vlgmr.msra.gmra.mxu1 %vm93_vm0, %v50_v20  ;;  %674 = vmatpush.bf16.msrb.mxu0 %v4976_v32 }
  0x14   :  { %675 = vmatpush.bf16.msrb.mxu0 %v4975_v33 }
  0x18   :  { %676 = vmatpush.bf16.msrb.mxu0 %v4974_v34 }
  0x8c   :  { %v106_v23 = vpop.f32.mrf.mxu0 }
  0x8d   :  { %v107_v24 = vadd.f32 %v106_v23, %v59_v22  ;;  %v120_v25 = vpop.f32.mrf.mxu1 }
  0x8e   :  { %v121_v27 = vadd.f32 %v120_v25, %v60_v26 }
  0x8f   :  { %545 = vrot.lane.b32.xlu1 %v107_v24, %s5506_s26  ;;  %159 = vrot.lane.b32.xlu0 %v107_v24, %s5507_s0  ;;  %v133_v35 = vmul.f32 0.5, %v107_v24 }
  0x91   :  { %v135_v36 = vrot.slane %v133_v35, 1  ;;  %v142_v37 = vperm.slane %v133_v35, 0  ;;  %v136_v48 = vrot.slane %v133_v35, 2  ;;  %v137_v49 = vrot.slane %v133_v35, 3 }
  0x92   :  { %v138_v0 = vrot.slane %v133_v35, 4  ;;  %v139_v1 = vrot.slane %v133_v35, 5  ;;  %v140_v14 = vrot.slane %v133_v35, 6  ;;  %v141_v15 = vrot.slane %v133_v35, 7 }
  0x93   :  { %v143_v38 = vperm.slane %v135_v36, 0  ;;  %v144_v53 = vperm.slane %v136_v48, 0  ;;  %v145_v54 = vperm.slane %v137_v49, 0 }
  0x94   :  { %v108_v28 = vpop.f32.mrf.mxu0  ;;  %v146_v3 = vperm.slane %v138_v0, 0  ;;  %v147_v4 = vperm.slane %v139_v1, 0  ;;  %v148_v17 = vperm.slane %v140_v14, 0  ;;  %v149_v18 = vperm.slane %v141_v15, 0 }
  0x95   :  { %v109_v29 = vadd.f32 %v108_v28, %v59_v22  ;;  %v122_v30 = vpop.f32.mrf.mxu1 }
  0x96   :  { %v123_v31 = vadd.f32 %v122_v30, %v60_v26 }
  0x97   :  { %1000 = vrot.lane.b32.xlu2 %v109_v29, %s5506_s26  ;;  %547 = vrot.lane.b32.xlu1 %v121_v27, %s5506_s26  ;;  %v616_v39 = vmul.f32 0.5, %v109_v29 }
  0x98   :  { %642 = vrot.lane.b32.xlu0 %v109_v29, %s5507_s0 }
  0x99   :  { %v618_v44 = vrot.slane %v616_v39, 1  ;;  %v625_v45 = vperm.slane %v616_v39, 0  ;;  %v619_v57 = vrot.slane %v616_v39, 2  ;;  %v620_v58 = vrot.slane %v616_v39, 3 }
  0x9a   :  { %v621_v7 = vrot.slane %v616_v39, 4  ;;  %v622_v8 = vrot.slane %v616_v39, 5  ;;  %v623_v21 = vrot.slane %v616_v39, 6  ;;  %v624_v22 = vrot.slane %v616_v39, 7 }
  0x9b   :  { %v626_v46 = vperm.slane %v618_v44, 0  ;;  %v627_v60 = vperm.slane %v619_v57, 0  ;;  %v628_v61 = vperm.slane %v620_v58, 0 }
  0x9c   :  { %v629_v10 = vperm.slane %v621_v7, 0  ;;  %v630_v11 = vperm.slane %v622_v8, 0  ;;  %v631_v24 = vperm.slane %v623_v21, 0  ;;  %v632_v25 = vperm.slane %v624_v22, 0 }
  0x9f   :  { %1002 = vrot.lane.b32.xlu2 %v123_v31, %s5506_s26 }
 0x101   :  { %v160_v40 = vpop.permute.xlu0 %159 }
 0x102   :  { %v162_v41 = vmul.f32 %v160_v40, %v142_v37  ;;  %v163_v42 = vmul.f32 %v160_v40, %v143_v38  ;;  %v164_v55 = vmul.f32 %v160_v40, %v144_v53  ;;  %v165_v56 = vmul.f32 %v160_v40, %v145_v54 }
 0x103   :  { %v166_v5 = vmul.f32 %v160_v40, %v146_v3  ;;  %v167_v6 = vmul.f32 %v160_v40, %v147_v4  ;;  %v168_v19 = vmul.f32 %v160_v40, %v148_v17  ;;  %v169_v20 = vmul.f32 %v160_v40, %v149_v18 }
 0x104   :  { %v170_v43 = vpack.c.bf16 %v163_v42, %v162_v41  ;;  %v171_v59 = vpack.c.bf16 %v165_v56, %v164_v55 }
 0x105   :  { %v172_v9 = vpack.c.bf16 %v167_v6, %v166_v5  ;;  %v173_v23 = vpack.c.bf16 %v169_v20, %v168_v19 }
 0x106   :  { %4784 = vmatmul.msk.bf16.vlgmr.msra.gmra.mxu2 %vm93_vm0, %v170_v43 }
 0x10a   :  { %v643_v47 = vpop.permute.xlu0 %642 }
 0x10b   :  { %v645_v50 = vmul.f32 %v643_v47, %v625_v45  ;;  %v646_v51 = vmul.f32 %v643_v47, %v626_v46  ;;  %v647_v62 = vmul.f32 %v643_v47, %v627_v60  ;;  %v648_v63 = vmul.f32 %v643_v47, %v628_v61 }
 0x10c   :  { %v649_v12 = vmul.f32 %v643_v47, %v629_v10  ;;  %v650_v13 = vmul.f32 %v643_v47, %v630_v11  ;;  %v651_v26 = vmul.f32 %v643_v47, %v631_v24  ;;  %v652_v27 = vmul.f32 %v643_v47, %v632_v25 }
 0x10d   :  { %v653_v52 = vpack.c.bf16 %v646_v51, %v645_v50  ;;  %v654_v2 = vpack.c.bf16 %v648_v63, %v647_v62 }
 0x10e   :  { %v655_v16 = vpack.c.bf16 %v650_v13, %v649_v12  ;;  %v656_v28 = vpack.c.bf16 %v652_v27, %v651_v26 }
 0x10f   :  { %4796 = vmatmul.msk.bf16.vlgmr.msrb.gmra.mxu0 %vm93_vm0, %v653_v52 }
 0x116   :  { %4785 = vmatmul.msk.bf16.gmra.mxu2 %vm93_vm0, %v171_v59 }
 0x11f   :  { %4797 = vmatmul.msk.bf16.gmra.mxu0 %vm93_vm0, %v654_v2 }
 0x126   :  { %4786 = vmatmul.msk.bf16.gmra.mxu2 %vm93_vm0, %v172_v9 }
 0x12f   :  { %4798 = vmatmul.msk.bf16.gmra.mxu0 %vm93_vm0, %v655_v16 }
 0x136   :  { %4787 = vmatmul.msk.bf16.gmra.mxu2 %vm93_vm0, %v173_v23 }
 0x13f   :  { %4799 = vmatmul.msk.bf16.gmra.mxu0 %vm93_vm0, %v656_v28 }
 0x189   :  { %v213_v29 = vpop.f32.mrf.mxu2 }
 0x18a   :  { %v234_v30 = vsel %vm233_vm1, %v213_v29, -inf }
 0x18b   :  { %v235_v31 = vrot.slane %v234_v30, 4 }
 0x18c   :  { %v678_v32 = vpop.f32.mrf.mxu0 }
 0x18d   :  { %v236_v33 = vmax.f32 %v234_v30, %v235_v31  ;;  %v698_v34 = vsel %vm233_vm1, %v678_v32, -inf }
 0x18e   :  { %v699_v35 = vrot.slane %v698_v34, 4 }
 0x18f   :  { %v237_v36 = vrot.slane %v236_v33, 2 }
 0x190   :  { %v700_v37 = vmax.f32 %v698_v34, %v699_v35 }
 0x191   :  { %v238_v38 = vmax.f32 %v236_v33, %v237_v36  ;;  %v215_v39 = vpop.f32.mrf.mxu2 }
 0x192   :  { %v701_v40 = vrot.slane %v700_v37, 2  ;;  %v241_v41 = vsel %vm233_vm1, %v215_v39, -inf }
 0x193   :  { %v239_v42 = vrot.slane %v238_v38, 1  ;;  %v242_v43 = vrot.slane %v241_v41, 4 }
 0x194   :  { %v702_v44 = vmax.f32 %v700_v37, %v701_v40  ;;  %v680_v45 = vpop.f32.mrf.mxu0 }
 0x195   :  { %v240_v46 = vmax.f32 %v238_v38, %v239_v42  ;;  %v243_v47 = vmax.f32 %v241_v41, %v242_v43  ;;  %v705_v48 = vsel %vm233_vm1, %v680_v45, -inf }
 0x196   :  { %v703_v49 = vrot.slane %v702_v44, 1  ;;  %v706_v50 = vrot.slane %v705_v48, 4 }
 0x197   :  { %v290_v51 = vsub.f32 %v213_v29, %v240_v46  ;;  %v244_v52 = vrot.slane %v243_v47, 2 }
 0x198   :  { %v704_v53 = vmax.f32 %v702_v44, %v703_v49  ;;  %v707_v54 = vmax.f32 %v705_v48, %v706_v50 }
 0x199   :  { %v298_v55 = vmul.f32 1.442695, %v290_v51  ;;  %v245_v56 = vmax.f32 %v243_v47, %v244_v52  ;;  %v218_v57 = vpop.f32.mrf.mxu2 }
 0x19a   :  { %v754_v58 = vsub.f32 %v678_v32, %v704_v53  ;;  %v708_v59 = vrot.slane %v707_v54, 2  ;;  %v248_v60 = vsel %vm233_vm1, %v218_v57, -inf }
 0x19b   :  { %5053 = vpow2.f32 %v298_v55  ;;  %v246_v61 = vrot.slane %v245_v56, 1  ;;  %v249_v62 = vrot.slane %v248_v60, 4 }
 0x19c   :  { %v762_v63 = vmul.f32 1.442695, %v754_v58  ;;  %v709_v0 = vmax.f32 %v707_v54, %v708_v59  ;;  %v683_v1 = vpop.f32.mrf.mxu0 }
 0x19d   :  { %v247_v2 = vmax.f32 %v245_v56, %v246_v61  ;;  %v250_v3 = vmax.f32 %v248_v60, %v249_v62  ;;  %v712_v4 = vsel %vm233_vm1, %v683_v1, -inf }
 0x19e   :  { %5055 = vpow2.f32 %v762_v63  ;;  %v710_v5 = vrot.slane %v709_v0, 1  ;;  %v713_v6 = vrot.slane %v712_v4, 4 }
 0x19f   :  { %v291_v7 = vsub.f32 %v215_v39, %v247_v2  ;;  %v251_v8 = vrot.slane %v250_v3, 2 }
 0x1a0   :  { %v711_v9 = vmax.f32 %v709_v0, %v710_v5  ;;  %v714_v10 = vmax.f32 %v712_v4, %v713_v6 }
 0x1a1   :  { %v5664_v11 = vpop.eup %5053  ;;  %v300_v12 = vmul.f32 1.442695, %v291_v7  ;;  %v252_v13 = vmax.f32 %v250_v3, %v251_v8  ;;  %v220_v14 = vpop.f32.mrf.mxu2 }
 0x1a2   :  { %v314_v15 = vsel %vm233_vm1, %v5664_v11, 0.0  ;;  %v755_v16 = vsub.f32 %v680_v45, %v711_v9  ;;  %v715_v17 = vrot.slane %v714_v10, 2  ;;  %v255_v18 = vsel %vm233_vm1, %v220_v14, -inf }
 0x1a3   :  { %v315_v19 = vrot.slane %v314_v15, 4  ;;  %5057 = vpow2.f32 %v300_v12  ;;  %v253_v20 = vrot.slane %v252_v13, 1  ;;  %v256_v21 = vrot.slane %v255_v18, 4 }
 0x1a4   :  { %v5669_v22 = vpop.eup %5055  ;;  %v764_v23 = vmul.f32 1.442695, %v755_v16  ;;  %v716_v24 = vmax.f32 %v714_v10, %v715_v17  ;;  %v5671_v25 = vpop.f32.mrf.mxu0 }
 0x1a5   :  { %v316_v26 = vadd.f32 %v315_v19, %v314_v15  ;;  %v778_v27 = vsel %vm233_vm1, %v5669_v22, 0.0  ;;  %v254_v28 = vmax.f32 %v252_v13, %v253_v20  ;;  %v257_v29 = vmax.f32 %v255_v18, %v256_v21 }
 0x1a6   :  { %v779_v30 = vrot.slane %v778_v27, 4  ;;  %5059 = vpow2.f32 %v764_v23  ;;  %v717_v31 = vrot.slane %v716_v24, 1  ;;  %v719_v32 = vsel %vm233_vm1, %v5671_v25, -inf }
 0x1a7   :  { %v317_v33 = vrot.slane %v316_v26, 2  ;;  %v292_v34 = vsub.f32 %v218_v57, %v254_v28  ;;  %v258_v35 = vrot.slane %v257_v29, 2  ;;  %v720_v36 = vrot.slane %v719_v32, 4 }
 0x1a8   :  { %v780_v37 = vadd.f32 %v779_v30, %v778_v27  ;;  %v718_v38 = vmax.f32 %v716_v24, %v717_v31 }
 0x1a9   :  { %v5677_v39 = vpop.eup %5057  ;;  %v318_v40 = vadd.f32 %v317_v33, %v316_v26  ;;  %v302_v41 = vmul.f32 1.442695, %v292_v34  ;;  %v259_v42 = vmax.f32 %v257_v29, %v258_v35  ;;  %v721_v43 = vmax.f32 %v719_v32, %v720_v36  ;;  %v5679_v44 = vpop.f32.mrf.mxu2 }
 0x1aa   :  { %v781_v45 = vrot.slane %v780_v37, 2  ;;  %v321_v46 = vsel %vm233_vm1, %v5677_v39, 0.0  ;;  %v756_v47 = vsub.f32 %v683_v1, %v718_v38  ;;  %v262_v48 = vsel %vm233_vm1, %v5679_v44, -inf }
 0x1ab   :  { %v319_v49 = vrot.slane %v318_v40, 1  ;;  %v322_v50 = vrot.slane %v321_v46, 4  ;;  %5061 = vpow2.f32 %v302_v41  ;;  %v260_v51 = vrot.slane %v259_v42, 1 }
 0x1ac   :  { %v5685_v52 = vpop.eup %5059  ;;  %v782_v53 = vadd.f32 %v781_v45, %v780_v37  ;;  %v766_v54 = vmul.f32 1.442695, %v756_v47  ;;  %v722_v55 = vrot.slane %v721_v43, 2  ;;  %v263_v56 = vrot.slane %v262_v48, 4  ;;  %v5687_v57 = vpop.f32.mrf.mxu0 }
 0x1ad   :  { %v323_v58 = vadd.f32 %v322_v50, %v321_v46  ;;  %v785_v59 = vsel %vm233_vm1, %v5685_v52, 0.0  ;;  %v261_v60 = vmax.f32 %v259_v42, %v260_v51  ;;  %v5691_v3 = vadd.f32 %v319_v49, %v318_v40 }
 0x1ae   :  { %v783_v61 = vrot.slane %v782_v53, 1  ;;  %v786_v62 = vrot.slane %v785_v59, 4  ;;  %5063 = vpow2.f32 %v766_v54  ;;  %v723_v63 = vmax.f32 %v721_v43, %v722_v55 }
 0x1af   :  { %v324_v0 = vrot.slane %v323_v58, 2  ;;  %v293_v1 = vsub.f32 %v220_v14, %v261_v60  ;;  %v264_v2 = vmax.f32 %v262_v48, %v263_v56  ;;  %v726_v6 = vsel %vm233_vm1, %v5687_v57, -inf }
 0x1b0   :  { %v787_v4 = vadd.f32 %v786_v62, %v785_v59  ;;  %v724_v5 = vrot.slane %v723_v63, 1  ;;  %v727_v10 = vrot.slane %v726_v6, 4  ;;  %v5699_v13 = vadd.f32 %v783_v61, %v782_v53 }
 0x1b1   :  { %v5695_v7 = vpop.eup %5061  ;;  %v304_v8 = vmul.f32 1.442695, %v293_v1  ;;  %v265_v9 = vrot.slane %v264_v2, 2  ;;  %v5697_v12 = vpop.f32.mrf.mxu2  ;;  %v325_v17 = vadd.f32 %v324_v0, %v323_v58  ;;  %vm375_vm3 = vweird.f32 %v5691_v3 }
 0x1b2   :  { %v788_v15 = vrot.slane %v787_v4, 2  ;;  %v328_v14 = vsel %vm233_vm1, %v5695_v7, 0.0  ;;  %v725_v16 = vmax.f32 %v723_v63, %v724_v5  ;;  %v728_v23 = vmax.f32 %v726_v6, %v727_v10 }
 0x1b3   :  { %v329_v18 = vrot.slane %v328_v14, 4  ;;  %5065 = vpow2.f32 %v304_v8  ;;  %v266_v19 = vmax.f32 %v264_v2, %v265_v9  ;;  %v269_v24 = vsel %vm233_vm1, %v5697_v12, -inf }
 0x1b4   :  { %v5703_v20 = vpop.eup %5063  ;;  %5067 = vrcp.f32 %v5691_v3  ;;  %v757_v21 = vsub.f32 %v5671_v25, %v725_v16  ;;  %v5709_v26 = vpop.f32.mrf.mxu0  ;;  %v789_v27 = vadd.f32 %v788_v15, %v787_v4  ;;  %v729_v33 = vrot.slane %v728_v23, 2 }
 0x1b5   :  { %v330_v28 = vadd.f32 %v329_v18, %v328_v14  ;;  %v792_v29 = vsel %vm233_vm1, %v5703_v20, 0.0  ;;  %v267_v30 = vrot.slane %v266_v19, 1  ;;  %5069 = vrcp.f32 %v5699_v13 }
 0x1b6   :  { %v793_v31 = vrot.slane %v792_v29, 4  ;;  %v768_v32 = vmul.f32 1.442695, %v757_v21  ;;  %v326_v34 = vrot.slane %v325_v17, 1  ;;  %v270_v36 = vrot.slane %v269_v24, 4 }
 0x1b7   :  { %v331_v35 = vrot.slane %v330_v28, 2  ;;  %v268_v25 = vmax.f32 %v266_v19, %v267_v30  ;;  %v730_v38 = vmax.f32 %v728_v23, %v729_v33  ;;  %v790_v41 = vrot.slane %v789_v27, 1 }
 0x1b8   :  { %v794_v37 = vadd.f32 %v793_v31, %v792_v29  ;;  %5071 = vpow2.f32 %v768_v32  ;;  %v271_v43 = vmax.f32 %v269_v24, %v270_v36  ;;  %v733_v45 = vsel %vm233_vm1, %v5709_v26, -inf }
 0x1b9   :  { %v5714_v40 = vpop.eup %5065  ;;  %v294_v42 = vsub.f32 %v5679_v44, %v268_v25  ;;  %v5719_v46 = vpop.f32.mrf.mxu2  ;;  %v332_v48 = vadd.f32 %v331_v35, %v330_v28  ;;  %v731_v51 = vrot.slane %v730_v38, 1  ;;  %v5725_v53 = vadd.f32 %v326_v34, %v325_v17 }
 0x1ba   :  { %v5721_v47 = vpop.eup %5067  ;;  %v795_v49 = vrot.slane %v794_v37, 2  ;;  %v335_v50 = vsel %vm233_vm1, %v5714_v40, 0.0  ;;  %v272_v56 = vrot.slane %v271_v43, 2  ;;  %v734_v60 = vrot.slane %v733_v45, 4 }
 0x1bb   :  { %v336_v54 = vrot.slane %v335_v50, 4  ;;  %v306_v55 = vmul.f32 1.442695, %v294_v42  ;;  %v5727_v44 = vpop.eup %5069  ;;  %v732_v59 = vmax.f32 %v730_v38, %v731_v51  ;;  %v276_v61 = vsel %vm233_vm1, %v5719_v46, -inf }
 0x1bc   :  { %v796_v58 = vadd.f32 %v795_v49, %v794_v37  ;;  %v5731_v62 = vadd.f32 %v790_v41, %v789_v27  ;;  %v273_v0 = vmax.f32 %v271_v43, %v272_v56  ;;  %v333_v2 = vrot.slane %v332_v48, 1  ;;  %v5736_v8 = vpop.f32.mrf.mxu0  ;;  %v4977_v56 = vld [vmem:[%s8115_s5] sm:$0x30] }
 0x1bd   :  { %v337_v63 = vadd.f32 %v336_v54, %v335_v50  ;;  %5073 = vpow2.f32 %v306_v55  ;;  %v758_v4 = vsub.f32 %v5687_v57, %v732_v59  ;;  %v735_v5 = vmax.f32 %v733_v45, %v734_v60  ;;  %v4790_v55 = vld [vmem:[%s8115_s5] sm:$0xf] }
 0x1be   :  { %v5733_v1 = vpop.eup %5071  ;;  %v277_v6 = vrot.slane %v276_v61, 4  ;;  %5075 = vrcp.f32 %v5725_v53  ;;  %v797_v9 = vrot.slane %v796_v58, 1  ;;  %v274_v15 = vrot.slane %v273_v0, 1 }
 0x1bf   :  { %v799_v10 = vsel %vm233_vm1, %v5733_v1, 0.0  ;;  %v338_v14 = vrot.slane %v337_v63, 2  ;;  %v770_v17 = vmul.f32 1.442695, %v758_v4  ;;  %v736_v18 = vrot.slane %v735_v5, 2 }
 0x1c0   :  { %v800_v16 = vrot.slane %v799_v10, 4  ;;  %5077 = vrcp.f32 %v5731_v62  ;;  %v275_v19 = vmax.f32 %v273_v0, %v274_v15  ;;  %v278_v21 = vmax.f32 %v276_v61, %v277_v6 }
 0x1c1   :  { %v740_v57 = vsel %vm233_vm1, %v5736_v8, -inf  ;;  %v5744_v23 = vadd.f32 %v333_v2, %v332_v48  ;;  %v737_v27 = vmax.f32 %v735_v5, %v736_v18  ;;  %v5748_v30 = vadd.f32 %v797_v9, %v796_v58  ;;  %v5751_v33 = vpop.f32.mrf.mxu2 }
 0x1c2   :  { %v801_v24 = vadd.f32 %v800_v16, %v799_v10  ;;  %v741_v28 = vrot.slane %v740_v57, 4  ;;  %5079 = vpow2.f32 %v770_v17  ;;  %v295_v31 = vsub.f32 %v5697_v12, %v275_v19 }
 0x1c3   :  { %v5746_v29 = vpop.eup %5073  ;;  %v279_v32 = vrot.slane %v278_v21, 2  ;;  %v339_v34 = vadd.f32 %v338_v14, %v337_v63  ;;  %v738_v25 = vrot.slane %v737_v27, 1  ;;  %5081 = vrcp.f32 %v5744_v23 }
 0x1c4   :  { %v342_v35 = vsel %vm233_vm1, %v5746_v29, 0.0  ;;  %v742_v36 = vmax.f32 %v740_v57, %v741_v28  ;;  %v5755_v37 = vpop.eup %5075  ;;  %v802_v38 = vrot.slane %v801_v24, 2  ;;  %v308_v42 = vmul.f32 1.442695, %v295_v31  ;;  %v5772_v5 = vpop.f32.mrf.mxu0 }
 0x1c5   :  { %v343_v41 = vrot.slane %v342_v35, 4  ;;  %v280_v43 = vmax.f32 %v278_v21, %v279_v32  ;;  %v739_v45 = vmax.f32 %v737_v27, %v738_v25  ;;  %v283_v12 = vsel %vm233_vm1, %v5751_v33, -inf }
 0x1c6   :  { %v743_v48 = vrot.slane %v742_v36, 2  ;;  %v5760_v49 = vpop.eup %5077  ;;  %5083 = vrcp.f32 %v5748_v30  ;;  %v284_v54 = vrot.slane %v283_v12, 4  ;;  %v340_v58 = vrot.slane %v339_v34, 1 }
 0x1c7   :  { %v344_v50 = vadd.f32 %v343_v41, %v342_v35  ;;  %v281_v51 = vrot.slane %v280_v43, 1  ;;  %5085 = vpow2.f32 %v308_v42  ;;  %v759_v59 = vsub.f32 %v5709_v26, %v739_v45 }
 0x1c8   :  { %v744_v60 = vmax.f32 %v742_v36, %v743_v48  ;;  %v5770_v61 = vpop.eup %5079  ;;  %v803_v63 = vadd.f32 %v802_v38, %v801_v24  ;;  %v285_v4 = vmax.f32 %v283_v12, %v284_v54  ;;  %v4791_v15 = vor.u32 %v4977_v56, %v4790_v55 }
 0x1c9   :  { %v345_v0 = vrot.slane %v344_v50, 2  ;;  %v282_v2 = vmax.f32 %v280_v43, %v281_v51  ;;  %v806_v6 = vsel %vm233_vm1, %v5770_v61, 0.0  ;;  %v772_v9 = vmul.f32 1.442695, %v759_v59  ;;  %v5777_v18 = vpop.eup %5081 }
 0x1ca   :  { %v745_v10 = vrot.slane %v744_v60, 1  ;;  %v807_v16 = vrot.slane %v806_v6, 4  ;;  %v286_v26 = vrot.slane %v285_v4, 2  ;;  %v5779_v19 = vadd.f32 %v340_v58, %v339_v34 }
 0x1cb   :  { %v346_v14 = vadd.f32 %v345_v0, %v344_v50  ;;  %v296_v17 = vsub.f32 %v5719_v46, %v282_v2  ;;  %v747_v57 = vsel %vm233_vm1, %v5772_v5, -inf  ;;  %v804_v27 = vrot.slane %v803_v63, 1 }
 0x1cc   :  { %v746_v21 = vmax.f32 %v744_v60, %v745_v10  ;;  %v5783_v24 = vpop.eup %5083  ;;  %v808_v28 = vadd.f32 %v807_v16, %v806_v6  ;;  %5087 = vpow2.f32 %v772_v9  ;;  %v287_v35 = vmax.f32 %v285_v4, %v286_v26 }
 0x1cd   :  { %v310_v31 = vmul.f32 1.442695, %v296_v17  ;;  %v5785_v32 = vpop.eup %5085  ;;  %v513_v25 = vsel %vm511_vm2, %v4791_v15, 0  ;;  %v748_v36 = vrot.slane %v747_v57, 4  ;;  %v347_v34 = vrot.slane %v346_v14, 1 }
 0x1ce   :  { %v760_v46 = vsub.f32 %v5736_v8, %v746_v21  ;;  %v809_v38 = vrot.slane %v808_v28, 2  ;;  %v349_v41 = vsel %vm233_vm1, %v5785_v32, 0.0  ;;  %977 = vmatpush.bf16.msrb.mxu1 %v513_v25  ;;  %522 = vmatpush.bf16.msra.mxu3 %v513_v25  ;;  %v288_v45 = vrot.slane %v287_v35, 1 }
 0x1cf   :  { %5089 = vpow2.f32 %v310_v31  ;;  %v350_v42 = vrot.slane %v349_v41, 4  ;;  %v749_v48 = vmax.f32 %v747_v57, %v748_v36  ;;  %v371_v8 = vmul.f32 %v5721_v47, %v5691_v3 }
 0x1d0   :  { %v774_v43 = vmul.f32 1.442695, %v760_v46  ;;  %5091 = vrcp.f32 %v5779_v19  ;;  %v810_v12 = vadd.f32 %v809_v38, %v808_v28  ;;  %v289_v51 = vmax.f32 %v287_v35, %v288_v45 }
 0x1d1   :  { %v351_v50 = vadd.f32 %v350_v42, %v349_v41  ;;  %v750_v54 = vrot.slane %v749_v48, 2  ;;  %v5795_v56 = vadd.f32 %v804_v27, %v803_v63  ;;  %v5797_v58 = vadd.f32 %v347_v34, %v346_v14 }
 0x1d2   :  { %5093 = vpow2.f32 %v774_v43  ;;  %v5793_v55 = vpop.eup %5087  ;;  %v811_v59 = vrot.slane %v810_v12, 1  ;;  %v372_v60 = vsub.f32 1.0, %v371_v8  ;;  %v297_v4 = vsub.f32 %v5751_v33, %v289_v51 }
 0x1d3   :  { %v352_v0 = vrot.slane %v351_v50, 2  ;;  %v813_v2 = vsel %vm233_vm1, %v5793_v55, 0.0  ;;  %v751_v6 = vmax.f32 %v749_v48, %v750_v54  ;;  %vm376_vm4 = vweird.f32 %v5721_v47 }
 0x1d4   :  { %v814_v10 = vrot.slane %v813_v2, 4  ;;  %v373_v15 = vmul.f32 %v5721_v47, %v372_v60  ;;  %v312_v16 = vmul.f32 1.442695, %v297_v4  ;;  %v379_v27 = vand.u32 2147483647, %v5691_v3  ;;  %vm5824_vm5 = vmor %vm375_vm3, %vm376_vm4 }
 0x1d5   :  { %v5802_v9 = vpop.eup %5089  ;;  %v353_v63 = vadd.f32 %v352_v0, %v351_v50  ;;  %v752_v17 = vrot.slane %v751_v6, 1  ;;  %v5815_v31 = vadd.f32 %v811_v59, %v810_v12  ;;  %v381_v35 = vand.u32 2147483648, %v5691_v3 }
 0x1d6   :  { %v356_v14 = vsel %vm233_vm1, %v5802_v9, 0.0  ;;  %v5809_v26 = vpop.eup %5091  ;;  %v815_v21 = vadd.f32 %v814_v10, %v813_v2  ;;  %v374_v57 = vadd.f32 %v5721_v47, %v373_v15  ;;  %5095 = vpow2.f32 %v312_v16 }
 0x1d7   :  { %v357_v33 = vrot.slane %v356_v14, 4  ;;  %v753_v46 = vmax.f32 %v751_v6, %v752_v17  ;;  %v354_v25 = vrot.slane %v353_v63, 1  ;;  %5097 = vrcp.f32 %v5795_v56 }
 0x1d8   :  { %v5813_v28 = vpop.eup %5093  ;;  %v816_v36 = vrot.slane %v815_v21, 2  ;;  %v378_v45 = vsel %vm5824_vm5, %v5721_v47, %v374_v57  ;;  %v382_v8 = vor.u32 1.1754944e-38, %v381_v35  ;;  %v386_v50 = vmul.f32 %v5755_v37, %v5725_v53 }
 0x1d9   :  { %v358_v34 = vadd.f32 %v357_v33, %v356_v14  ;;  %v820_v38 = vsel %vm233_vm1, %v5813_v28, 0.0  ;;  %v761_v43 = vsub.f32 %v5772_v5, %v753_v46  ;;  %5099 = vrcp.f32 %v5797_v58 }
 0x1da   :  { %v821_v42 = vrot.slane %v820_v38, 4  ;;  %v817_v48 = vadd.f32 %v816_v36, %v815_v21  ;;  %vm380_vm6 = vcmp.eq.f32.partialorder %v379_v27, 8.507059e+37  ;;  %5101 = vrcp.f32 %v5815_v31 }
 0x1db   :  { %v359_v12 = vrot.slane %v358_v34, 2  ;;  %v776_v51 = vmul.f32 1.442695, %v761_v43  ;;  %v5837_v54 = vadd.f32 %v354_v25, %v353_v63  ;;  %v383_v5 = vsel %vm380_vm6, %v382_v8, %v378_v45 }
 0x1dc   :  { %v822_v3 = vadd.f32 %v821_v42, %v820_v38  ;;  %v387_v59 = vsub.f32 1.0, %v386_v50  ;;  %v5839_v60 = vpop.eup %5095  ;;  %v818_v47 = vrot.slane %v817_v48, 1  ;;  %vm391_vm7 = vweird.f32 %v5755_v37 }
 0x1dd   :  { %v360_v0 = vadd.f32 %v359_v12, %v358_v34  ;;  %5103 = vpow2.f32 %v776_v51  ;;  %v363_v4 = vsel %vm233_vm1, %v5839_v60, 0.0  ;;  %v394_v10 = vand.u32 2147483647, %v5725_v53  ;;  %v5846_v15 = vpop.eup %5097 }
 0x1de   :  { %v823_v2 = vrot.slane %v822_v3, 2  ;;  %v388_v6 = vmul.f32 %v5755_v37, %v387_v59  ;;  %v364_v14 = vrot.slane %v363_v4, 4  ;;  %vm390_vm8 = vweird.f32 %v5725_v53 }
 0x1df   :  { %v396_v16 = vand.u32 2147483648, %v5725_v53  ;;  %5105 = vrcp.f32 %v5837_v54  ;;  %v384_v17 = vmul.f32 %v5664_v11, %v383_v5  ;;  %v835_v33 = vmul.f32 %v5727_v44, %v5699_v13  ;;  %v5855_v57 = vpop.eup %5099  ;;  %vm392_vm9 = vmor %vm390_vm8, %vm391_vm7 }
 0x1e0   :  { %v824_v63 = vadd.f32 %v823_v2, %v822_v3  ;;  %v389_v21 = vadd.f32 %v5755_v37, %v388_v6  ;;  %v5857_v27 = vadd.f32 %v818_v47, %v817_v48  ;;  %v361_v46 = vrot.slane %v360_v0, 1  ;;  %v5861_v53 = vpop.eup %5101 }
 0x1e1   :  { %v365_v35 = vadd.f32 %v364_v14, %v363_v4  ;;  %v397_v25 = vor.u32 1.1754944e-38, %v396_v16  ;;  %vm395_vm10 = vcmp.eq.f32.partialorder %v394_v10, 8.507059e+37  ;;  %v836_v34 = vsub.f32 1.0, %v835_v33 }
 0x1e2   :  { %v825_v36 = vrot.slane %v824_v63, 1  ;;  %v393_v11 = vsel %vm392_vm9, %v5755_v37, %v389_v21  ;;  %vm840_vm11 = vweird.f32 %v5727_v44  ;;  %v843_v43 = vand.u32 2147483647, %v5699_v13 }
 0x1e3   :  { %v5864_v38 = vpop.eup %5103  ;;  %v366_v41 = vrot.slane %v365_v35, 2  ;;  %v398_v42 = vsel %vm395_vm10, %v397_v25, %v393_v11  ;;  %v837_v12 = vmul.f32 %v5727_v44, %v836_v34  ;;  %v845_v8 = vand.u32 2147483648, %v5699_v13 }
 0x1e4   :  { %v827_v45 = vsel %vm233_vm1, %v5864_v38, 0.0  ;;  %v399_v48 = vmul.f32 %v5677_v39, %v398_v42  ;;  %v5873_v37 = vadd.f32 %v361_v46, %v360_v0  ;;  %vm839_vm12 = vweird.f32 %v5699_v13 }
 0x1e5   :  { %v367_v50 = vadd.f32 %v366_v41, %v365_v35  ;;  %v828_v3 = vrot.slane %v827_v45, 4  ;;  %v5876_v51 = vpop.eup %5105  ;;  %v5878_v5 = vadd.f32 %v825_v36, %v824_v63  ;;  %v838_v47 = vadd.f32 %v5727_v44, %v837_v12  ;;  %vm841_vm13 = vmor %vm839_vm12, %vm840_vm11 }
 0x1e6   :  { %v490_v59 = vpack.c.bf16 %v399_v48, %v384_v17  ;;  %v850_v39 = vmul.f32 %v5760_v49, %v5731_v62  ;;  %vm844_vm14 = vcmp.eq.f32.partialorder %v843_v43, 8.507059e+37  ;;  %v846_v0 = vor.u32 1.1754944e-38, %v845_v8 }
 0x1e7   :  { %v368_v2 = vrot.slane %v367_v50, 1  ;;  %v829_v4 = vadd.f32 %v828_v3, %v827_v45  ;;  %v842_v13 = vsel %vm841_vm13, %v5727_v44, %v838_v47  ;;  %v858_v10 = vand.u32 2147483647, %v5731_v62 }
 0x1e8   :  { %4792 = vmatmul.msk.bf16.vlgmr.msra.gmra.mxu3 %vm233_vm1, %v490_v59  ;;  %v851_v6 = vsub.f32 1.0, %v850_v39  ;;  %v860_v63 = vand.u32 2147483648, %v5731_v62  ;;  %5107 = vrcp.f32 %v5857_v27  ;;  %v847_v16 = vsel %vm844_vm14, %v846_v0, %v842_v13 }
 0x1e9   :  { %v830_v14 = vrot.slane %v829_v4, 2  ;;  %v401_v17 = vmul.f32 %v5777_v18, %v5744_v23  ;;  %5109 = vrcp.f32 %v5873_v37  ;;  %v5893_v21 = vadd.f32 %v368_v2, %v367_v50 }
 0x1ea   :  { %v852_v33 = vmul.f32 %v5760_v49, %v851_v6  ;;  %vm855_vm15 = vweird.f32 %v5760_v49  ;;  %5111 = vrcp.f32 %v5878_v5  ;;  %vm854_vm2 = vweird.f32 %v5731_v62 }
 0x1eb   :  { %v831_v44 = vadd.f32 %v830_v14, %v829_v4  ;;  %v402_v46 = vsub.f32 1.0, %v401_v17  ;;  %v848_v35 = vmul.f32 %v5669_v22, %v847_v16  ;;  %vm859_vm3 = vcmp.eq.f32.partialorder %v858_v10, 8.507059e+37  ;;  %vm856_vm4 = vmor %vm854_vm2, %vm855_vm15 }
 0x1ec   :  { %v853_v25 = vadd.f32 %v5760_v49, %v852_v33  ;;  %v861_v36 = vor.u32 1.1754944e-38, %v860_v63  ;;  %vm406_vm5 = vweird.f32 %v5777_v18  ;;  %v411_v34 = vand.u32 2147483648, %v5744_v23 }
 0x1ed   :  { %v403_v11 = vmul.f32 %v5777_v18, %v402_v46  ;;  %v416_v41 = vmul.f32 %v5809_v26, %v5779_v19  ;;  %5113 = vrcp.f32 %v5893_v21  ;;  %v832_v62 = vrot.slane %v831_v44, 1 }
 0x1ee   :  { %v857_v42 = vsel %vm856_vm4, %v5760_v49, %v853_v25  ;;  %v409_v22 = vand.u32 2147483647, %v5744_v23  ;;  %v5909_v43 = vpop.eup %5107  ;;  %vm405_vm6 = vweird.f32 %v5744_v23  ;;  %v424_v3 = vand.u32 2147483647, %v5779_v19 }
 0x1ef   :  { %v862_v45 = vsel %vm859_vm3, %v861_v36, %v857_v42  ;;  %v404_v48 = vadd.f32 %v5777_v18, %v403_v11  ;;  %v417_v12 = vsub.f32 1.0, %v416_v41  ;;  %v5913_v8 = vpop.eup %5109  ;;  %vm407_vm7 = vmor %vm405_vm6, %vm406_vm5  ;;  %v426_v59 = vand.u32 2147483648, %v5779_v19 }
 0x1f0   :  { %v863_v50 = vmul.f32 %v5685_v52, %v862_v45  ;;  %v865_v49 = vmul.f32 %v5783_v24, %v5748_v30  ;;  %v5920_v47 = vpop.eup %5111  ;;  %v412_v2 = vor.u32 1.1754944e-38, %v411_v34  ;;  %vm421_vm8 = vweird.f32 %v5809_v26 }
 0x1f1   :  { %v408_v39 = vsel %vm407_vm7, %v5777_v18, %v404_v48  ;;  %v418_v23 = vmul.f32 %v5809_v26, %v417_v12  ;;  %v5925_v4 = vadd.f32 %v832_v62, %v831_v44  ;;  %vm410_vm9 = vcmp.eq.f32.partialorder %v409_v22, 8.507059e+37 }
 0x1f2   :  { %v954_v52 = vpack.c.bf16 %v863_v50, %v848_v35  ;;  %vm420_vm10 = vweird.f32 %v5779_v19  ;;  %v413_v0 = vsel %vm410_vm9, %v412_v2, %v408_v39  ;;  %v866_v6 = vsub.f32 1.0, %v865_v49 }
 0x1f3   :  { %v419_v13 = vadd.f32 %v5809_v26, %v418_v23  ;;  %vm869_vm11 = vweird.f32 %v5748_v30  ;;  %v5930_v10 = vpop.eup %5113  ;;  %vm422_vm12 = vmor %vm420_vm10, %vm421_vm8  ;;  %vm425_vm13 = vcmp.eq.f32.partialorder %v424_v3, 8.507059e+37  ;;  %v427_v18 = vor.u32 1.1754944e-38, %v426_v59 }
 0x1f4   :  { %4800 = vmatmul.msk.bf16.vlgmr.msrb.gmra.mxu1 %vm233_vm1, %v954_v52  ;;  %v875_v63 = vand.u32 2147483648, %v5748_v30  ;;  %v880_v14 = vmul.f32 %v5846_v15, %v5795_v56  ;;  %v867_v16 = vmul.f32 %v5783_v24, %v866_v6  ;;  %vm870_vm14 = vweird.f32 %v5783_v24 }
 0x1f5   :  { %v423_v19 = vsel %vm422_vm12, %v5809_v26, %v419_v13  ;;  %v873_v17 = vand.u32 2147483647, %v5748_v30  ;;  %v414_v33 = vmul.f32 %v5695_v7, %v413_v0  ;;  %v888_v35 = vand.u32 2147483647, %v5795_v56  ;;  %vm871_vm2 = vmor %vm869_vm11, %vm870_vm14 }
 0x1f6   :  { %v428_v44 = vsel %vm425_vm13, %v427_v18, %v423_v19  ;;  %v881_v46 = vsub.f32 1.0, %v880_v14  ;;  %v868_v36 = vadd.f32 %v5783_v24, %v867_v16  ;;  %vm884_vm15 = vweird.f32 %v5795_v56 }
 0x1f7   :  { %v429_v25 = vmul.f32 %v5714_v40, %v428_v44  ;;  %v890_v26 = vand.u32 2147483648, %v5795_v56  ;;  %v876_v11 = vor.u32 1.1754944e-38, %v875_v63  ;;  %vm885_vm3 = vweird.f32 %v5846_v15 }
 0x1f8   :  { %v882_v34 = vmul.f32 %v5846_v15, %v881_v46  ;;  %v431_v7 = vmul.f32 %v5855_v57, %v5797_v58  ;;  %v872_v40 = vsel %vm871_vm2, %v5783_v24, %v868_v36  ;;  %vm874_vm4 = vcmp.eq.f32.partialorder %v873_v17, 8.507059e+37  ;;  %vm886_vm6 = vmor %vm884_vm15, %vm885_vm3 }
 0x1f9   :  { %v491_v41 = vpack.c.bf16 %v429_v25, %v414_v33  ;;  %v439_v62 = vand.u32 2147483647, %v5797_v58  ;;  %v877_v42 = vsel %vm874_vm4, %v876_v11, %v872_v40  ;;  %vm889_vm5 = vcmp.eq.f32.partialorder %v888_v35, 8.507059e+37 }
 0x1fa   :  { %v883_v22 = vadd.f32 %v5846_v15, %v882_v34  ;;  %v432_v30 = vsub.f32 1.0, %v431_v7  ;;  %v891_v45 = vor.u32 1.1754944e-38, %v890_v26  ;;  %vm435_vm7 = vweird.f32 %v5797_v58 }
 0x1fb   :  { %4793 = vmatmul.msk.bf16.gmra.mxu3 %vm233_vm1, %v491_v41  ;;  %v441_v48 = vand.u32 2147483648, %v5797_v58  ;;  %v446_v24 = vmul.f32 %v5876_v51, %v5837_v54  ;;  %v878_v12 = vmul.f32 %v5703_v20, %v877_v42  ;;  %vm436_vm8 = vweird.f32 %v5855_v57 }
 0x1fc   :  { %v887_v50 = vsel %vm886_vm6, %v5846_v15, %v883_v22  ;;  %v433_v3 = vmul.f32 %v5855_v57, %v432_v30  ;;  %vm5966_vm9 = vcmp.eq.f32.partialorder %v439_v62, 8.507059e+37  ;;  %v454_v39 = vand.u32 2147483647, %v5837_v54  ;;  %vm437_vm10 = vmor %vm435_vm7, %vm436_vm8 }
 0x1fd   :  { %v892_v59 = vsel %vm889_vm5, %v891_v45, %v887_v50  ;;  %v447_v49 = vsub.f32 1.0, %v446_v24  ;;  %v456_v20 = vand.u32 2147483648, %v5837_v54  ;;  %v895_v15 = vmul.f32 %v5861_v53, %v5815_v31 }
 0x1fe   :  { %v893_v2 = vmul.f32 %v5733_v1, %v892_v59  ;;  %v434_v23 = vadd.f32 %v5855_v57, %v433_v3  ;;  %v442_v52 = vor.u32 1.1754944e-38, %v441_v48  ;;  %vm450_vm11 = vweird.f32 %v5837_v54 }
 0x1ff   :  { %v448_v0 = vmul.f32 %v5876_v51, %v447_v49  ;;  %vm451_vm12 = vweird.f32 %v5876_v51  ;;  %v896_v6 = vsub.f32 1.0, %v895_v15  ;;  %vm899_vm13 = vweird.f32 %v5815_v31 }
 0x200   :  { %v955_v13 = vpack.c.bf16 %v893_v2, %v878_v12  ;;  %v438_v1 = vsel %vm437_vm10, %v5855_v57, %v434_v23  ;;  %vm455_vm14 = vcmp.eq.f32.partialorder %v454_v39, 8.507059e+37  ;;  %v910_v58 = vmul.f32 %v5909_v43, %v5857_v27  ;;  %vm452_vm15 = vmor %vm450_vm11, %vm451_vm12 }
 0x201   :  { %v443_v18 = vsel %vm5966_vm9, %v442_v52, %v438_v1  ;;  %v449_v63 = vadd.f32 %v5876_v51, %v448_v0  ;;  %v457_v14 = vor.u32 1.1754944e-38, %v456_v20  ;;  %v897_v54 = vmul.f32 %v5861_v53, %v896_v6 }
 0x202   :  { %vm900_vm2 = vweird.f32 %v5861_v53  ;;  %v903_v57 = vand.u32 2147483647, %v5815_v31  ;;  %v444_v19 = vmul.f32 %v5746_v29, %v443_v18  ;;  %v905_v17 = vand.u32 2147483648, %v5815_v31 }
 0x203   :  { %v453_v16 = vsel %vm452_vm15, %v5876_v51, %v449_v63  ;;  %v911_v33 = vsub.f32 1.0, %v910_v58  ;;  %v898_v46 = vadd.f32 %v5861_v53, %v897_v54  ;;  %vm915_vm3 = vweird.f32 %v5909_v43  ;;  %vm901_vm4 = vmor %vm899_vm13, %vm900_vm2 }
 0x204   :  { %4801 = vmatmul.msk.bf16.gmra.mxu1 %vm233_vm1, %v955_v13  ;;  %v458_v44 = vsel %vm455_vm14, %v457_v14, %v453_v16  ;;  %v920_v35 = vand.u32 2147483648, %v5857_v27  ;;  %v918_v29 = vand.u32 2147483647, %v5857_v27  ;;  %v461_v51 = vmul.f32 %v5913_v8, %v5873_v37 }
 0x205   :  { %v459_v25 = vmul.f32 %v5785_v32, %v458_v44  ;;  %v912_v36 = vmul.f32 %v5909_v43, %v911_v33  ;;  %5115 = vrcp.f32 %v5925_v4  ;;  %vm914_vm5 = vweird.f32 %v5857_v27 }
 0x206   :  { %v902_v11 = vsel %vm901_vm4, %v5861_v53, %v898_v46  ;;  %v462_v34 = vsub.f32 1.0, %v461_v51  ;;  %v906_v7 = vor.u32 1.1754944e-38, %v905_v17  ;;  %vm916_vm6 = vmor %vm914_vm5, %vm915_vm3  ;;  %v921_v41 = vor.u32 1.1754944e-38, %v920_v35 }
 0x207   :  { %v492_v26 = vpack.c.bf16 %v459_v25, %v444_v19  ;;  %v913_v32 = vadd.f32 %v5909_v43, %v912_v36  ;;  %v476_v40 = vmul.f32 %v5930_v10, %v5893_v21  ;;  %vm904_vm7 = vcmp.eq.f32.partialorder %v903_v57, 8.507059e+37  ;;  %v546_v36 = vpop.permute.xlu1 %545 }
 0x208   :  { %vm919_vm8 = vcmp.eq.f32.partialorder %v918_v29, 8.507059e+37  ;;  %v463_v31 = vmul.f32 %v5913_v8, %v462_v34  ;;  %v907_v42 = vsel %vm904_vm7, %v906_v7, %v902_v11  ;;  %vm466_vm9 = vweird.f32 %v5913_v8  ;;  %v1001_v29 = vpop.permute.xlu2 %1000 }
 0x209   :  { %v917_v62 = vsel %vm916_vm6, %v5909_v43, %v913_v32  ;;  %v477_v53 = vsub.f32 1.0, %v476_v40  ;;  %v471_v30 = vand.u32 2147483648, %v5873_v37  ;;  %vm481_vm10 = vweird.f32 %v5930_v10 }
 0x20a   :  { %v922_v27 = vsel %vm919_vm8, %v921_v41, %v917_v62  ;;  %v464_v22 = vadd.f32 %v5913_v8, %v463_v31  ;;  %v486_v45 = vand.u32 2147483648, %v5893_v21  ;;  %v484_v12 = vand.u32 2147483647, %v5893_v21 }
 0x20b   :  { %4794 = vmatmul.msk.bf16.gmra.mxu3 %vm233_vm1, %v492_v26  ;;  %v5116_v48 = vpop.eup %5115  ;;  %v923_v43 = vmul.f32 %v5793_v55, %v922_v27  ;;  %v478_v24 = vmul.f32 %v5930_v10, %v477_v53  ;;  %v925_v50 = vmul.f32 %v5920_v47, %v5878_v5  ;;  %vm465_vm11 = vweird.f32 %v5873_v37 }
 0x20c   :  { %v469_v3 = vand.u32 2147483647, %v5873_v37  ;;  %v908_v59 = vmul.f32 %v5770_v61, %v907_v42  ;;  %vm6031_vm12 = vmor %vm465_vm11, %vm466_vm9  ;;  %vm480_vm13 = vweird.f32 %v5893_v21  ;;  %v472_v2 = vor.u32 1.1754944e-38, %v471_v30 }
 0x20d   :  { %v479_v55 = vadd.f32 %v5930_v10, %v478_v24  ;;  %v926_v49 = vsub.f32 1.0, %v925_v50  ;;  %v468_v39 = vsel %vm6031_vm12, %v5913_v8, %v464_v22  ;;  %vm482_vm14 = vmor %vm480_vm13, %vm481_vm10  ;;  %v487_v61 = vor.u32 1.1754944e-38, %v486_v45 }
 0x20e   :  { %v940_v37 = vmul.f32 %v5116_v48, %v5925_v4  ;;  %v956_v23 = vpack.c.bf16 %v923_v43, %v908_v59  ;;  %vm485_vm15 = vcmp.eq.f32.partialorder %v484_v12, 8.507059e+37  ;;  %vm470_vm2 = vcmp.eq.f32.partialorder %v469_v3, 8.507059e+37 }
 0x20f   :  { %v483_v20 = vsel %vm482_vm14, %v5930_v10, %v479_v55  ;;  %v927_v15 = vmul.f32 %v5920_v47, %v926_v49  ;;  %v473_v0 = vsel %vm470_vm2, %v472_v2, %v468_v39  ;;  %vm945_vm3 = vweird.f32 %v5116_v48 }
 0x210   :  { %v488_v21 = vsel %vm485_vm15, %v487_v61, %v483_v20  ;;  %v941_v52 = vsub.f32 1.0, %v940_v37  ;;  %v950_v1 = vand.u32 2147483648, %v5925_v4  ;;  %vm930_vm4 = vweird.f32 %v5920_v47  ;;  %v1003_v11 = vpop.permute.xlu2 %1002 }
 0x211   :  { %v489_v13 = vmul.f32 %v5839_v60, %v488_v21  ;;  %v928_v6 = vadd.f32 %v5920_v47, %v927_v15  ;;  %v948_v10 = vand.u32 2147483647, %v5925_v4  ;;  %v474_v18 = vmul.f32 %v5802_v9, %v473_v0  ;;  %v4978_v21 = vld [vmem:[%s8117_s6] sm:$0xff] }
 0x212   :  { %v942_v8 = vmul.f32 %v5116_v48, %v941_v52  ;;  %v935_v63 = vand.u32 2147483648, %v5878_v5  ;;  %vm944_vm5 = vweird.f32 %v5925_v4  ;;  %vm929_vm6 = vweird.f32 %v5878_v5 }
 0x213   :  { %v933_v60 = vand.u32 2147483647, %v5878_v5  ;;  %vm946_vm7 = vmor %vm944_vm5, %vm945_vm3  ;;  %v493_v14 = vpack.c.bf16 %v489_v13, %v474_v18  ;;  %v951_v57 = vor.u32 1.1754944e-38, %v950_v1  ;;  %vm949_vm9 = vcmp.eq.f32.partialorder %v948_v10, 8.507059e+37  ;;  %v4980_v5 = vld [vmem:[%s8117_s6 + $0x10] sm:$0xff] }
 0x214   :  { %4802 = vmatmul.msk.bf16.gmra.mxu1 %vm233_vm1, %v956_v23  ;;  %v943_v58 = vadd.f32 %v5116_v48, %v942_v8  ;;  %vm931_vm8 = vmor %vm929_vm6, %vm930_vm4  ;;  %v936_v16 = vor.u32 1.1754944e-38, %v935_v63  ;;  %1146 = vmatpush.bf16.msrb.mxu3 %v4980_v5  ;;  %vm8126_vm11 = vcmask 261120   ;;  %vm1078_vm12 = vcmask 1041409  }
 0x215   :  { %v932_v19 = vsel %vm931_vm8, %v5920_v47, %v928_v6  ;;  %vm934_vm10 = vcmp.eq.f32.partialorder %v933_v60, 8.507059e+37  ;;  %v6071_v7 = vsel %vm8126_vm11, %v1001_v29, %v1003_v11  ;;  %vm1080_vm13 = vcmask 1042434  }
 0x216   :  { %v947_v54 = vsel %vm946_vm7, %v5116_v48, %v943_v58  ;;  %v937_v9 = vsel %vm934_vm10, %v936_v16, %v932_v19  ;;  %vm1082_vm14 = vcmask 1043459   ;;  %vm1084_vm15 = vcmask 1044484  }
 0x217   :  { %v952_v17 = vsel %vm949_vm9, %v951_v57, %v947_v54  ;;  %v938_v33 = vmul.f32 %v5813_v28, %v937_v9  ;;  %v4979_v28 = vld [vmem:[%s8117_s6 + $0x8] sm:$0xff]  ;;  %vm1086_vm2 = vcmask 1045509   ;;  %vm1088_vm3 = vcmask 1046534  }
 0x218   :  { %v953_v4 = vmul.f32 %v5864_v38, %v952_v17  ;;  %1147 = vmatpush.bf16.msrb.mxu3 %v4979_v28  ;;  %v548_v38 = vpop.permute.xlu1 %547  ;;  %vm1090_vm4 = vcmask 1047559   ;;  %vm1229_vm5 = vcmask 195584  }
 0x219   :  { %v6068_v34 = vsel %vm8126_vm11, %v546_v36, %v548_v38 }
 0x21a   :  { %v957_v44 = vpack.c.bf16 %v953_v4, %v938_v33 }
 0x21b   :  { %4795 = vmatmul.msk.bf16.gmra.mxu3 %vm233_vm1, %v493_v14 }
 0x21c   :  { %1148 = vmatpush.bf16.msrb.mxu3 %v4978_v21 }
 0x224   :  { %4803 = vmatmul.msk.bf16.gmra.mxu1 %vm233_vm1, %v957_v44 }
 0x26b   :  { %v524_v46 = vpop.f32.mrf.mxu3 }
 0x26c   :  { %v552_v41 = vmul.f32 %v6068_v34, %v524_v46 }
 0x26e   :  { %v560_v42 = vsel %vm93_vm0, %v552_v41, 0.0 }
 0x26f   :  { %v561_v22 = vrot.slane %v560_v42, 4 }
 0x271   :  { %v979_v47 = vpop.f32.mrf.mxu1  ;;  %v562_v3 = vadd.f32 %v561_v22, %v560_v42 }
 0x272   :  { %v1006_v62 = vmul.f32 %v6071_v7, %v979_v47 }
 0x273   :  { %v526_v35 = vpop.f32.mrf.mxu3  ;;  %v563_v52 = vrot.slane %v562_v3, 2 }
 0x274   :  { %v553_v31 = vmul.f32 %v6068_v34, %v526_v35  ;;  %v1014_v27 = vsel %vm93_vm0, %v1006_v62, 0.0 }
 0x275   :  { %v1015_v45 = vrot.slane %v1014_v27, 4  ;;  %v564_v19 = vadd.f32 %v563_v52, %v562_v3 }
 0x276   :  { %v567_v30 = vsel %vm93_vm0, %v553_v31, 0.0 }
 0x277   :  { %v568_v12 = vrot.slane %v567_v30, 4  ;;  %v1016_v56 = vadd.f32 %v1015_v45, %v1014_v27 }
 0x279   :  { %v981_v25 = vpop.f32.mrf.mxu1  ;;  %v569_v37 = vadd.f32 %v568_v12, %v567_v30  ;;  %v1017_v8 = vrot.slane %v1016_v56, 2 }
 0x27a   :  { %v1007_v24 = vmul.f32 %v6071_v7, %v981_v25 }
 0x27b   :  { %v570_v14 = vrot.slane %v569_v37, 2  ;;  %v1018_v5 = vadd.f32 %v1017_v8, %v1016_v56 }
 0x27c   :  { %v1021_v39 = vsel %vm93_vm0, %v1007_v24, 0.0 }
 0x27d   :  { %v1022_v1 = vrot.slane %v1021_v39, 4  ;;  %v571_v25 = vadd.f32 %v570_v14, %v569_v37  ;;  %v1019_v22 = vrot.slane %v1018_v5, 1 }
 0x27e   :  { %v529_v51 = vpop.f32.mrf.mxu3 }
 0x27f   :  { %v554_v48 = vmul.f32 %v6068_v34, %v529_v51  ;;  %v1023_v4 = vadd.f32 %v1022_v1, %v1021_v39  ;;  %v572_v30 = vrot.slane %v571_v25, 1  ;;  %v1020_v52 = vadd.f32 %v1019_v22, %v1018_v5 }
 0x281   :  { %v984_v26 = vpop.f32.mrf.mxu1  ;;  %v574_v55 = vsel %vm93_vm0, %v554_v48, 0.0  ;;  %v1024_v11 = vrot.slane %v1023_v4, 2 }
 0x282   :  { %v1008_v50 = vmul.f32 %v6071_v7, %v984_v26  ;;  %v575_v0 = vrot.slane %v574_v55, 4  ;;  %v565_v26 = vrot.slane %v564_v19, 1 }
 0x284   :  { %v1028_v23 = vsel %vm93_vm0, %v1008_v50, 0.0  ;;  %v576_v16 = vadd.f32 %v575_v0, %v574_v55  ;;  %v566_v3 = vadd.f32 %v565_v26, %v564_v19  ;;  %v573_v0 = vadd.f32 %v572_v30, %v571_v25 }
 0x285   :  { %v1029_v18 = vrot.slane %v1028_v23, 4 }
 0x286   :  { %v531_v32 = vpop.f32.mrf.mxu3  ;;  %v577_v28 = vrot.slane %v576_v16, 2 }
 0x287   :  { %v555_v59 = vmul.f32 %v6068_v34, %v531_v32  ;;  %v1030_v46 = vadd.f32 %v1029_v18, %v1028_v23 }
 0x289   :  { %v986_v40 = vpop.f32.mrf.mxu1  ;;  %v581_v13 = vsel %vm93_vm0, %v555_v59, 0.0  ;;  %v1031_v31 = vrot.slane %v1030_v46, 2 }
 0x28a   :  { %v1009_v2 = vmul.f32 %v6071_v7, %v986_v40  ;;  %v582_v54 = vrot.slane %v581_v13, 4 }
 0x28b   :  { %v1032_v39 = vadd.f32 %v1031_v31, %v1030_v46 }
 0x28c   :  { %v1035_v63 = vsel %vm93_vm0, %v1009_v2, 0.0  ;;  %v583_v36 = vadd.f32 %v582_v54, %v581_v13 }
 0x28d   :  { %v1036_v33 = vrot.slane %v1035_v63, 4  ;;  %v1033_v19 = vrot.slane %v1032_v39, 1 }
 0x28e   :  { %v534_v53 = vpop.f32.mrf.mxu3  ;;  %v584_v45 = vrot.slane %v583_v36, 2 }
 0x28f   :  { %v556_v49 = vmul.f32 %v6068_v34, %v534_v53  ;;  %v1037_v32 = vadd.f32 %v1036_v33, %v1035_v63 }
 0x290   :  { %v585_v23 = vadd.f32 %v584_v45, %v583_v36 }
 0x291   :  { %v989_v43 = vpop.f32.mrf.mxu1  ;;  %v588_v6 = vsel %vm93_vm0, %v556_v49, 0.0  ;;  %v1038_v59 = vrot.slane %v1037_v32, 2  ;;  %v1025_v49 = vadd.f32 %v1024_v11, %v1023_v4 }
 0x292   :  { %v1010_v20 = vmul.f32 %v6071_v7, %v989_v43  ;;  %v589_v17 = vrot.slane %v588_v6, 4  ;;  %v578_v43 = vadd.f32 %v577_v28, %v576_v16 }
 0x293   :  { %v1039_v1 = vadd.f32 %v1038_v59, %v1037_v32 }
 0x294   :  { %v1042_v57 = vsel %vm93_vm0, %v1010_v20, 0.0  ;;  %v590_v38 = vadd.f32 %v589_v17, %v588_v6  ;;  %v579_v13 = vrot.slane %v578_v43, 1 }
 0x295   :  { %v1043_v47 = vrot.slane %v1042_v57, 4  ;;  %v1040_v5 = vrot.slane %v1039_v1, 1 }
 0x296   :  { %v536_v61 = vpop.f32.mrf.mxu3  ;;  %v591_v24 = vrot.slane %v590_v38, 2 }
 0x297   :  { %v557_v15 = vmul.f32 %v6068_v34, %v536_v61  ;;  %v1044_v42 = vadd.f32 %v1043_v47, %v1042_v57  ;;  %v1026_v57 = vrot.slane %v1025_v49, 1 }
 0x298   :  { %v592_v8 = vadd.f32 %v591_v24, %v590_v38  ;;  %v1034_v38 = vadd.f32 %v1033_v19, %v1032_v39  ;;  %v1170_v19 = vld [vmem:[%s8122_s1 + $0x8] sm:$0xff] }
 0x299   :  { %v991_v10 = vpop.f32.mrf.mxu1  ;;  %v595_v60 = vsel %vm93_vm0, %v557_v15, 0.0  ;;  %v1045_v2 = vrot.slane %v1044_v42, 2 }
 0x29a   :  { %v1011_v58 = vmul.f32 %v6071_v7, %v991_v10  ;;  %v596_v44 = vrot.slane %v595_v60, 4  ;;  %v593_v17 = vrot.slane %v592_v8, 1 }
 0x29c   :  { %v1049_v9 = vsel %vm93_vm0, %v1011_v58, 0.0  ;;  %v597_v41 = vadd.f32 %v596_v44, %v595_v60  ;;  %v1046_v58 = vadd.f32 %v1045_v2, %v1044_v42  ;;  %v1079_v44 = vsel %vm1078_vm12, %v573_v0, %v566_v3  ;;  %v1215_v0 = vld [vmem:[%s8119_s8 + $0x8] sm:$0xf] }
 0x29d   :  { %v1050_v29 = vrot.slane %v1049_v9, 4  ;;  %v594_v11 = vadd.f32 %v593_v17, %v592_v8  ;;  %v1225_v8 = vunpack.c.l.b16 %v1215_v0 }
 0x29e   :  { %v539_v35 = vpop.f32.mrf.mxu3  ;;  %v598_v56 = vrot.slane %v597_v41, 2  ;;  %v1047_v25 = vrot.slane %v1046_v58, 1 }
 0x29f   :  { %v558_v51 = vmul.f32 %v6068_v34, %v539_v35  ;;  %v1051_v48 = vadd.f32 %v1050_v29, %v1049_v9  ;;  %v580_v35 = vadd.f32 %v579_v13, %v578_v43  ;;  %v1027_v29 = vadd.f32 %v1026_v57, %v1025_v49  ;;  %v1169_v57 = vld [vmem:[%s8122_s1] sm:$0xff] }
 0x2a0   :  { %v599_v6 = vadd.f32 %v598_v56, %v597_v41  ;;  %v5508_v13 = vmov 0  }
 0x2a1   :  { %v994_v40 = vpop.f32.mrf.mxu1  ;;  %v602_v62 = vsel %vm93_vm0, %v558_v51, 0.0  ;;  %v1052_v20 = vrot.slane %v1051_v48, 2  ;;  %v1081_v42 = vsel %vm1080_vm13, %v580_v35, %v1079_v44  ;;  %v1101_v30 = vsel %vm1078_vm12, %v1027_v29, %v1020_v52  ;;  %v6132_v52 = vld [vmem:[%s8118_s10] sm:$0xff] }
 0x2a2   :  { %v1012_v27 = vmul.f32 %v6071_v7, %v994_v40  ;;  %v603_v53 = vrot.slane %v602_v62, 4  ;;  %v600_v46 = vrot.slane %v599_v6, 1  ;;  %v1041_v40 = vadd.f32 %v1040_v5, %v1039_v1  ;;  %v6167_v35 = vld [vmem:[%s8120_s11] ss:$0 sm:$0xff] }
 0x2a3   :  { %v1053_v16 = vadd.f32 %v1052_v20, %v1051_v48  ;;  %v1102_v24 = vsel %vm1080_vm13, %v1034_v38, %v1101_v30  ;;  %v1227_v1 = vpack.c.b16 %v1225_v8, %v1225_v8 }
 0x2a4   :  { %v1056_v12 = vsel %vm93_vm0, %v1012_v27, 0.0  ;;  %v604_v50 = vadd.f32 %v603_v53, %v602_v62  ;;  %v601_v62 = vadd.f32 %v600_v46, %v599_v6  ;;  %v1048_v27 = vadd.f32 %v1047_v25, %v1046_v58 }
 0x2a5   :  { %v1057_v55 = vrot.slane %v1056_v12, 4  ;;  %v1054_v26 = vrot.slane %v1053_v16, 1  ;;  %v1103_v59 = vsel %vm1082_vm14, %v1041_v40, %v1102_v24 }
 0x2a6   :  { %v605_v61 = vrot.slane %v604_v50, 2  ;;  %v541_v37 = vpop.f32.mrf.mxu3  ;;  %v1104_v49 = vsel %vm1084_vm15, %v1048_v27, %v1103_v59 }
 0x2a7   :  { %v1058_v15 = vadd.f32 %v1057_v55, %v1056_v12  ;;  %v559_v21 = vmul.f32 %v6068_v34, %v541_v37  ;;  %v586_v34 = vrot.slane %v585_v23, 1  ;;  %v1055_v48 = vadd.f32 %v1054_v26, %v1053_v16 }
 0x2a8   :  { %v606_v60 = vadd.f32 %v605_v61, %v604_v50 }
 0x2a9   :  { %v1059_v10 = vrot.slane %v1058_v15, 2  ;;  %v996_v18 = vpop.f32.mrf.mxu1  ;;  %v609_v63 = vsel %vm93_vm0, %v559_v21, 0.0  ;;  %v587_v51 = vadd.f32 %v586_v34, %v585_v23  ;;  %v1105_v2 = vsel %vm1086_vm2, %v1055_v48, %v1104_v49  ;;  %v6126_v21 = vld [vmem:[%s8118_s10 + $0x8] sm:$0xff] }
 0x2aa   :  { %v1013_v14 = vmul.f32 %v6071_v7, %v996_v18  ;;  %v610_v54 = vrot.slane %v609_v63, 4  ;;  %v607_v36 = vrot.slane %v606_v60, 1  ;;  %1304 = vmatpush.bf16.msra.mxu3 %v6126_v21  ;;  %1681 = vmatpush.bf16.msra.mxu0 %v6126_v21  ;;  %v5049_v18 = vld [vmem:[%s8116_s7] ss:$0 sm:$0xff] }
 0x2ab   :  { %v1060_v9 = vadd.f32 %v1059_v10, %v1058_v15  ;;  %v1083_v45 = vsel %vm1082_vm14, %v587_v51, %v1081_v42  ;;  %3285 = vmatpush.bf16.msra.mxu1 %v6126_v21  ;;  %v1172_v42 = vld [vmem:[%s8122_s1 + $0x18] sm:$0xff] }
 0x2ac   :  { %v1063_v4 = vsel %vm93_vm0, %v1013_v14, 0.0  ;;  %v611_v33 = vadd.f32 %v610_v54, %v609_v63  ;;  %v608_v53 = vadd.f32 %v607_v36, %v606_v60  ;;  %v1085_v12 = vsel %vm1084_vm15, %v594_v11, %v1083_v45  ;;  %v4981_v54 = vld [vmem:[%s8119_s8] sm:$0xff] }
 0x2ad   :  { %v1064_v47 = vrot.slane %v1063_v4, 4  ;;  %v1061_v32 = vrot.slane %v1060_v9, 1  ;;  %v1087_v56 = vsel %vm1086_vm2, %v601_v62, %v1085_v12 }
 0x2ae   :  { %v612_v7 = vrot.slane %v611_v33, 2  ;;  %v1089_v39 = vsel %vm1088_vm3, %v608_v53, %v1087_v56  ;;  %1305 = vmatpush.bf16.msra.mxu3 %v6132_v52  ;;  %1682 = vmatpush.bf16.msra.mxu0 %v6132_v52 }
 0x2af   :  { %v1065_v28 = vadd.f32 %v1064_v47, %v1063_v4  ;;  %v1062_v50 = vadd.f32 %v1061_v32, %v1060_v9  ;;  %3286 = vmatpush.bf16.msra.mxu1 %v6132_v52 }
 0x2b0   :  { %v613_v41 = vadd.f32 %v612_v7, %v611_v33 }
 0x2b1   :  { %v1066_v31 = vrot.slane %v1065_v28, 2  ;;  %v1106_v23 = vsel %vm1088_vm3, %v1062_v50, %v1105_v2 }
 0x2b2   :  { %v614_v22 = vrot.slane %v613_v41, 1  ;;  %2884 = vmatpush.bf16.msrb.mxu0 %v6126_v21 }
 0x2b3   :  { %v1067_v43 = vadd.f32 %v1066_v31, %v1065_v28  ;;  %v6194_v28 = vld [vmem:[%s8121_s9] ss:$0 sm:$0xff]  ;;  %v1171_v31 = vld [vmem:[%s8122_s1 + $0x10] sm:$0xff] }
 0x2b4   :  { %v615_v3 = vadd.f32 %v614_v22, %v613_v41 }
 0x2b5   :  { %v1068_v55 = vrot.slane %v1067_v43, 1 }
 0x2b6   :  { %v1091_v37 = vsel %vm1090_vm4, %v615_v3, %v1089_v39  ;;  %2885 = vmatpush.bf16.msrb.mxu0 %v6132_v52 }
 0x2b7   :  { %v1069_v61 = vadd.f32 %v1068_v55, %v1067_v43 }
 0x2b9   :  { %v1107_v20 = vsel %vm1090_vm4, %v1069_v61, %v1106_v23  ;;  %v1173_v61 = vld [vmem:[%s8122_s1 + $0x20] sm:$0xff] }
 0x2ba   :  { %v1109_v15 = vpack.c.bf16 %v1107_v20, %v1091_v37  ;;  %v1174_v37 = vld [vmem:[%s8122_s1 + $0x28] sm:$0xff] }
 0x2bc   :  { %4816 = vmatmul.msk.bf16.vlgmr.msrb.gmra.mxu3 %vm93_vm0, %v1109_v15  ;;  %vm1242_vm0 = vcmask 1043456  }
 0x2bd   :  { %2082 = vmatpush.bf16.msrb.mxu3 %v6126_v21  ;;  %v1244_v6 = vsel %vm1242_vm0, %v1227_v1, 0 }
 0x2be   :  { %1252 = vmatpush.bf16.msrb.mxu2 %v1244_v6 }
 0x2c1   :  { %2083 = vmatpush.bf16.msrb.mxu3 %v6132_v52 }
 0x2c2   :  { %1253 = vmatpush.bf16.msrb.mxu2 %v4981_v54 }
 0x2cc   :  { %1306 = vmatmul.bf16.vlgmr.msra.gmra.mxu3 %v5508_v13 }
 0x2cd   :  { %2483 = vmatpush.bf16.msra.mxu3 %v6126_v21 }
 0x2d1   :  { %2484 = vmatpush.bf16.msra.mxu3 %v6132_v52 }
 0x33f   :  { %v1150_v10 = vpop.f32.mrf.mxu3 }
 0x340   :  { %v1151_v58 = vadd.f32 %v5049_v18, %v1150_v10 }
 0x347   :  { %v1152_v63 = vpop.f32.mrf.mxu3 }
 0x348   :  { %v1153_v60 = vadd.f32 %v5049_v18, %v1152_v63 }
 0x34a   :  { %v5019_v14 = vpack.i.bf16 %v1153_v60, %v1151_v58 }
 0x34c   :  { %5020 = vrot.lane.b32.xlu2 %v5019_v14, %s5509_s29  ;;  %5015 = vrot.lane.b32.xlu1 %v5019_v14, %s5510_s30 }
 0x34d   :  { %5010 = vrot.lane.b32.xlu0 %v5019_v14, %s5511_s15 }
 0x34f   :  { %v1307_v44 = vpop.f32.mrf.mxu3 }
 0x350   :  { %v6172_v25 = vadd.f32 %v6167_v35, %v1307_v44 }
 0x352   :  { %v1312_v7 = vrot.slane %v6172_v25, 1  ;;  %v1313_v29 = vrot.slane %v6172_v25, 2  ;;  %v1315_v51 = vrot.slane %v6172_v25, 4  ;;  %v1318_v26 = vrot.slane %v6172_v25, 7 }
 0x353   :  { %v1316_v32 = vrot.slane %v6172_v25, 5  ;;  %v1314_v3 = vrot.slane %v6172_v25, 3  ;;  %v1317_v55 = vrot.slane %v6172_v25, 6 }
 0x355   :  { %5025 = vrot.lane.b32.xlu0 %v5019_v14, %s5512_s4 }
 0x357   :  { %v1309_v47 = vpop.f32.mrf.mxu3 }
 0x358   :  { %v1175_v47 = vld [vmem:[%s8122_s1 + $0x30] sm:$0xff] }
 0x3a6   :  { %v5021_v34 = vpop.permute.xlu2 %5020 }
 0x3a7   :  { %v5023_v16 = vunpack.i.h.bf16 %v5021_v34  ;;  %v5022_v17 = vunpack.i.l.bf16 %v5021_v34 }
 0x3a9   :  { %v1202_v9 = vsel %vm233_vm1, %v1170_v19, %v5023_v16  ;;  %v1201_v4 = vsel %vm233_vm1, %v1169_v57, %v5022_v17 }
 0x3aa   :  { %v1209_v33 = vpack.c.bf16 %v1202_v9, %v1201_v4 }
 0x3ac   :  { %4821 = vmatmul.msk.bf16.vlgmr.msrb.gmra.mxu2 %vm1229_vm5, %v1209_v33 }
 0x3be   :  { %v5016_v5 = vpop.permute.xlu1 %5015 }
 0x3bf   :  { %v5011_v46 = vpop.permute.xlu0 %5010  ;;  %5035 = vrot.lane.b32.xlu2 %v5016_v5, %s5509_s29 }
 0x3c0   :  { %5030 = vrot.lane.b32.xlu1 %v5011_v46, %s5509_s29 }
 0x3c7   :  { %v5026_v36 = vpop.permute.xlu0 %5025  ;;  %1491 = vrot.lane.b32.xlu2 %v1313_v29, %s5513_s21 }
 0x3c8   :  { %5040 = vrot.lane.b32.xlu0 %v5026_v36, %s5509_s29  ;;  %1489 = vrot.lane.b32.xlu1 %v1312_v7, %s5513_s21  ;;  %v1176_v36 = vld [vmem:[%s8122_s1 + $0x38] sm:$0xff]  ;;  %s5514_s1 = smov 96  }
 0x3cf   :  { %1495 = vrot.lane.b32.xlu2 %v1315_v51, %s5513_s21 }
 0x3d0   :  { %1487 = vrot.lane.b32.xlu0 %v6172_v25, %s5513_s21  ;;  %1493 = vrot.lane.b32.xlu1 %v1314_v3, %s5513_s21 }
 0x3d7   :  { %1501 = vrot.lane.b32.xlu2 %v1318_v26, %s5513_s21 }
 0x3d8   :  { %1497 = vrot.lane.b32.xlu0 %v1316_v32, %s5513_s21  ;;  %1499 = vrot.lane.b32.xlu1 %v1317_v55, %s5513_s21 }
 0x419   :  { %v5036_v56 = vpop.permute.xlu2 %5035 }
 0x41a   :  { %v5038_v49 = vunpack.i.h.bf16 %v5036_v56  ;;  %v5037_v39 = vunpack.i.l.bf16 %v5036_v56 }
 0x41c   :  { %v1205_v13 = vsel %vm233_vm1, %v1173_v61, %v5037_v39  ;;  %v1206_v8 = vsel %vm233_vm1, %v1174_v37, %v5038_v49 }
 0x41d   :  { %v1211_v10 = vpack.c.bf16 %v1206_v8, %v1205_v13 }
 0x42f   :  { %v1255_v38 = vpop.f32.mrf.mxu2 }
 0x430   :  { %v6197_v11 = vadd.f32 %v6194_v28, %v1255_v38 }
 0x432   :  { %v1327_v41 = vadd.f32 %v6172_v25, %v6197_v11  ;;  %v5031_v62 = vpop.permute.xlu1 %5030 }
 0x433   :  { %v5033_v27 = vunpack.i.h.bf16 %v5031_v62  ;;  %v5032_v53 = vunpack.i.l.bf16 %v5031_v62 }
 0x434   :  { %v4833_v40 = vmul.f32 -1.442695, %v1327_v41 }
 0x435   :  { %v1203_v45 = vsel %vm233_vm1, %v1171_v31, %v5032_v53  ;;  %v1204_v48 = vsel %vm233_vm1, %v1172_v42, %v5033_v27 }
 0x436   :  { %5117 = vpow2.f32 %v4833_v40  ;;  %v1210_v43 = vpack.c.bf16 %v1204_v48, %v1203_v45 }
 0x437   :  { %v1257_v22 = vpop.f32.mrf.mxu2 }
 0x438   :  { %v6212_v30 = vadd.f32 %v6194_v28, %v1257_v22  ;;  %4822 = vmatmul.msk.bf16.gmra.mxu2 %vm1229_vm5, %v1210_v43 }
 0x43a   :  { %v1328_v24 = vadd.f32 %v1312_v7, %v6212_v30  ;;  %v5041_v20 = vpop.permute.xlu0 %5040  ;;  %v1490_v38 = vpop.permute.xlu1 %1489 }
 0x43b   :  { %v5043_v44 = vunpack.i.h.bf16 %v5041_v20  ;;  %v5042_v5 = vunpack.i.l.bf16 %v5041_v20 }
 0x43c   :  { %v5118_v12 = vpop.eup %5117  ;;  %v4834_v50 = vmul.f32 -1.442695, %v1328_v24 }
 0x43d   :  { %v1359_v59 = vadd.f32 1.0, %v5118_v12  ;;  %v1207_v62 = vsel %vm233_vm1, %v1175_v47, %v5042_v5  ;;  %v1208_v31 = vsel %vm233_vm1, %v1176_v36, %v5043_v44 }
 0x43e   :  { %5119 = vpow2.f32 %v4834_v50  ;;  %v1212_v27 = vpack.c.bf16 %v1208_v31, %v1207_v62 }
 0x43f   :  { %5121 = vrcp.f32 %v1359_v59  ;;  %v1378_v6 = vand.u32 2147483648, %v1359_v59  ;;  %v1376_v63 = vand.u32 2147483647, %v1359_v59  ;;  %vm1372_vm7 = vweird.f32 %v1359_v59 }
 0x441   :  { %v1379_v14 = vor.u32 1.1754944e-38, %v1378_v6  ;;  %vm1377_vm9 = vcmp.eq.f32.partialorder %v1376_v63, 8.507059e+37 }
 0x442   :  { %v1488_v54 = vpop.permute.xlu0 %1487 }
 0x444   :  { %v5120_v2 = vpop.eup %5119 }
 0x445   :  { %v5122_v23 = vpop.eup %5121  ;;  %v1360_v15 = vadd.f32 1.0, %v5120_v2 }
 0x446   :  { %v1368_v0 = vmul.f32 %v5122_v23, %v1359_v59  ;;  %vm1373_vm6 = vweird.f32 %v5122_v23 }
 0x447   :  { %5123 = vrcp.f32 %v1360_v15  ;;  %vm1374_vm8 = vmor %vm1372_vm7, %vm1373_vm6  ;;  %v1393_v9 = vand.u32 2147483648, %v1360_v15  ;;  %v1391_v33 = vand.u32 2147483647, %v1360_v15  ;;  %vm1387_vm0 = vweird.f32 %v1360_v15 }
 0x448   :  { %v1369_v1 = vsub.f32 1.0, %v1368_v0  ;;  %4823 = vmatmul.msk.bf16.gmra.mxu2 %vm1229_vm5, %v1211_v10 }
 0x449   :  { %v1394_v7 = vor.u32 1.1754944e-38, %v1393_v9  ;;  %vm1392_vm7 = vcmp.eq.f32.partialorder %v1391_v33, 8.507059e+37 }
 0x44a   :  { %v1370_v18 = vmul.f32 %v5122_v23, %v1369_v1 }
 0x44c   :  { %v1371_v58 = vadd.f32 %v5122_v23, %v1370_v18 }
 0x44d   :  { %v5124_v60 = vpop.eup %5123 }
 0x44e   :  { %v1375_v57 = vsel %vm1374_vm8, %v5122_v23, %v1371_v58  ;;  %v1383_v19 = vmul.f32 %v5124_v60, %v1360_v15  ;;  %vm1388_vm10 = vweird.f32 %v5124_v60 }
 0x44f   :  { %v6235_v34 = vsel %vm1377_vm9, %v1379_v14, %v1375_v57  ;;  %vm1389_vm6 = vmor %vm1387_vm0, %vm1388_vm10 }
 0x450   :  { %v1511_v16 = vmul.f32 %v1488_v54, %v6235_v34  ;;  %v1384_v17 = vsub.f32 1.0, %v1383_v19  ;;  %v1492_v19 = vpop.permute.xlu2 %1491 }
 0x452   :  { %1527 = vrot.lane.b32.xlu2 %v1511_v16, %s5513_s21  ;;  %v1385_v4 = vmul.f32 %v5124_v60, %v1384_v17 }
 0x454   :  { %v1386_v46 = vadd.f32 %v5124_v60, %v1385_v4 }
 0x456   :  { %v1390_v41 = vsel %vm1389_vm6, %v5124_v60, %v1386_v46 }
 0x457   :  { %v6245_v40 = vsel %vm1392_vm7, %v1394_v7, %v1390_v41 }
 0x458   :  { %v1512_v42 = vmul.f32 %v1490_v38, %v6245_v40  ;;  %4824 = vmatmul.msk.bf16.gmra.mxu2 %vm1229_vm5, %v1212_v27  ;;  %v1494_v38 = vpop.permute.xlu1 %1493 }
 0x45a   :  { %1529 = vrot.lane.b32.xlu0 %v1512_v42, %s5513_s21 }
 0x4bb   :  { %v1260_v53 = vpop.f32.mrf.mxu2 }
 0x4bc   :  { %v6253_v22 = vadd.f32 %v6194_v28, %v1260_v53 }
 0x4be   :  { %v1329_v45 = vadd.f32 %v1313_v29, %v6253_v22 }
 0x4c0   :  { %v4835_v48 = vmul.f32 -1.442695, %v1329_v45 }
 0x4c2   :  { %5125 = vpow2.f32 %v4835_v48 }
 0x4c3   :  { %v1262_v43 = vpop.f32.mrf.mxu2 }
 0x4c4   :  { %v6259_v24 = vadd.f32 %v6194_v28, %v1262_v43 }
 0x4c6   :  { %v1330_v12 = vadd.f32 %v1314_v3, %v6259_v24 }
 0x4c8   :  { %v5126_v50 = vpop.eup %5125  ;;  %v4836_v59 = vmul.f32 -1.442695, %v1330_v12  ;;  %v1498_v12 = vpop.permute.xlu0 %1497 }
 0x4c9   :  { %v1361_v56 = vadd.f32 1.0, %v5126_v50 }
 0x4ca   :  { %5127 = vpow2.f32 %v4836_v59 }
 0x4cb   :  { %v1265_v49 = vpop.f32.mrf.mxu2  ;;  %5129 = vrcp.f32 %v1361_v56  ;;  %v1408_v13 = vand.u32 2147483648, %v1361_v56  ;;  %vm1402_vm5 = vweird.f32 %v1361_v56 }
 0x4cc   :  { %v6265_v39 = vadd.f32 %v6194_v28, %v1265_v49 }
 0x4cd   :  { %v1409_v60 = vor.u32 1.1754944e-38, %v1408_v13 }
 0x4ce   :  { %v1331_v29 = vadd.f32 %v1315_v51, %v6265_v39  ;;  %v1406_v51 = vand.u32 2147483647, %v1361_v56 }
 0x4d0   :  { %v5128_v2 = vpop.eup %5127  ;;  %v4837_v61 = vmul.f32 -1.442695, %v1331_v29  ;;  %vm1407_vm9 = vcmp.eq.f32.partialorder %v1406_v51, 8.507059e+37 }
 0x4d1   :  { %v1362_v37 = vadd.f32 1.0, %v5128_v2  ;;  %v5130_v23 = vpop.eup %5129 }
 0x4d2   :  { %5131 = vpow2.f32 %v4837_v61  ;;  %v1398_v3 = vmul.f32 %v5130_v23, %v1361_v56  ;;  %vm1403_vm1 = vweird.f32 %v5130_v23 }
 0x4d3   :  { %v1267_v20 = vpop.f32.mrf.mxu2  ;;  %5133 = vrcp.f32 %v1362_v37  ;;  %vm1404_vm8 = vmor %vm1402_vm5, %vm1403_vm1  ;;  %v1423_v4 = vand.u32 2147483648, %v1362_v37  ;;  %v1421_v44 = vand.u32 2147483647, %v1362_v37  ;;  %vm1417_vm0 = vweird.f32 %v1362_v37 }
 0x4d4   :  { %v6271_v15 = vadd.f32 %v6194_v28, %v1267_v20  ;;  %v1399_v0 = vsub.f32 1.0, %v1398_v3  ;;  %v1496_v3 = vpop.permute.xlu2 %1495 }
 0x4d5   :  { %v1424_v41 = vor.u32 1.1754944e-38, %v1423_v4  ;;  %vm1422_vm7 = vcmp.eq.f32.partialorder %v1421_v44, 8.507059e+37 }
 0x4d6   :  { %v1332_v8 = vadd.f32 %v1316_v32, %v6271_v15  ;;  %v1400_v1 = vmul.f32 %v5130_v23, %v1399_v0 }
 0x4d8   :  { %v5132_v6 = vpop.eup %5131  ;;  %v4838_v10 = vmul.f32 -1.442695, %v1332_v8  ;;  %v1401_v63 = vadd.f32 %v5130_v23, %v1400_v1 }
 0x4d9   :  { %v5134_v18 = vpop.eup %5133  ;;  %v1363_v58 = vadd.f32 1.0, %v5132_v6  ;;  %v1530_v6 = vpop.permute.xlu0 %1529 }
 0x4da   :  { %v1413_v14 = vmul.f32 %v5134_v18, %v1362_v37  ;;  %5135 = vpow2.f32 %v4838_v10  ;;  %v1405_v57 = vsel %vm1404_vm8, %v5130_v23, %v1401_v63  ;;  %vm1418_vm10 = vweird.f32 %v5134_v18 }
 0x4db   :  { %v1270_v54 = vpop.f32.mrf.mxu2  ;;  %5137 = vrcp.f32 %v1363_v58  ;;  %v6279_v16 = vsel %vm1407_vm9, %v1409_v60, %v1405_v57  ;;  %vm1419_vm6 = vmor %vm1417_vm0, %vm1418_vm10  ;;  %v1438_v43 = vand.u32 2147483648, %v1363_v58  ;;  %v1436_v59 = vand.u32 2147483647, %v1363_v58 }
 0x4dc   :  { %v6277_v32 = vadd.f32 %v6194_v28, %v1270_v54  ;;  %v1414_v17 = vsub.f32 1.0, %v1413_v14  ;;  %v1513_v9 = vmul.f32 %v1492_v19, %v6279_v16  ;;  %vm1432_vm5 = vweird.f32 %v1363_v58  ;;  %v1502_v4 = vpop.permute.xlu2 %1501 }
 0x4dd   :  { %vm1437_vm9 = vcmp.eq.f32.partialorder %v1436_v59, 8.507059e+37  ;;  %v1552_v54 = vadd.f32 %v1530_v6, %v6212_v30 }
 0x4de   :  { %v1415_v33 = vmul.f32 %v5134_v18, %v1414_v17  ;;  %v1333_v5 = vadd.f32 %v1317_v55, %v6277_v32  ;;  %1531 = vrot.lane.b32.xlu1 %v1513_v9, %s5513_s21 }
 0x4e0   :  { %v5136_v46 = vpop.eup %5135  ;;  %v1416_v47 = vadd.f32 %v5134_v18, %v1415_v33  ;;  %v4839_v36 = vmul.f32 -1.442695, %v1333_v5 }
 0x4e1   :  { %v5138_v7 = vpop.eup %5137  ;;  %v1364_v62 = vadd.f32 1.0, %v5136_v46 }
 0x4e2   :  { %v1420_v31 = vsel %vm1419_vm6, %v5134_v18, %v1416_v47  ;;  %v1428_v42 = vmul.f32 %v5138_v7, %v1363_v58  ;;  %5139 = vpow2.f32 %v4839_v36  ;;  %vm1433_vm1 = vweird.f32 %v5138_v7  ;;  %v1500_v47 = vpop.permute.xlu1 %1499 }
 0x4e3   :  { %v6286_v27 = vsel %vm1422_vm7, %v1424_v41, %v1420_v31  ;;  %v1272_v53 = vpop.f32.mrf.mxu2  ;;  %5141 = vrcp.f32 %v1364_v62  ;;  %vm1434_vm8 = vmor %vm1432_vm5, %vm1433_vm1  ;;  %v1451_v1 = vand.u32 2147483647, %v1364_v62  ;;  %vm1447_vm0 = vweird.f32 %v1364_v62 }
 0x4e4   :  { %v1514_v55 = vmul.f32 %v1494_v38, %v6286_v27  ;;  %v6290_v45 = vadd.f32 %v6194_v28, %v1272_v53  ;;  %v1429_v48 = vsub.f32 1.0, %v1428_v42  ;;  %v1439_v28 = vor.u32 1.1754944e-38, %v1438_v43  ;;  %v1528_v43 = vpop.permute.xlu2 %1527 }
 0x4e5   :  { %vm1452_vm7 = vcmp.eq.f32.partialorder %v1451_v1, 8.507059e+37 }
 0x4e6   :  { %1533 = vrot.lane.b32.xlu0 %v1514_v55, %s5513_s21  ;;  %v1430_v50 = vmul.f32 %v5138_v7, %v1429_v48  ;;  %v1334_v56 = vadd.f32 %v1318_v26, %v6290_v45  ;;  %v1453_v26 = vand.u32 2147483648, %v1364_v62 }
 0x4e8   :  { %v5140_v49 = vpop.eup %5139  ;;  %v1431_v29 = vadd.f32 %v5138_v7, %v1430_v50  ;;  %v4840_v2 = vmul.f32 -1.442695, %v1334_v56  ;;  %v1454_v63 = vor.u32 1.1754944e-38, %v1453_v26  ;;  %v1551_v56 = vadd.f32 %v1528_v43, %v6197_v11 }
 0x4e9   :  { %v5142_v61 = vpop.eup %5141  ;;  %v1365_v37 = vadd.f32 1.0, %v5140_v49 }
 0x4ea   :  { %v1435_v23 = vsel %vm1434_vm8, %v5138_v7, %v1431_v29  ;;  %v1443_v20 = vmul.f32 %v5142_v61, %v1364_v62  ;;  %5143 = vpow2.f32 %v4840_v2  ;;  %vm1448_vm10 = vweird.f32 %v5142_v61 }
 0x4eb   :  { %v6296_v0 = vsel %vm1437_vm9, %v1439_v28, %v1435_v23  ;;  %5145 = vrcp.f32 %v1365_v37  ;;  %vm1449_vm6 = vmor %vm1447_vm0, %vm1448_vm10  ;;  %v1468_v9 = vand.u32 2147483648, %v1365_v37  ;;  %v1466_v44 = vand.u32 2147483647, %v1365_v37 }
 0x4ec   :  { %v1515_v13 = vmul.f32 %v1496_v3, %v6296_v0  ;;  %v1444_v25 = vsub.f32 1.0, %v1443_v20  ;;  %vm1462_vm5 = vweird.f32 %v1365_v37 }
 0x4ed   :  { %v1469_v36 = vor.u32 1.1754944e-38, %v1468_v9  ;;  %vm1467_vm9 = vcmp.eq.f32.partialorder %v1466_v44, 8.507059e+37 }
 0x4ee   :  { %1535 = vrot.lane.b32.xlu1 %v1515_v13, %s5513_s21  ;;  %v1445_v8 = vmul.f32 %v5142_v61, %v1444_v25 }
 0x4f0   :  { %v5144_v51 = vpop.eup %5143  ;;  %v1446_v10 = vadd.f32 %v5142_v61, %v1445_v8 }
 0x4f1   :  { %v5146_v18 = vpop.eup %5145  ;;  %v1366_v58 = vadd.f32 1.0, %v5144_v51 }
 0x4f2   :  { %v1450_v60 = vsel %vm1449_vm6, %v5142_v61, %v1446_v10  ;;  %v1458_v14 = vmul.f32 %v5146_v18, %v1365_v37  ;;  %vm1463_vm1 = vweird.f32 %v5146_v18 }
 0x4f3   :  { %v6301_v57 = vsel %vm1452_vm7, %v1454_v63, %v1450_v60  ;;  %5147 = vrcp.f32 %v1366_v58  ;;  %vm1464_vm8 = vmor %vm1462_vm5, %vm1463_vm1  ;;  %v1483_v53 = vand.u32 2147483648, %v1366_v58  ;;  %v1481_v48 = vand.u32 2147483647, %v1366_v58 }
 0x4f4   :  { %v1516_v19 = vmul.f32 %v1498_v12, %v6301_v57  ;;  %v1459_v17 = vsub.f32 1.0, %v1458_v14  ;;  %5149 = vtanh.f32 %v1552_v54  ;;  %vm1477_vm0 = vweird.f32 %v1366_v58 }
 0x4f5   :  { %v1484_v50 = vor.u32 1.1754944e-38, %v1483_v53  ;;  %vm1482_vm7 = vcmp.eq.f32.partialorder %v1481_v48, 8.507059e+37  ;;  %5151 = vtanh.f32 %v1551_v56  ;;  %v1568_v63 = vsub.f32 1.0, %v6245_v40 }
 0x4f6   :  { %1537 = vrot.lane.b32.xlu2 %v1516_v19, %s5513_s21  ;;  %v1460_v33 = vmul.f32 %v5146_v18, %v1459_v17  ;;  %v1616_v54 = vmul.f32 0.0, %v6245_v40  ;;  %v1569_v48 = vsub.f32 1.0, %v6279_v16 }
 0x4f8   :  { %v1461_v5 = vadd.f32 %v5146_v18, %v1460_v33 }
 0x4f9   :  { %v5148_v46 = vpop.eup %5147 }
 0x4fa   :  { %v1465_v7 = vsel %vm1464_vm8, %v5146_v18, %v1461_v5  ;;  %v1473_v38 = vmul.f32 %v5148_v46, %v1366_v58  ;;  %v5150_v42 = vpop.eup %5149  ;;  %vm1478_vm10 = vweird.f32 %v5148_v46  ;;  %v1615_v5 = vmul.f32 0.0, %v6235_v34 }
 0x4fb   :  { %v6305_v41 = vsel %vm1467_vm9, %v1469_v36, %v1465_v7  ;;  %vm1479_vm6 = vmor %vm1477_vm0, %vm1478_vm10  ;;  %v5152_v2 = vpop.eup %5151 }
 0x4fc   :  { %v1517_v62 = vmul.f32 %v1500_v47, %v6305_v41  ;;  %v1474_v31 = vsub.f32 1.0, %v1473_v38 }
 0x4fe   :  { %1585 = vrot.lane.b32.xlu2 %v5150_v42, %s5514_s1  ;;  %1539 = vrot.lane.b32.xlu0 %v1517_v62, %s5513_s21  ;;  %v1475_v55 = vmul.f32 %v5148_v46, %v1474_v31  ;;  %v1570_v42 = vsub.f32 1.0, %v6286_v27 }
 0x500   :  { %v1476_v12 = vadd.f32 %v5148_v46, %v1475_v55  ;;  %v1618_v55 = vmul.f32 0.0, %v6286_v27 }
 0x502   :  { %v1480_v59 = vsel %vm1479_vm6, %v5148_v46, %v1476_v12  ;;  %v1617_v12 = vmul.f32 0.0, %v6279_v16 }
 0x503   :  { %v6311_v49 = vsel %vm1482_vm7, %v1484_v50, %v1480_v59 }
 0x504   :  { %v1518_v29 = vmul.f32 %v1502_v4, %v6311_v49  ;;  %v1567_v4 = vsub.f32 1.0, %v6235_v34 }
 0x506   :  { %1541 = vrot.lane.b32.xlu1 %v1518_v29, %s5513_s21 }
 0x50e   :  { %1583 = vrot.lane.b32.xlu1 %v5152_v2, %s5514_s1 }
 0x550   :  { %v1538_v61 = vpop.permute.xlu2 %1537  ;;  %v1532_v37 = vpop.permute.xlu1 %1531 }
 0x551   :  { %v1556_v28 = vadd.f32 %v1538_v61, %v6271_v15  ;;  %v1553_v23 = vadd.f32 %v1532_v37, %v6253_v22 }
 0x553   :  { %5153 = vtanh.f32 %v1556_v28 }
 0x554   :  { %5155 = vtanh.f32 %v1553_v23 }
 0x558   :  { %v1534_v20 = vpop.permute.xlu0 %1533  ;;  %v1586_v18 = vpop.permute.xlu2 %1585 }
 0x559   :  { %v5154_v3 = vpop.eup %5153  ;;  %v1554_v13 = vadd.f32 %v1534_v20, %v6259_v24  ;;  %v1608_v58 = vmul.f32 %v1586_v18, %v1568_v63  ;;  %v1620_v18 = vmul.f32 0.0, %v6301_v57  ;;  %v1621_v63 = vmul.f32 0.0, %v6305_v41 }
 0x55a   :  { %v5156_v25 = vpop.eup %5155  ;;  %1593 = vrot.lane.b32.xlu1 %v5154_v3, %s5514_s1  ;;  %v1572_v3 = vsub.f32 1.0, %v6301_v57 }
 0x55b   :  { %5157 = vtanh.f32 %v1554_v13  ;;  %1587 = vrot.lane.b32.xlu0 %v5156_v25, %s5514_s1  ;;  %v6329_v17 = vadd.f32 %v1616_v54, %v1608_v58  ;;  %v1573_v25 = vsub.f32 1.0, %v6305_v41  ;;  %v1571_v54 = vsub.f32 1.0, %v6296_v0 }
 0x55d   :  { %v1632_v9 = vpack.c.bf16 %v6329_v17, %v6329_v17  ;;  %v2001_v29 = vrot.slane %v6329_v17, 7 }
 0x55f   :  { %v1648_v40 = vunpack.c.l.b16 %v1632_v9  ;;  %v1619_v9 = vmul.f32 0.0, %v6296_v0 }
 0x560   :  { %v1536_v26 = vpop.permute.xlu1 %1535 }
 0x561   :  { %v5158_v8 = vpop.eup %5157  ;;  %v1555_v1 = vadd.f32 %v1536_v26, %v6265_v39  ;;  %v1655_v7 = vrot.slane %v1648_v40, 7 }
 0x562   :  { %1589 = vrot.lane.b32.xlu2 %v5158_v8, %s5514_s1 }
 0x563   :  { %5159 = vtanh.f32 %v1555_v1 }
 0x569   :  { %v5160_v51 = vpop.eup %5159 }
 0x56a   :  { %1591 = vrot.lane.b32.xlu0 %v5160_v51, %s5514_s1 }
 0x570   :  { %v1540_v6 = vpop.permute.xlu0 %1539 }
 0x571   :  { %v1557_v10 = vadd.f32 %v1540_v6, %v6277_v32 }
 0x573   :  { %5161 = vtanh.f32 %v1557_v10 }
 0x578   :  { %v1542_v60 = vpop.permute.xlu1 %1541 }
 0x579   :  { %v5162_v14 = vpop.eup %5161  ;;  %v1558_v19 = vadd.f32 %v1542_v60, %v6290_v45 }
 0x57a   :  { %1595 = vrot.lane.b32.xlu2 %v5162_v14, %s5514_s1 }
 0x57b   :  { %5163 = vtanh.f32 %v1558_v19 }
 0x580   :  { %v1584_v33 = vpop.permute.xlu1 %1583 }
 0x581   :  { %v5164_v44 = vpop.eup %5163  ;;  %v1607_v46 = vmul.f32 %v1584_v33, %v1567_v4 }
 0x582   :  { %1597 = vrot.lane.b32.xlu0 %v5164_v44, %s5514_s1 }
 0x583   :  { %v6336_v47 = vadd.f32 %v1615_v5, %v1607_v46 }
 0x585   :  { %v1631_v36 = vpack.c.bf16 %v6336_v47, %v6336_v47  ;;  %v4438_v61 = vsel %vm1078_vm12, %v2001_v29, %v6336_v47 }
 0x587   :  { %v1647_v38 = vunpack.c.l.b16 %v1631_v36 }
 0x589   :  { %v1656_v62 = vsel %vm1078_vm12, %v1655_v7, %v1647_v38 }
 0x5bc   :  { %v1590_v31 = vpop.permute.xlu2 %1589 }
 0x5bd   :  { %v1610_v53 = vmul.f32 %v1590_v31, %v1570_v42 }
 0x5bf   :  { %v6343_v34 = vadd.f32 %v1618_v55, %v1610_v53 }
 0x5c1   :  { %v1634_v59 = vpack.c.bf16 %v6343_v34, %v6343_v34  ;;  %v4441_v16 = vrot.slane %v6343_v34, 5 }
 0x5c3   :  { %v1650_v28 = vunpack.c.l.b16 %v1634_v59 }
 0x5c5   :  { %v1659_v51 = vrot.slane %v1650_v28, 5 }
 0x5cc   :  { %v1594_v37 = vpop.permute.xlu1 %1593 }
 0x5cd   :  { %v1588_v43 = vpop.permute.xlu0 %1587  ;;  %v1612_v1 = vmul.f32 %v1594_v37, %v1572_v3 }
 0x5ce   :  { %v1609_v50 = vmul.f32 %v1588_v43, %v1569_v48 }
 0x5cf   :  { %v6368_v60 = vadd.f32 %v1620_v18, %v1612_v1 }
 0x5d0   :  { %v6349_v56 = vadd.f32 %v1617_v12, %v1609_v50  ;;  %v1574_v50 = vsub.f32 1.0, %v6311_v49 }
 0x5d1   :  { %v1636_v33 = vpack.c.bf16 %v6368_v60, %v6368_v60  ;;  %v4445_v40 = vrot.slane %v6368_v60, 3 }
 0x5d2   :  { %v1633_v2 = vpack.c.bf16 %v6349_v56, %v6349_v56  ;;  %v4439_v27 = vrot.slane %v6349_v56, 6 }
 0x5d3   :  { %v1652_v46 = vunpack.c.l.b16 %v1636_v33 }
 0x5d4   :  { %v1649_v23 = vunpack.c.l.b16 %v1633_v2  ;;  %v4440_v20 = vsel %vm1080_vm13, %v4439_v27, %v4438_v61  ;;  %v1596_v13 = vpop.permute.xlu2 %1595  ;;  %v1622_v2 = vmul.f32 0.0, %v6311_v49 }
 0x5d5   :  { %v4442_v26 = vsel %vm1082_vm14, %v4441_v16, %v4440_v20  ;;  %v1613_v6 = vmul.f32 %v1596_v13, %v1573_v25  ;;  %v1663_v53 = vrot.slane %v1652_v46, 3 }
 0x5d6   :  { %v1657_v8 = vrot.slane %v1649_v23, 6 }
 0x5d7   :  { %v6370_v14 = vadd.f32 %v1621_v63, %v1613_v6 }
 0x5d8   :  { %v1658_v10 = vsel %vm1080_vm13, %v1657_v8, %v1656_v62 }
 0x5d9   :  { %v1660_v58 = vsel %vm1082_vm14, %v1659_v51, %v1658_v10  ;;  %v1637_v57 = vpack.c.bf16 %v6370_v14, %v6370_v14  ;;  %v4447_v0 = vrot.slane %v6370_v14, 2 }
 0x5db   :  { %v1653_v36 = vunpack.c.l.b16 %v1637_v57 }
 0x5dc   :  { %v1592_v19 = vpop.permute.xlu0 %1591 }
 0x5dd   :  { %v1611_v4 = vmul.f32 %v1592_v19, %v1571_v54  ;;  %v1665_v55 = vrot.slane %v1653_v36, 2 }
 0x5df   :  { %v6378_v44 = vadd.f32 %v1619_v9, %v1611_v4 }
 0x5e1   :  { %v1635_v41 = vpack.c.bf16 %v6378_v44, %v6378_v44  ;;  %v4443_v5 = vrot.slane %v6378_v44, 4 }
 0x5e3   :  { %v1651_v7 = vunpack.c.l.b16 %v1635_v41  ;;  %v4444_v38 = vsel %vm1084_vm15, %v4443_v5, %v4442_v26 }
 0x5e4   :  { %v4446_v62 = vsel %vm1086_vm2, %v4445_v40, %v4444_v38 }
 0x5e5   :  { %v1661_v31 = vrot.slane %v1651_v7, 4  ;;  %v4448_v42 = vsel %vm1088_vm3, %v4447_v0, %v4446_v62 }
 0x5e7   :  { %v1662_v48 = vsel %vm1084_vm15, %v1661_v31, %v1660_v58 }
 0x5e8   :  { %v1664_v43 = vsel %vm1086_vm2, %v1663_v53, %v1662_v48 }
 0x5e9   :  { %v1666_v12 = vsel %vm1088_vm3, %v1665_v55, %v1664_v43 }
 0x5f4   :  { %v1598_v59 = vpop.permute.xlu0 %1597 }
 0x5f5   :  { %v1614_v27 = vmul.f32 %v1598_v59, %v1574_v50 }
 0x5f7   :  { %v6393_v61 = vadd.f32 %v1622_v2, %v1614_v27 }
 0x5f9   :  { %v1638_v28 = vpack.c.bf16 %v6393_v61, %v6393_v61  ;;  %v4449_v16 = vrot.slane %v6393_v61, 1 }
 0x5fb   :  { %v1654_v37 = vunpack.c.l.b16 %v1638_v28  ;;  %v6399_v23 = vsel %vm1090_vm4, %v4449_v16, %v4448_v42 }
 0x5fd   :  { %v1667_v20 = vrot.slane %v1654_v37, 1 }
 0x5ff   :  { %v1668_v3 = vsel %vm1090_vm4, %v1667_v20, %v1666_v12 }
 0x600   :  { %v1669_v13 = vpack.c.b16 %v1668_v3, %v1668_v3 }
 0x602   :  { %1670 = vrot.lane.b32.xlu1 %v1669_v13, %s5514_s1 }
 0x674   :  { %v1671_v25 = vpop.permute.xlu1 %1670 }
 0x675   :  { %4841 = vmatmul.msk.bf16.vlgmr.msra.gmra.mxu0 %vm8126_vm11, %v1671_v25 }
 0x676   :  { %4087 = vmatpush.bf16.msra.mxu0 %v6126_v21 }
 0x67a   :  { %4088 = vmatpush.bf16.msra.mxu0 %v6132_v52 }
 0x6f2   :  { %v1684_v49 = vpop.f32.mrf.mxu0 }
 0x6f3   :  { %v6407_v26 = vadd.f32 %v6167_v35, %v1684_v49 }
 0x6f5   :  { %1866 = vrot.lane.b32.xlu1 %v6407_v26, %s5513_s21  ;;  %v1690_v8 = vrot.slane %v6407_v26, 1  ;;  %v1689_v1 = vrot.slane %v6407_v26, 7  ;;  %v1691_v51 = vrot.slane %v6407_v26, 2  ;;  %v1694_v6 = vrot.slane %v6407_v26, 5 }
 0x6f6   :  { %v1693_v63 = vrot.slane %v6407_v26, 4  ;;  %v1692_v54 = vrot.slane %v6407_v26, 3  ;;  %v1695_v57 = vrot.slane %v6407_v26, 6 }
 0x6f7   :  { %1868 = vrot.lane.b32.xlu0 %v1690_v8, %s5513_s21  ;;  %1864 = vrot.lane.b32.xlu2 %v1689_v1, %s5513_s21  ;;  %v1704_v21 = vadd.f32 %v1689_v1, %v6197_v11  ;;  %v1707_v52 = vadd.f32 %v1691_v51, %v6259_v24  ;;  %v1710_v10 = vadd.f32 %v1694_v6, %v6277_v32 }
 0x6f9   :  { %v4842_v35 = vmul.f32 -1.442695, %v1704_v21  ;;  %v4845_v58 = vmul.f32 -1.442695, %v1707_v52  ;;  %v4848_v19 = vmul.f32 -1.442695, %v1710_v10 }
 0x6fa   :  { %v1686_v18 = vpop.f32.mrf.mxu0  ;;  %v2000_v21 = vrot.slane %v6336_v47, 7  ;;  %v1705_v47 = vadd.f32 %v6407_v26, %v6212_v30 }
 0x6fb   :  { %5165 = vpow2.f32 %v4842_v35 }
 0x6fc   :  { %5167 = vpow2.f32 %v4845_v58  ;;  %v2003_v58 = vrot.slane %v6343_v34, 7  ;;  %v1709_v34 = vadd.f32 %v1693_v63, %v6271_v15 }
 0x6fd   :  { %1874 = vrot.lane.b32.xlu1 %v1693_v63, %s5513_s21  ;;  %5169 = vpow2.f32 %v4848_v19  ;;  %v2006_v19 = vrot.slane %v6370_v14, 7  ;;  %v1708_v14 = vadd.f32 %v1692_v54, %v6265_v39 }
 0x6ff   :  { %1872 = vrot.lane.b32.xlu0 %v1692_v54, %s5513_s21  ;;  %1870 = vrot.lane.b32.xlu2 %v1691_v51, %s5513_s21 }
 0x701   :  { %v5166_v9 = vpop.eup %5165 }
 0x702   :  { %v1736_v4 = vadd.f32 1.0, %v5166_v9  ;;  %v5168_v33 = vpop.eup %5167 }
 0x703   :  { %v1739_v41 = vadd.f32 1.0, %v5168_v33  ;;  %v5170_v5 = vpop.eup %5169  ;;  %v1706_v33 = vadd.f32 %v1690_v8, %v6253_v22  ;;  %v1711_v8 = vadd.f32 %v1695_v57, %v6290_v45 }
 0x704   :  { %5171 = vrcp.f32 %v1736_v4  ;;  %v1742_v46 = vadd.f32 1.0, %v5170_v5  ;;  %v1755_v12 = vand.u32 2147483648, %v1736_v4  ;;  %vm1749_vm5 = vweird.f32 %v1736_v4 }
 0x705   :  { %5173 = vrcp.f32 %v1739_v41  ;;  %v1753_v59 = vand.u32 2147483647, %v1736_v4  ;;  %v1800_v16 = vand.u32 2147483648, %v1739_v41  ;;  %vm1794_vm0 = vweird.f32 %v1739_v41 }
 0x706   :  { %5175 = vrcp.f32 %v1742_v46  ;;  %v1756_v20 = vor.u32 1.1754944e-38, %v1755_v12  ;;  %v1798_v3 = vand.u32 2147483647, %v1739_v41  ;;  %v1845_v13 = vand.u32 2147483648, %v1742_v46 }
 0x707   :  { %1878 = vrot.lane.b32.xlu0 %v1695_v57, %s5513_s21  ;;  %1876 = vrot.lane.b32.xlu2 %v1694_v6, %s5513_s21  ;;  %vm1754_vm6 = vcmp.eq.f32.partialorder %v1753_v59, 8.507059e+37  ;;  %vm1839_vm11 = vweird.f32 %v1742_v46  ;;  %v1843_v25 = vand.u32 2147483647, %v1742_v46  ;;  %v1801_v51 = vor.u32 1.1754944e-38, %v1800_v16 }
 0x708   :  { %v1846_v52 = vor.u32 1.1754944e-38, %v1845_v13  ;;  %v4844_v5 = vmul.f32 -1.442695, %v1706_v33 }
 0x70a   :  { %v5172_v40 = vpop.eup %5171 }
 0x70b   :  { %v1745_v36 = vmul.f32 %v5172_v40, %v1736_v4  ;;  %v5174_v0 = vpop.eup %5173  ;;  %vm1750_vm1 = vweird.f32 %v5172_v40 }
 0x70c   :  { %v1790_v38 = vmul.f32 %v5174_v0, %v1739_v41  ;;  %v5176_v62 = vpop.eup %5175  ;;  %vm6436_vm8 = vmor %vm1749_vm5, %vm1750_vm1  ;;  %vm1795_vm9 = vweird.f32 %v5174_v0  ;;  %vm1799_vm5 = vcmp.eq.f32.partialorder %v1798_v3, 8.507059e+37  ;;  %v4843_v41 = vmul.f32 -1.442695, %v1705_v47 }
 0x70d   :  { %v1746_v7 = vsub.f32 1.0, %v1745_v36  ;;  %v1835_v53 = vmul.f32 %v5176_v62, %v1742_v46  ;;  %vm1840_vm10 = vweird.f32 %v5176_v62  ;;  %vm1796_vm7 = vmor %vm1794_vm0, %vm1795_vm9  ;;  %v4847_v46 = vmul.f32 -1.442695, %v1709_v34 }
 0x70e   :  { %v1791_v42 = vsub.f32 1.0, %v1790_v38  ;;  %vm1841_vm1 = vmor %vm1839_vm11, %vm1840_vm10  ;;  %5177 = vpow2.f32 %v4843_v41  ;;  %v4846_v36 = vmul.f32 -1.442695, %v1708_v14 }
 0x70f   :  { %v1747_v31 = vmul.f32 %v5172_v40, %v1746_v7  ;;  %v1836_v48 = vsub.f32 1.0, %v1835_v53  ;;  %5179 = vpow2.f32 %v4844_v5 }
 0x710   :  { %v1792_v55 = vmul.f32 %v5174_v0, %v1791_v42  ;;  %5181 = vpow2.f32 %v4847_v46 }
 0x711   :  { %v1748_v43 = vadd.f32 %v5172_v40, %v1747_v31  ;;  %v1837_v50 = vmul.f32 %v5176_v62, %v1836_v48  ;;  %5183 = vpow2.f32 %v4846_v36 }
 0x712   :  { %v1793_v27 = vadd.f32 %v5174_v0, %v1792_v55 }
 0x713   :  { %v1752_v28 = vsel %vm6436_vm8, %v5172_v40, %v1748_v43  ;;  %v1838_v37 = vadd.f32 %v5176_v62, %v1837_v50  ;;  %vm1844_vm8 = vcmp.eq.f32.partialorder %v1843_v25, 8.507059e+37 }
 0x714   :  { %v6442_v49 = vsel %vm1754_vm6, %v1756_v20, %v1752_v28  ;;  %v1797_v1 = vsel %vm1796_vm7, %v5174_v0, %v1793_v27  ;;  %v5178_v40 = vpop.eup %5177 }
 0x715   :  { %v1842_v6 = vsel %vm1841_vm1, %v5176_v62, %v1838_v37  ;;  %v6445_v35 = vsel %vm1799_vm5, %v1801_v51, %v1797_v1  ;;  %v6448_v10 = vmul.f32 %v2000_v21, %v6442_v49  ;;  %v5180_v0 = vpop.eup %5179  ;;  %v1737_v7 = vadd.f32 1.0, %v5178_v40 }
 0x716   :  { %v6450_v18 = vsel %vm1844_vm8, %v1846_v52, %v1842_v6  ;;  %v6455_v9 = vmul.f32 %v2003_v58, %v6445_v35  ;;  %v1738_v38 = vadd.f32 1.0, %v5180_v0  ;;  %v5182_v63 = vpop.eup %5181  ;;  %v4849_v62 = vmul.f32 -1.442695, %v1711_v8 }
 0x717   :  { %v6458_v4 = vmul.f32 %v2006_v19, %v6450_v18  ;;  %5185 = vrcp.f32 %v1737_v7  ;;  %v5184_v31 = vpop.eup %5183  ;;  %v6474_v42 = vadd.f32 1.0, %v5182_v63  ;;  %vm1764_vm9 = vweird.f32 %v1737_v7 }
 0x718   :  { %5187 = vrcp.f32 %v1738_v38  ;;  %v6476_v53 = vadd.f32 1.0, %v5184_v31  ;;  %v1768_v21 = vand.u32 2147483647, %v1737_v7  ;;  %v1770_v52 = vand.u32 2147483648, %v1737_v7 }
 0x719   :  { %5189 = vpow2.f32 %v4849_v62  ;;  %v1785_v41 = vand.u32 2147483648, %v1738_v38  ;;  %vm1779_vm6 = vweird.f32 %v1738_v38  ;;  %v1783_v34 = vand.u32 2147483647, %v1738_v38 }
 0x71a   :  { %5191 = vrcp.f32 %v6474_v42  ;;  %v1771_v46 = vor.u32 1.1754944e-38, %v1770_v52  ;;  %vm1769_vm1 = vcmp.eq.f32.partialorder %v1768_v21, 8.507059e+37 }
 0x71b   :  { %5193 = vrcp.f32 %v6476_v53  ;;  %v1786_v63 = vor.u32 1.1754944e-38, %v1785_v41  ;;  %vm1784_vm5 = vcmp.eq.f32.partialorder %v1783_v34, 8.507059e+37 }
 0x71d   :  { %v5186_v54 = vpop.eup %5185 }
 0x71e   :  { %v5188_v43 = vpop.eup %5187  ;;  %v1760_v26 = vmul.f32 %v5186_v54, %v1737_v7  ;;  %vm1765_vm11 = vweird.f32 %v5186_v54 }
 0x71f   :  { %v5190_v57 = vpop.eup %5189  ;;  %v1775_v12 = vmul.f32 %v5188_v43, %v1738_v38  ;;  %vm1780_vm10 = vweird.f32 %v5188_v43  ;;  %vm1766_vm0 = vmor %vm1764_vm9, %vm1765_vm11  ;;  %vm1824_vm11 = vweird.f32 %v6474_v42 }
 0x720   :  { %v1761_v50 = vsub.f32 1.0, %v1760_v26  ;;  %v6482_v59 = vpop.eup %5191  ;;  %v6484_v2 = vadd.f32 1.0, %v5190_v57  ;;  %vm1781_vm7 = vmor %vm1779_vm6, %vm1780_vm10 }
 0x721   :  { %v1776_v16 = vsub.f32 1.0, %v1775_v12  ;;  %v6487_v37 = vpop.eup %5193  ;;  %v1820_v3 = vmul.f32 %v6482_v59, %v6474_v42  ;;  %vm1825_vm8 = vweird.f32 %v6482_v59  ;;  %v1815_v12 = vand.u32 2147483648, %v6476_v53 }
 0x722   :  { %v1762_v20 = vmul.f32 %v5186_v54, %v1761_v50  ;;  %5195 = vrcp.f32 %v6484_v2  ;;  %v1805_v25 = vmul.f32 %v6487_v37, %v6476_v53  ;;  %vm1810_vm9 = vweird.f32 %v6487_v37  ;;  %vm1826_vm10 = vmor %vm1824_vm11, %vm1825_vm8 }
 0x723   :  { %v1777_v13 = vmul.f32 %v5188_v43, %v1776_v16  ;;  %v1821_v51 = vsub.f32 1.0, %v1820_v3  ;;  %vm1854_vm8 = vweird.f32 %v6484_v2 }
 0x724   :  { %v1763_v1 = vadd.f32 %v5186_v54, %v1762_v20  ;;  %v1806_v47 = vsub.f32 1.0, %v1805_v25 }
 0x725   :  { %v1778_v19 = vadd.f32 %v5188_v43, %v1777_v13  ;;  %v1822_v14 = vmul.f32 %v6482_v59, %v1821_v51  ;;  %v1816_v13 = vor.u32 1.1754944e-38, %v1815_v12 }
 0x726   :  { %v1767_v5 = vsel %vm1766_vm0, %v5186_v54, %v1763_v1  ;;  %v1807_v36 = vmul.f32 %v6487_v37, %v1806_v47  ;;  %vm1809_vm0 = vweird.f32 %v6476_v53 }
 0x727   :  { %v1782_v40 = vsel %vm1781_vm7, %v5188_v43, %v1778_v19  ;;  %v6503_v8 = vsel %vm1769_vm1, %v1771_v46, %v1767_v5  ;;  %v1823_v38 = vadd.f32 %v6482_v59, %v1822_v14  ;;  %vm1811_vm6 = vmor %vm1809_vm0, %vm1810_vm9 }
 0x728   :  { %v6496_v33 = vpop.eup %5195  ;;  %v6508_v54 = vsel %vm1784_vm5, %v1786_v63, %v1782_v40  ;;  %v1808_v26 = vadd.f32 %v6487_v37, %v1807_v36 }
 0x729   :  { %v1850_v0 = vmul.f32 %v6496_v33, %v6484_v2  ;;  %v1827_v50 = vsel %vm1826_vm10, %v6482_v59, %v1823_v38  ;;  %vm1855_vm5 = vweird.f32 %v6496_v33  ;;  %vm8135_vm10 = vcmask 261120  }
 0x72a   :  { %vm1856_vm11 = vmor %vm1854_vm8, %vm1855_vm5 }
 0x72b   :  { %v1851_v57 = vsub.f32 1.0, %v1850_v0 }
 0x72d   :  { %v1852_v16 = vmul.f32 %v6496_v33, %v1851_v57 }
 0x751   :  { %v1865_v55 = vpop.permute.xlu2 %1864 }
 0x752   :  { %v1888_v48 = vmul.f32 %v1865_v55, %v6442_v49  ;;  %v1828_v55 = vand.u32 2147483647, %v6474_v42 }
 0x754   :  { %1904 = vrot.lane.b32.xlu1 %v1888_v48, %s5513_s21  ;;  %v1830_v48 = vand.u32 2147483648, %v6474_v42  ;;  %v1813_v42 = vand.u32 2147483647, %v6476_v53  ;;  %vm1829_vm7 = vcmp.eq.f32.partialorder %v1828_v55, 8.507059e+37  ;;  %v1853_v53 = vadd.f32 %v6496_v33, %v1852_v16 }
 0x756   :  { %vm1814_vm1 = vcmp.eq.f32.partialorder %v1813_v42, 8.507059e+37  ;;  %v1857_v21 = vsel %vm1856_vm11, %v6496_v33, %v1853_v53 }
 0x759   :  { %v1871_v27 = vpop.permute.xlu2 %1870 }
 0x75a   :  { %v1891_v28 = vmul.f32 %v1871_v27, %v6445_v35  ;;  %v1831_v27 = vor.u32 1.1754944e-38, %v1830_v48 }
 0x75c   :  { %1910 = vrot.lane.b32.xlu1 %v1891_v28, %s5513_s21  ;;  %v1812_v28 = vsel %vm1811_vm6, %v6487_v37, %v1808_v26  ;;  %v6524_v3 = vsel %vm1829_vm7, %v1831_v27, %v1827_v50  ;;  %v1860_v37 = vand.u32 2147483648, %v6484_v2 }
 0x75d   :  { %v6527_v1 = vsel %vm1814_vm1, %v1816_v13, %v1812_v28  ;;  %v1945_v28 = vsub.f32 1.0, %v6503_v8  ;;  %v1946_v13 = vsub.f32 1.0, %v6508_v54  ;;  %v1949_v17 = vsub.f32 1.0, %v6524_v3 }
 0x75e   :  { %v1861_v52 = vor.u32 1.1754944e-38, %v1860_v37 }
 0x761   :  { %v1877_v6 = vpop.permute.xlu2 %1876 }
 0x762   :  { %v1894_v58 = vmul.f32 %v1877_v6, %v6450_v18  ;;  %v1858_v6 = vand.u32 2147483647, %v6484_v2 }
 0x764   :  { %1916 = vrot.lane.b32.xlu1 %v1894_v58, %s5513_s21  ;;  %vm1859_vm9 = vcmp.eq.f32.partialorder %v1858_v6, 8.507059e+37 }
 0x765   :  { %v6538_v58 = vsel %vm1859_vm9, %v1861_v52, %v1857_v21 }
 0x767   :  { %v1867_v7 = vpop.permute.xlu1 %1866 }
 0x768   :  { %v1889_v62 = vmul.f32 %v1867_v7, %v6503_v8 }
 0x769   :  { %v1869_v31 = vpop.permute.xlu0 %1868 }
 0x76a   :  { %v1890_v43 = vmul.f32 %v1869_v31, %v6508_v54  ;;  %1906 = vrot.lane.b32.xlu0 %v1889_v62, %s5513_s21 }
 0x76c   :  { %1908 = vrot.lane.b32.xlu2 %v1890_v43, %s5513_s21 }
 0x76f   :  { %v1875_v20 = vpop.permute.xlu1 %1874 }
 0x770   :  { %v1893_v25 = vmul.f32 %v1875_v20, %v6524_v3 }
 0x771   :  { %v1873_v59 = vpop.permute.xlu0 %1872 }
 0x772   :  { %v1892_v51 = vmul.f32 %v1873_v59, %v6527_v1  ;;  %1914 = vrot.lane.b32.xlu0 %v1893_v25, %s5513_s21  ;;  %v2002_v25 = vrot.slane %v6349_v56, 7  ;;  %v2017_v59 = vmul.f32 %v2001_v29, %v6503_v8  ;;  %v2005_v29 = vrot.slane %v6368_v60, 7 }
 0x774   :  { %1912 = vrot.lane.b32.xlu2 %v1892_v51, %s5513_s21  ;;  %v1944_v51 = vsub.f32 1.0, %v6442_v49  ;;  %v2018_v6 = vmul.f32 %v2002_v25, %v6508_v54 }
 0x779   :  { %v1879_v19 = vpop.permute.xlu0 %1878 }
 0x77a   :  { %v1895_v47 = vmul.f32 %v1879_v19, %v6538_v58 }
 0x77c   :  { %1918 = vrot.lane.b32.xlu2 %v1895_v47, %s5513_s21 }
 0x7c6   :  { %v1909_v41 = vpop.permute.xlu2 %1908  ;;  %v1905_v5 = vpop.permute.xlu1 %1904 }
 0x7c7   :  { %v1930_v34 = vadd.f32 %v1909_v41, %v6253_v22  ;;  %v1928_v14 = vadd.f32 %v1905_v5, %v6197_v11 }
 0x7c9   :  { %5197 = vtanh.f32 %v1930_v34  ;;  %v2004_v34 = vrot.slane %v6378_v44, 7 }
 0x7ca   :  { %5199 = vtanh.f32 %v1928_v14  ;;  %v2021_v14 = vmul.f32 %v2005_v29, %v6524_v3 }
 0x7ce   :  { %v1913_v2 = vpop.permute.xlu2 %1912  ;;  %v1911_v46 = vpop.permute.xlu1 %1910 }
 0x7cf   :  { %v5198_v33 = vpop.eup %5197  ;;  %v1932_v40 = vadd.f32 %v1913_v2, %v6265_v39  ;;  %v1931_v36 = vadd.f32 %v1911_v46, %v6259_v24  ;;  %v1948_v46 = vsub.f32 1.0, %v6527_v1 }
 0x7d0   :  { %v5200_v0 = vpop.eup %5199  ;;  %1964 = vrot.lane.b32.xlu1 %v5198_v33, %s5514_s1 }
 0x7d1   :  { %5201 = vtanh.f32 %v1932_v40  ;;  %1960 = vrot.lane.b32.xlu0 %v5200_v0, %s5514_s1  ;;  %v1947_v40 = vsub.f32 1.0, %v6445_v35 }
 0x7d2   :  { %5203 = vtanh.f32 %v1931_v36 }
 0x7d6   :  { %v1919_v7 = vpop.permute.xlu2 %1918  ;;  %v1917_v63 = vpop.permute.xlu1 %1916 }
 0x7d7   :  { %v5202_v62 = vpop.eup %5201  ;;  %v1935_v38 = vadd.f32 %v1919_v7, %v6290_v45  ;;  %v1934_v31 = vadd.f32 %v1917_v63, %v6277_v32 }
 0x7d8   :  { %v5204_v55 = vpop.eup %5203  ;;  %1968 = vrot.lane.b32.xlu1 %v5202_v62, %s5514_s1  ;;  %v2020_v62 = vmul.f32 %v2004_v34, %v6527_v1 }
 0x7d9   :  { %5205 = vtanh.f32 %v1935_v38  ;;  %1966 = vrot.lane.b32.xlu0 %v5204_v55, %s5514_s1 }
 0x7da   :  { %5207 = vtanh.f32 %v1934_v31 }
 0x7dc   :  { %v1907_v48 = vpop.permute.xlu0 %1906 }
 0x7dd   :  { %v1929_v43 = vadd.f32 %v1907_v48, %v6212_v30 }
 0x7df   :  { %v5206_v26 = vpop.eup %5205  ;;  %5209 = vtanh.f32 %v1929_v43 }
 0x7e0   :  { %v5208_v57 = vpop.eup %5207  ;;  %1974 = vrot.lane.b32.xlu1 %v5206_v26, %s5514_s1 }
 0x7e1   :  { %1972 = vrot.lane.b32.xlu0 %v5208_v57, %s5514_s1 }
 0x7e4   :  { %v1915_v12 = vpop.permute.xlu0 %1914 }
 0x7e5   :  { %v5210_v50 = vpop.eup %5209  ;;  %v1933_v42 = vadd.f32 %v1915_v12, %v6271_v15 }
 0x7e6   :  { %1962 = vrot.lane.b32.xlu2 %v5210_v50, %s5514_s1 }
 0x7e7   :  { %5211 = vtanh.f32 %v1933_v42 }
 0x7ed   :  { %v5212_v27 = vpop.eup %5211 }
 0x7ee   :  { %1970 = vrot.lane.b32.xlu2 %v5212_v27, %s5514_s1  ;;  %v2007_v27 = vrot.slane %v6393_v61, 7 }
 0x840   :  { %v1963_v16 = vpop.permute.xlu2 %1962 }
 0x841   :  { %v1985_v20 = vmul.f32 %v1963_v16, %v1945_v28  ;;  %v1950_v16 = vsub.f32 1.0, %v6450_v18 }
 0x842   :  { %v1965_v53 = vpop.permute.xlu1 %1964 }
 0x843   :  { %v1961_v37 = vpop.permute.xlu0 %1960  ;;  %v1986_v21 = vmul.f32 %v1965_v53, %v1946_v13  ;;  %v6566_v52 = vadd.f32 %v2017_v59, %v1985_v20  ;;  %v1951_v20 = vsub.f32 1.0, %v6538_v58 }
 0x844   :  { %v1984_v19 = vmul.f32 %v1961_v37, %v1944_v51 }
 0x845   :  { %v6568_v47 = vadd.f32 %v2018_v6, %v1986_v21  ;;  %v2033_v49 = vpack.c.bf16 %v6566_v52, %v6566_v52  ;;  %v2023_v21 = vmul.f32 %v2007_v27, %v6538_v58 }
 0x846   :  { %v6571_v41 = vadd.f32 %v6448_v10, %v1984_v19 }
 0x847   :  { %v2034_v56 = vpack.c.bf16 %v6568_v47, %v6568_v47  ;;  %v2049_v38 = vunpack.c.l.b16 %v2033_v49  ;;  %v2403_v55 = vrot.slane %v6568_v47, 7 }
 0x848   :  { %v2032_v8 = vpack.c.bf16 %v6571_v41, %v6571_v41  ;;  %v4454_v54 = vrot.slane %v6571_v41, 1  ;;  %v1971_v5 = vpop.permute.xlu2 %1970 }
 0x849   :  { %v2050_v10 = vunpack.c.l.b16 %v2034_v56  ;;  %v1989_v2 = vmul.f32 %v1971_v5, %v1949_v17 }
 0x84a   :  { %v2048_v33 = vunpack.c.l.b16 %v2032_v8  ;;  %v4455_v60 = vsel %vm1078_vm12, %v6566_v52, %v4454_v54  ;;  %v1969_v36 = vpop.permute.xlu1 %1968 }
 0x84b   :  { %v2058_v0 = vrot.slane %v2050_v10, 7  ;;  %v6588_v7 = vadd.f32 %v2021_v14, %v1989_v2  ;;  %v1967_v63 = vpop.permute.xlu0 %1966  ;;  %v1988_v44 = vmul.f32 %v1969_v36, %v1948_v46  ;;  %v4456_v28 = vsel %vm1080_vm13, %v2403_v55, %v4455_v60 }
 0x84c   :  { %v2056_v31 = vrot.slane %v2048_v33, 1  ;;  %v1987_v3 = vmul.f32 %v1967_v63, %v1947_v40 }
 0x84d   :  { %v6592_v48 = vadd.f32 %v2020_v62, %v1988_v44  ;;  %v2037_v35 = vpack.c.bf16 %v6588_v7, %v6588_v7  ;;  %v4461_v25 = vrot.slane %v6588_v7, 4 }
 0x84e   :  { %v2057_v43 = vsel %vm1078_vm12, %v2049_v38, %v2056_v31  ;;  %v6598_v26 = vadd.f32 %v6455_v9, %v1987_v3  ;;  %v5501_v38 = vld [vmem:[%s8118_s10 + $0x8] sm:$0xff]  ;;  %v5502_v31 = vld [vmem:[%s8118_s10] sm:$0xff] }
 0x84f   :  { %v2059_v57 = vsel %vm1080_vm13, %v2058_v0, %v2057_v43  ;;  %v2036_v1 = vpack.c.bf16 %v6592_v48, %v6592_v48  ;;  %v4459_v12 = vrot.slane %v6592_v48, 5  ;;  %v2053_v13 = vunpack.c.l.b16 %v2037_v35  ;;  %v6649_v43 = vld [vmem:[%s8120_s11] ss:$0 sm:$0xff] }
 0x850   :  { %v2035_v50 = vpack.c.bf16 %v6598_v26, %v6598_v26  ;;  %v4457_v42 = vrot.slane %v6598_v26, 6 }
 0x851   :  { %v2052_v9 = vunpack.c.l.b16 %v2036_v1  ;;  %v2064_v49 = vrot.slane %v2053_v13, 4 }
 0x852   :  { %v2051_v59 = vunpack.c.l.b16 %v2035_v50  ;;  %v4458_v51 = vsel %vm1082_vm14, %v4457_v42, %v4456_v28  ;;  %v1975_v53 = vpop.permute.xlu1 %1974 }
 0x853   :  { %v2062_v37 = vrot.slane %v2052_v9, 5  ;;  %v4460_v6 = vsel %vm1084_vm15, %v4459_v12, %v4458_v51  ;;  %v1973_v61 = vpop.permute.xlu0 %1972  ;;  %v1991_v19 = vmul.f32 %v1975_v53, %v1951_v20 }
 0x854   :  { %v2060_v56 = vrot.slane %v2051_v59, 6  ;;  %v1990_v17 = vmul.f32 %v1973_v61, %v1950_v16  ;;  %v4462_v18 = vsel %vm1086_vm2, %v4461_v25, %v4460_v6 }
 0x855   :  { %v6618_v29 = vadd.f32 %v2023_v21, %v1991_v19 }
 0x856   :  { %v6621_v8 = vadd.f32 %v6458_v4, %v1990_v17  ;;  %v2061_v54 = vsel %vm1082_vm14, %v2060_v56, %v2059_v57 }
 0x857   :  { %v2039_v5 = vpack.c.bf16 %v6618_v29, %v6618_v29  ;;  %v4465_v34 = vrot.slane %v6618_v29, 2  ;;  %v2063_v58 = vsel %vm1084_vm15, %v2062_v37, %v2061_v54 }
 0x858   :  { %v2038_v10 = vpack.c.bf16 %v6621_v8, %v6621_v8  ;;  %v4463_v14 = vrot.slane %v6621_v8, 3  ;;  %v2065_v2 = vsel %vm1086_vm2, %v2064_v49, %v2063_v58 }
 0x859   :  { %v2055_v46 = vunpack.c.l.b16 %v2039_v5 }
 0x85a   :  { %v2054_v33 = vunpack.c.l.b16 %v2038_v10  ;;  %v4464_v4 = vsel %vm1088_vm3, %v4463_v14, %v4462_v18 }
 0x85b   :  { %v2068_v60 = vrot.slane %v2055_v46, 2  ;;  %v6634_v40 = vsel %vm1090_vm4, %v4465_v34, %v4464_v4 }
 0x85c   :  { %v2066_v36 = vrot.slane %v2054_v33, 3 }
 0x85e   :  { %v2067_v0 = vsel %vm1088_vm3, %v2066_v36, %v2065_v2  ;;  %v2404_v36 = vrot.slane %v6598_v26, 7 }
 0x85f   :  { %v2069_v63 = vsel %vm1090_vm4, %v2068_v60, %v2067_v0 }
 0x860   :  { %v2070_v62 = vpack.c.b16 %v2069_v63, %v2069_v63 }
 0x862   :  { %2071 = vrot.lane.b32.xlu2 %v2070_v62, %s5514_s1  ;;  %v2406_v62 = vrot.slane %v6588_v7, 7 }
 0x8bc   :  { %v2072_v44 = vpop.permute.xlu2 %2071 }
 0x8bd   :  { %4850 = vmatmul.msk.bf16.vlgmr.msrb.gmra.mxu3 %vm8135_vm10, %v2072_v44 }
 0x8be   :  { %3686 = vmatpush.bf16.msrb.mxu3 %v5501_v38 }
 0x8c2   :  { %3687 = vmatpush.bf16.msrb.mxu3 %v5502_v31 }
 0x940   :  { %v2085_v3 = vpop.f32.mrf.mxu3 }
 0x941   :  { %v6652_v35 = vadd.f32 %v6649_v43, %v2085_v3 }
 0x943   :  { %2269 = vrot.lane.b32.xlu0 %v6652_v35, %s5513_s21  ;;  %v2092_v57 = vrot.slane %v6652_v35, 1  ;;  %v2091_v1 = vrot.slane %v6652_v35, 7  ;;  %v2094_v12 = vrot.slane %v6652_v35, 3  ;;  %v2090_v16 = vrot.slane %v6652_v35, 6 }
 0x944   :  { %v2093_v20 = vrot.slane %v6652_v35, 2  ;;  %v2095_v59 = vrot.slane %v6652_v35, 4  ;;  %v2096_v37 = vrot.slane %v6652_v35, 5  ;;  %v2107_v38 = vadd.f32 %v6652_v35, %v6253_v22 }
 0x945   :  { %2271 = vrot.lane.b32.xlu2 %v2092_v57, %s5513_s21  ;;  %v2108_v50 = vadd.f32 %v2092_v57, %v6259_v24  ;;  %2267 = vrot.lane.b32.xlu1 %v2091_v1, %s5513_s21  ;;  %v2110_v42 = vadd.f32 %v2094_v12, %v6271_v15  ;;  %v2106_v31 = vadd.f32 %v2091_v1, %v6212_v30 }
 0x946   :  { %v4853_v3 = vmul.f32 -1.442695, %v2107_v38  ;;  %v2105_v26 = vadd.f32 %v2090_v16, %v6197_v11  ;;  %v2112_v35 = vadd.f32 %v2096_v37, %v6290_v45 }
 0x947   :  { %v4854_v27 = vmul.f32 -1.442695, %v2108_v50  ;;  %v4856_v9 = vmul.f32 -1.442695, %v2110_v42  ;;  %v4852_v57 = vmul.f32 -1.442695, %v2106_v31 }
 0x948   :  { %v2087_v28 = vpop.f32.mrf.mxu3  ;;  %v4851_v50 = vmul.f32 -1.442695, %v2105_v26 }
 0x949   :  { %5213 = vpow2.f32 %v4854_v27  ;;  %v2111_v28 = vadd.f32 %v2095_v59, %v6277_v32 }
 0x94a   :  { %5215 = vpow2.f32 %v4856_v9 }
 0x94b   :  { %2265 = vrot.lane.b32.xlu0 %v2090_v16, %s5513_s21 }
 0x94d   :  { %2275 = vrot.lane.b32.xlu2 %v2094_v12, %s5513_s21  ;;  %2273 = vrot.lane.b32.xlu1 %v2093_v20, %s5513_s21  ;;  %v2109_v12 = vadd.f32 %v2093_v20, %v6265_v39 }
 0x94f   :  { %v5214_v13 = vpop.eup %5213  ;;  %v4855_v27 = vmul.f32 -1.442695, %v2109_v12 }
 0x950   :  { %v2140_v25 = vadd.f32 1.0, %v5214_v13  ;;  %v5216_v51 = vpop.eup %5215  ;;  %v4857_v13 = vmul.f32 -1.442695, %v2111_v28 }
 0x951   :  { %v2142_v53 = vadd.f32 1.0, %v5216_v51 }
 0x952   :  { %5217 = vrcp.f32 %v2140_v25  ;;  %v2201_v5 = vand.u32 2147483648, %v2140_v25  ;;  %vm2195_vm6 = vweird.f32 %v2140_v25  ;;  %v2199_v34 = vand.u32 2147483647, %v2140_v25 }
 0x953   :  { %2277 = vrot.lane.b32.xlu0 %v2095_v59, %s5513_s21  ;;  %5219 = vrcp.f32 %v2142_v53  ;;  %v2231_v14 = vand.u32 2147483648, %v2142_v53  ;;  %vm2225_vm5 = vweird.f32 %v2142_v53  ;;  %v2229_v46 = vand.u32 2147483647, %v2142_v53 }
 0x954   :  { %v2202_v2 = vor.u32 1.1754944e-38, %v2201_v5  ;;  %vm2200_vm8 = vcmp.eq.f32.partialorder %v2199_v34, 8.507059e+37  ;;  %5221 = vpow2.f32 %v4853_v3 }
 0x955   :  { %2279 = vrot.lane.b32.xlu1 %v2096_v37, %s5513_s21  ;;  %v2232_v60 = vor.u32 1.1754944e-38, %v2231_v14  ;;  %vm2230_vm9 = vcmp.eq.f32.partialorder %v2229_v46, 8.507059e+37  ;;  %5223 = vpow2.f32 %v4852_v57 }
 0x956   :  { %5225 = vpow2.f32 %v4851_v50 }
 0x957   :  { %5227 = vpow2.f32 %v4855_v27 }
 0x958   :  { %v5218_v6 = vpop.eup %5217 }
 0x959   :  { %v2191_v61 = vmul.f32 %v5218_v6, %v2140_v25  ;;  %v5220_v21 = vpop.eup %5219  ;;  %vm2196_vm0 = vweird.f32 %v5218_v6  ;;  %v4858_v25 = vmul.f32 -1.442695, %v2112_v35 }
 0x95a   :  { %v2221_v56 = vmul.f32 %v5220_v21, %v2142_v53  ;;  %vm2197_vm7 = vmor %vm2195_vm6, %vm2196_vm0  ;;  %vm2226_vm1 = vweird.f32 %v5220_v21  ;;  %v5222_v42 = vpop.eup %5221 }
 0x95b   :  { %v2192_v19 = vsub.f32 1.0, %v2191_v61  ;;  %vm2227_vm11 = vmor %vm2225_vm5, %vm2226_vm1  ;;  %v5224_v7 = vpop.eup %5223  ;;  %v2139_v9 = vadd.f32 1.0, %v5222_v42 }
 0x95c   :  { %v2222_v18 = vsub.f32 1.0, %v2221_v56  ;;  %v6691_v1 = vadd.f32 1.0, %v5224_v7  ;;  %v5226_v16 = vpop.eup %5225 }
 0x95d   :  { %v2193_v17 = vmul.f32 %v5218_v6, %v2192_v19  ;;  %5229 = vrcp.f32 %v2139_v9  ;;  %v5228_v20 = vpop.eup %5227  ;;  %v6694_v51 = vadd.f32 1.0, %v5226_v16  ;;  %vm2180_vm0 = vweird.f32 %v2139_v9 }
 0x95e   :  { %v2223_v49 = vmul.f32 %v5220_v21, %v2222_v18  ;;  %5231 = vrcp.f32 %v6691_v1  ;;  %v2186_v31 = vand.u32 2147483648, %v2139_v9  ;;  %v2184_v3 = vand.u32 2147483647, %v2139_v9 }
 0x95f   :  { %v2194_v54 = vadd.f32 %v5218_v6, %v2193_v17  ;;  %5233 = vpow2.f32 %v4857_v13  ;;  %v2169_v50 = vand.u32 2147483647, %v6691_v1  ;;  %v2171_v42 = vand.u32 2147483648, %v6691_v1 }
 0x960   :  { %v2224_v58 = vadd.f32 %v5220_v21, %v2223_v49  ;;  %5235 = vpow2.f32 %v4858_v25  ;;  %vm2165_vm1 = vweird.f32 %v6691_v1  ;;  %v2187_v35 = vor.u32 1.1754944e-38, %v2186_v31 }
 0x961   :  { %v2198_v10 = vsel %vm2197_vm7, %v5218_v6, %v2194_v54  ;;  %v6696_v6 = vadd.f32 1.0, %v5228_v20  ;;  %5237 = vrcp.f32 %v6694_v51 }
 0x962   :  { %v6672_v33 = vsel %vm2200_vm8, %v2202_v2, %v2198_v10  ;;  %v2228_v4 = vsel %vm2227_vm11, %v5220_v21, %v2224_v58  ;;  %vm2185_vm8 = vcmp.eq.f32.partialorder %v2184_v3, 8.507059e+37  ;;  %vm2170_vm11 = vcmp.eq.f32.partialorder %v2169_v50, 8.507059e+37 }
 0x963   :  { %v6675_v0 = vsel %vm2230_vm9, %v2232_v60, %v2228_v4  ;;  %v6678_v63 = vmul.f32 %v2404_v36, %v6672_v33  ;;  %v5230_v53 = vpop.eup %5229  ;;  %5239 = vrcp.f32 %v6696_v6 }
 0x964   :  { %v6682_v44 = vmul.f32 %v2406_v62, %v6675_v0  ;;  %v5232_v37 = vpop.eup %5231  ;;  %v2176_v19 = vmul.f32 %v5230_v53, %v2139_v9  ;;  %vm2181_vm10 = vweird.f32 %v5230_v53 }
 0x965   :  { %v5234_v21 = vpop.eup %5233  ;;  %v2161_v17 = vmul.f32 %v5232_v37, %v6691_v1  ;;  %vm2166_vm6 = vweird.f32 %v5232_v37  ;;  %vm2182_vm7 = vmor %vm2180_vm0, %vm2181_vm10  ;;  %vm2150_vm10 = vweird.f32 %v6694_v51 }
 0x966   :  { %v5236_v56 = vpop.eup %5235  ;;  %v6703_v18 = vadd.f32 1.0, %v5234_v21  ;;  %v2177_v49 = vsub.f32 1.0, %v2176_v19  ;;  %vm2167_vm5 = vmor %vm2165_vm1, %vm2166_vm6 }
 0x967   :  { %v6705_v54 = vpop.eup %5237  ;;  %v6707_v5 = vadd.f32 1.0, %v5236_v56  ;;  %v2162_v10 = vsub.f32 1.0, %v2161_v17  ;;  %v2156_v56 = vand.u32 2147483648, %v6694_v51 }
 0x968   :  { %5241 = vrcp.f32 %v6703_v18  ;;  %v2178_v2 = vmul.f32 %v5230_v53, %v2177_v49  ;;  %v2146_v46 = vmul.f32 %v6705_v54, %v6694_v51  ;;  %vm2151_vm9 = vweird.f32 %v6705_v54 }
 0x969   :  { %v6710_v14 = vpop.eup %5239  ;;  %5243 = vrcp.f32 %v6707_v5  ;;  %v2163_v4 = vmul.f32 %v5232_v37, %v2162_v10  ;;  %vm2152_vm6 = vmor %vm2150_vm10, %vm2151_vm9  ;;  %vm2240_vm9 = vweird.f32 %v6703_v18  ;;  %v2244_v50 = vand.u32 2147483647, %v6703_v18 }
 0x96a   :  { %v2206_v60 = vmul.f32 %v6710_v14, %v6696_v6  ;;  %v2179_v36 = vadd.f32 %v5230_v53, %v2178_v2  ;;  %v2147_v62 = vsub.f32 1.0, %v2146_v46  ;;  %vm2211_vm0 = vweird.f32 %v6710_v14 }
 0x96b   :  { %v2164_v57 = vadd.f32 %v5232_v37, %v2163_v4  ;;  %v2157_v46 = vor.u32 1.1754944e-38, %v2156_v56 }
 0x96c   :  { %v2207_v26 = vsub.f32 1.0, %v2206_v60  ;;  %v2183_v27 = vsel %vm2182_vm7, %v5230_v53, %v2179_v36  ;;  %v2148_v7 = vmul.f32 %v6705_v54, %v2147_v62  ;;  %v2172_v53 = vor.u32 1.1754944e-38, %v2171_v42 }
 0x96d   :  { %v2168_v9 = vsel %vm2167_vm5, %v5232_v37, %v2164_v57  ;;  %v6732_v20 = vsel %vm2185_vm8, %v2187_v35, %v2183_v27  ;;  %v2154_v37 = vand.u32 2147483647, %v6694_v51  ;;  %vm2210_vm7 = vweird.f32 %v6696_v6 }
 0x96e   :  { %v6719_v38 = vpop.eup %5241  ;;  %v2208_v13 = vmul.f32 %v6710_v14, %v2207_v26  ;;  %v6737_v19 = vsel %vm2170_vm11, %v2172_v53, %v2168_v9  ;;  %v2214_v51 = vand.u32 2147483647, %v6696_v6  ;;  %vm2212_vm1 = vmor %vm2210_vm7, %vm2211_vm0  ;;  %v2261_v27 = vand.u32 2147483648, %v6707_v5 }
 0x96f   :  { %v6721_v12 = vpop.eup %5243  ;;  %v2236_v28 = vmul.f32 %v6719_v38, %v6703_v18  ;;  %vm2155_vm5 = vcmp.eq.f32.partialorder %v2154_v37, 8.507059e+37  ;;  %vm2241_vm11 = vweird.f32 %v6719_v38 }
 0x970   :  { %v2251_v16 = vmul.f32 %v6721_v12, %v6707_v5  ;;  %v2209_v49 = vadd.f32 %v6710_v14, %v2208_v13  ;;  %vm2215_vm8 = vcmp.eq.f32.partialorder %v2214_v51, 8.507059e+37  ;;  %vm2256_vm10 = vweird.f32 %v6721_v12  ;;  %vm2242_vm0 = vmor %vm2240_vm9, %vm2241_vm11 }
 0x972   :  { %v2213_v4 = vsel %vm2212_vm1, %v6710_v14, %v2209_v49  ;;  %v2246_v14 = vand.u32 2147483648, %v6703_v18  ;;  %vm2245_vm1 = vcmp.eq.f32.partialorder %v2244_v50, 8.507059e+37 }
 0x974   :  { %v2247_v35 = vor.u32 1.1754944e-38, %v2246_v14 }
 0x99f   :  { %v2272_v59 = vpop.permute.xlu2 %2271 }
 0x9a0   :  { %v2292_v61 = vmul.f32 %v2272_v59, %v6672_v33  ;;  %v2149_v59 = vadd.f32 %v6705_v54, %v2148_v7 }
 0x9a2   :  { %2311 = vrot.lane.b32.xlu1 %v2292_v61, %s5513_s21  ;;  %v2237_v61 = vsub.f32 1.0, %v2236_v28  ;;  %v2153_v10 = vsel %vm2152_vm6, %v6705_v54, %v2149_v59  ;;  %vm2255_vm6 = vweird.f32 %v6707_v5  ;;  %v2259_v28 = vand.u32 2147483647, %v6707_v5 }
 0x9a3   :  { %v6754_v62 = vsel %vm2155_vm5, %v2157_v46, %v2153_v10  ;;  %vm2257_vm7 = vmor %vm2255_vm6, %vm2256_vm10 }
 0x9a4   :  { %v2238_v2 = vmul.f32 %v6719_v38, %v2237_v61  ;;  %vm2260_vm5 = vcmp.eq.f32.partialorder %v2259_v28, 8.507059e+37 }
 0x9a6   :  { %v2239_v54 = vadd.f32 %v6719_v38, %v2238_v2 }
 0x9a7   :  { %v2276_v34 = vpop.permute.xlu2 %2275 }
 0x9a8   :  { %v2294_v58 = vmul.f32 %v2276_v34, %v6675_v0  ;;  %v2252_v34 = vsub.f32 1.0, %v2251_v16  ;;  %v2243_v7 = vsel %vm2242_vm0, %v6719_v38, %v2239_v54  ;;  %v2262_v16 = vor.u32 1.1754944e-38, %v2261_v27 }
 0x9a9   :  { %v6774_v9 = vsel %vm2245_vm1, %v2247_v35, %v2243_v7  ;;  %v2346_v27 = vsub.f32 1.0, %v6737_v19  ;;  %v2402_v7 = vrot.slane %v6566_v52, 7  ;;  %v2419_v52 = vmul.f32 %v2403_v55, %v6732_v20 }
 0x9aa   :  { %2315 = vrot.lane.b32.xlu1 %v2294_v58, %s5513_s21  ;;  %v2216_v58 = vand.u32 2147483648, %v6696_v6  ;;  %v2253_v60 = vmul.f32 %v6721_v12, %v2252_v34 }
 0x9ac   :  { %v2217_v31 = vor.u32 1.1754944e-38, %v2216_v58  ;;  %v2254_v42 = vadd.f32 %v6721_v12, %v2253_v60 }
 0x9ae   :  { %v6759_v6 = vsel %vm2215_vm8, %v2217_v31, %v2213_v4  ;;  %v2258_v18 = vsel %vm2257_vm7, %v6721_v12, %v2254_v42  ;;  %v2348_v42 = vsub.f32 1.0, %v6672_v33  ;;  %v2345_v33 = vsub.f32 1.0, %v6754_v62 }
 0x9af   :  { %v6777_v53 = vsel %vm2260_vm5, %v2262_v16, %v2258_v18  ;;  %v2349_v47 = vsub.f32 1.0, %v6759_v6  ;;  %vm8136_vm8 = vcmask 261120  }
 0x9b5   :  { %v2270_v25 = vpop.permute.xlu0 %2269 }
 0x9b6   :  { %v2291_v1 = vmul.f32 %v2270_v25, %v6732_v20 }
 0x9b7   :  { %v2268_v21 = vpop.permute.xlu1 %2267 }
 0x9b8   :  { %v2290_v17 = vmul.f32 %v2268_v21, %v6737_v19  ;;  %2309 = vrot.lane.b32.xlu2 %v2291_v1, %s5513_s21 }
 0x9ba   :  { %2307 = vrot.lane.b32.xlu0 %v2290_v17, %s5513_s21 }
 0x9bd   :  { %v2266_v36 = vpop.permute.xlu0 %2265 }
 0x9be   :  { %v2289_v3 = vmul.f32 %v2266_v36, %v6754_v62 }
 0x9bf   :  { %v2274_v57 = vpop.permute.xlu1 %2273 }
 0x9c0   :  { %v2293_v26 = vmul.f32 %v2274_v57, %v6759_v6  ;;  %2305 = vrot.lane.b32.xlu2 %v2289_v3, %s5513_s21 }
 0x9c2   :  { %2313 = vrot.lane.b32.xlu0 %v2293_v26, %s5513_s21 }
 0x9c5   :  { %v2278_v13 = vpop.permute.xlu0 %2277 }
 0x9c6   :  { %v2295_v25 = vmul.f32 %v2278_v13, %v6774_v9  ;;  %v2418_v13 = vmul.f32 %v2402_v7, %v6737_v19  ;;  %v2405_v19 = vrot.slane %v6592_v48, 7 }
 0x9c7   :  { %v2280_v1 = vpop.permute.xlu1 %2279 }
 0x9c8   :  { %v2296_v38 = vmul.f32 %v2280_v1, %v6777_v53  ;;  %2317 = vrot.lane.b32.xlu2 %v2295_v25, %s5513_s21  ;;  %v2347_v25 = vsub.f32 1.0, %v6732_v20  ;;  %v2407_v20 = vrot.slane %v6621_v8, 7 }
 0x9ca   :  { %2319 = vrot.lane.b32.xlu0 %v2296_v38, %s5513_s21 }
 0xa12   :  { %v2310_v5 = vpop.permute.xlu2 %2309 }
 0xa13   :  { %v2331_v59 = vadd.f32 %v2310_v5, %v6253_v22 }
 0xa14   :  { %v2312_v12 = vpop.permute.xlu1 %2311 }
 0xa15   :  { %5245 = vtanh.f32 %v2331_v59  ;;  %v2332_v61 = vadd.f32 %v2312_v12, %v6259_v24  ;;  %v2401_v59 = vrot.slane %v6571_v41, 7 }
 0xa17   :  { %5247 = vtanh.f32 %v2332_v61 }
 0xa1a   :  { %v2306_v21 = vpop.permute.xlu2 %2305 }
 0xa1b   :  { %v5246_v37 = vpop.eup %5245  ;;  %v2329_v56 = vadd.f32 %v2306_v21, %v6197_v11 }
 0xa1c   :  { %2365 = vrot.lane.b32.xlu1 %v5246_v37, %s5514_s1  ;;  %v2316_v17 = vpop.permute.xlu1 %2315  ;;  %v2350_v37 = vsub.f32 1.0, %v6675_v0 }
 0xa1d   :  { %v5248_v49 = vpop.eup %5247  ;;  %5249 = vtanh.f32 %v2329_v56  ;;  %v2334_v34 = vadd.f32 %v2316_v17, %v6271_v15 }
 0xa1e   :  { %2367 = vrot.lane.b32.xlu0 %v5248_v49, %s5514_s1 }
 0xa1f   :  { %5251 = vtanh.f32 %v2334_v34  ;;  %v2421_v34 = vmul.f32 %v2405_v19, %v6759_v6 }
 0xa22   :  { %v2318_v58 = vpop.permute.xlu2 %2317 }
 0xa23   :  { %v5250_v10 = vpop.eup %5249  ;;  %v2335_v51 = vadd.f32 %v2318_v58, %v6277_v32 }
 0xa24   :  { %2361 = vrot.lane.b32.xlu1 %v5250_v10, %s5514_s1  ;;  %v2351_v10 = vsub.f32 1.0, %v6774_v9 }
 0xa25   :  { %v5252_v2 = vpop.eup %5251  ;;  %5253 = vtanh.f32 %v2335_v51  ;;  %v2423_v51 = vmul.f32 %v2407_v20, %v6774_v9 }
 0xa26   :  { %2371 = vrot.lane.b32.xlu0 %v5252_v2, %s5514_s1 }
 0xa2b   :  { %v5254_v46 = vpop.eup %5253 }
 0xa2c   :  { %v2308_v4 = vpop.permute.xlu0 %2307  ;;  %2373 = vrot.lane.b32.xlu1 %v5254_v46, %s5514_s1 }
 0xa2d   :  { %v2330_v60 = vadd.f32 %v2308_v4, %v6212_v30 }
 0xa2f   :  { %5255 = vtanh.f32 %v2330_v60 }
 0xa34   :  { %v2314_v36 = vpop.permute.xlu0 %2313 }
 0xa35   :  { %v5256_v31 = vpop.eup %5255  ;;  %v2333_v3 = vadd.f32 %v2314_v36, %v6265_v39  ;;  %v2352_v36 = vsub.f32 1.0, %v6777_v53 }
 0xa36   :  { %2363 = vrot.lane.b32.xlu2 %v5256_v31, %s5514_s1 }
 0xa37   :  { %5257 = vtanh.f32 %v2333_v3 }
 0xa3c   :  { %v2320_v54 = vpop.permute.xlu0 %2319 }
 0xa3d   :  { %v5258_v57 = vpop.eup %5257  ;;  %v2336_v14 = vadd.f32 %v2320_v54, %v6290_v45 }
 0xa3e   :  { %2369 = vrot.lane.b32.xlu2 %v5258_v57, %s5514_s1 }
 0xa3f   :  { %5259 = vtanh.f32 %v2336_v14 }
 0xa45   :  { %v5260_v26 = vpop.eup %5259 }
 0xa46   :  { %2375 = vrot.lane.b32.xlu2 %v5260_v26, %s5514_s1 }
 0xa8e   :  { %v2366_v50 = vpop.permute.xlu1 %2365 }
 0xa8f   :  { %v2387_v5 = vmul.f32 %v2366_v50, %v2347_v25 }
 0xa90   :  { %v2368_v28 = vpop.permute.xlu0 %2367  ;;  %v2364_v35 = vpop.permute.xlu2 %2363 }
 0xa91   :  { %v2388_v18 = vmul.f32 %v2368_v28, %v2348_v42  ;;  %v2386_v16 = vmul.f32 %v2364_v35, %v2346_v27  ;;  %v6818_v56 = vadd.f32 %v2419_v52, %v2387_v5 }
 0xa93   :  { %v6804_v1 = vadd.f32 %v6678_v63, %v2388_v18  ;;  %v6806_v38 = vadd.f32 %v2418_v13, %v2386_v16  ;;  %v2417_v63 = vmul.f32 %v2401_v59, %v6754_v62  ;;  %v2408_v62 = vrot.slane %v6618_v29, 7 }
 0xa94   :  { %v2435_v6 = vpack.c.bf16 %v6818_v56, %v6818_v56 }
 0xa95   :  { %v2434_v61 = vpack.c.bf16 %v6806_v38, %v6806_v38  ;;  %v2436_v41 = vpack.c.bf16 %v6804_v1, %v6804_v1  ;;  %v4469_v0 = vrot.slane %v6806_v38, 1  ;;  %v2424_v54 = vmul.f32 %v2408_v62, %v6777_v53 }
 0xa96   :  { %v2362_v12 = vpop.permute.xlu1 %2361  ;;  %v2805_v57 = vrot.slane %v6804_v1, 7  ;;  %v2451_v35 = vunpack.c.l.b16 %v2435_v6 }
 0xa97   :  { %v2385_v21 = vmul.f32 %v2362_v12, %v2345_v33  ;;  %v2450_v2 = vunpack.c.l.b16 %v2434_v61  ;;  %v2452_v29 = vunpack.c.l.b16 %v2436_v41 }
 0xa98   :  { %v2372_v17 = vpop.permute.xlu0 %2371  ;;  %v2370_v55 = vpop.permute.xlu2 %2369 }
 0xa99   :  { %v6824_v48 = vadd.f32 %v2417_v63, %v2385_v21  ;;  %v2390_v49 = vmul.f32 %v2372_v17, %v2350_v37  ;;  %v2389_v58 = vmul.f32 %v2370_v55, %v2349_v47  ;;  %v2458_v42 = vrot.slane %v2450_v2, 1 }
 0xa9a   :  { %v2461_v18 = vrot.slane %v2452_v29, 7 }
 0xa9b   :  { %v2433_v46 = vpack.c.bf16 %v6824_v48, %v6824_v48  ;;  %v4468_v8 = vrot.slane %v6824_v48, 2  ;;  %v6835_v4 = vadd.f32 %v6682_v44, %v2390_v49  ;;  %v6839_v60 = vadd.f32 %v2421_v34, %v2389_v58 }
 0xa9d   :  { %v2449_v31 = vunpack.c.l.b16 %v2433_v46  ;;  %v4470_v9 = vsel %vm1078_vm12, %v4469_v0, %v4468_v8  ;;  %v2438_v3 = vpack.c.bf16 %v6835_v4, %v6835_v4  ;;  %v2437_v14 = vpack.c.bf16 %v6839_v60, %v6839_v60 }
 0xa9e   :  { %v4471_v44 = vsel %vm1080_vm13, %v6818_v56, %v4470_v9  ;;  %v4473_v26 = vrot.slane %v6839_v60, 6  ;;  %v2374_v50 = vpop.permute.xlu1 %2373  ;;  %v4475_v5 = vrot.slane %v6835_v4, 5 }
 0xa9f   :  { %v2457_v27 = vrot.slane %v2449_v31, 2  ;;  %v2454_v7 = vunpack.c.l.b16 %v2438_v3  ;;  %v2391_v28 = vmul.f32 %v2374_v50, %v2351_v10  ;;  %v2453_v13 = vunpack.c.l.b16 %v2437_v14 }
 0xaa0   :  { %v2376_v16 = vpop.permute.xlu2 %2375  ;;  %v4472_v53 = vsel %vm1082_vm14, %v2805_v57, %v4471_v44 }
 0xaa1   :  { %v2459_v25 = vsel %vm1078_vm12, %v2458_v42, %v2457_v27  ;;  %v6857_v33 = vadd.f32 %v2423_v51, %v2391_v28  ;;  %v2392_v59 = vmul.f32 %v2376_v16, %v2352_v36  ;;  %v2465_v12 = vrot.slane %v2454_v7, 5 }
 0xaa2   :  { %v2460_v52 = vsel %vm1080_vm13, %v2451_v35, %v2459_v25  ;;  %v2463_v19 = vrot.slane %v2453_v13, 6  ;;  %v4474_v61 = vsel %vm1084_vm15, %v4473_v26, %v4472_v53 }
 0xaa3   :  { %v2439_v63 = vpack.c.bf16 %v6857_v33, %v6857_v33  ;;  %v4477_v21 = vrot.slane %v6857_v33, 4  ;;  %v6864_v37 = vadd.f32 %v2424_v54, %v2392_v59  ;;  %v2462_v41 = vsel %vm1082_vm14, %v2461_v18, %v2460_v52 }
 0xaa4   :  { %v2464_v17 = vsel %vm1084_vm15, %v2463_v19, %v2462_v41  ;;  %v4476_v47 = vsel %vm1086_vm2, %v4475_v5, %v4474_v61 }
 0xaa5   :  { %v2455_v55 = vunpack.c.l.b16 %v2439_v63  ;;  %v2440_v20 = vpack.c.bf16 %v6864_v37, %v6864_v37  ;;  %v4479_v49 = vrot.slane %v6864_v37, 3  ;;  %v2466_v34 = vsel %vm1086_vm2, %v2465_v12, %v2464_v17 }
 0xaa6   :  { %v4478_v62 = vsel %vm1088_vm3, %v4477_v21, %v4476_v47 }
 0xaa7   :  { %v2467_v0 = vrot.slane %v2455_v55, 4  ;;  %v2456_v58 = vunpack.c.l.b16 %v2440_v20  ;;  %v6875_v10 = vsel %vm1090_vm4, %v4479_v49, %v4478_v62 }
 0xaa9   :  { %v2469_v51 = vrot.slane %v2456_v58, 3  ;;  %v2468_v2 = vsel %vm1088_vm3, %v2467_v0, %v2466_v34  ;;  %v2803_v58 = vrot.slane %v6806_v38, 7 }
 0xaab   :  { %v2470_v46 = vsel %vm1090_vm4, %v2469_v51, %v2468_v2 }
 0xaac   :  { %v2471_v8 = vpack.c.b16 %v2470_v46, %v2470_v46  ;;  %v2809_v46 = vrot.slane %v6864_v37, 7 }
 0xaae   :  { %2472 = vrot.lane.b32.xlu0 %v2471_v8, %s5514_s1 }
 0xb20   :  { %v2473_v6 = vpop.permute.xlu0 %2472 }
 0xb21   :  { %4859 = vmatmul.msk.bf16.vlgmr.msra.gmra.mxu3 %vm8136_vm8, %v2473_v6 }
 0xba4   :  { %v2486_v29 = vpop.f32.mrf.mxu3 }
 0xba5   :  { %v6882_v36 = vadd.f32 %v6649_v43, %v2486_v29 }
 0xba7   :  { %2672 = vrot.lane.b32.xlu2 %v6882_v36, %s5513_s21  ;;  %v2493_v31 = vrot.slane %v6882_v36, 7  ;;  %v2491_v9 = vrot.slane %v6882_v36, 5  ;;  %v2492_v3 = vrot.slane %v6882_v36, 6  ;;  %v2497_v54 = vrot.slane %v6882_v36, 4 }
 0xba8   :  { %v2495_v42 = vrot.slane %v6882_v36, 2  ;;  %v2494_v27 = vrot.slane %v6882_v36, 1  ;;  %v2496_v35 = vrot.slane %v6882_v36, 3  ;;  %v2509_v0 = vadd.f32 %v6882_v36, %v6259_v24 }
 0xba9   :  { %2670 = vrot.lane.b32.xlu0 %v2493_v31, %s5513_s21  ;;  %2666 = vrot.lane.b32.xlu1 %v2491_v9, %s5513_s21  ;;  %v2507_v43 = vadd.f32 %v2492_v3, %v6212_v30  ;;  %v2513_v44 = vadd.f32 %v2497_v54, %v6290_v45  ;;  %v2506_v38 = vadd.f32 %v2491_v9, %v6197_v11 }
 0xbaa   :  { %v4863_v8 = vmul.f32 -1.442695, %v2509_v0  ;;  %v2512_v36 = vadd.f32 %v2496_v35, %v6277_v32 }
 0xbab   :  { %v4861_v14 = vmul.f32 -1.442695, %v2507_v43  ;;  %v4867_v50 = vmul.f32 -1.442695, %v2513_v44 }
 0xbac   :  { %v2488_v26 = vpop.f32.mrf.mxu3 }
 0xbad   :  { %5261 = vpow2.f32 %v4861_v14  ;;  %v4860_v14 = vmul.f32 -1.442695, %v2506_v38  ;;  %v2511_v26 = vadd.f32 %v2495_v42, %v6271_v15 }
 0xbae   :  { %5263 = vpow2.f32 %v4867_v50  ;;  %v2510_v50 = vadd.f32 %v2494_v27, %v6265_v39 }
 0xbaf   :  { %2668 = vrot.lane.b32.xlu2 %v2492_v3, %s5513_s21 }
 0xbb1   :  { %2676 = vrot.lane.b32.xlu0 %v2495_v42, %s5513_s21  ;;  %2674 = vrot.lane.b32.xlu1 %v2494_v27, %s5513_s21  ;;  %v4866_v27 = vmul.f32 -1.442695, %v2512_v36 }
 0xbb3   :  { %v5262_v7 = vpop.eup %5261 }
 0xbb4   :  { %v2539_v28 = vadd.f32 1.0, %v5262_v7  ;;  %v5264_v18 = vpop.eup %5263 }
 0xbb5   :  { %v2545_v13 = vadd.f32 1.0, %v5264_v18  ;;  %v4864_v18 = vmul.f32 -1.442695, %v2510_v50 }
 0xbb6   :  { %5265 = vrcp.f32 %v2539_v28  ;;  %v2572_v63 = vand.u32 2147483648, %v2539_v28  ;;  %vm2566_vm9 = vweird.f32 %v2539_v28  ;;  %v2570_v21 = vand.u32 2147483647, %v2539_v28 }
 0xbb7   :  { %2680 = vrot.lane.b32.xlu2 %v2497_v54, %s5513_s21  ;;  %5267 = vrcp.f32 %v2545_v13  ;;  %v2662_v17 = vand.u32 2147483648, %v2545_v13  ;;  %vm2656_vm6 = vweird.f32 %v2545_v13  ;;  %v2660_v55 = vand.u32 2147483647, %v2545_v13 }
 0xbb8   :  { %v2573_v20 = vor.u32 1.1754944e-38, %v2572_v63  ;;  %vm2571_vm1 = vcmp.eq.f32.partialorder %v2570_v21, 8.507059e+37  ;;  %5269 = vpow2.f32 %v4863_v8  ;;  %v2508_v54 = vadd.f32 %v2493_v31, %v6253_v22 }
 0xbb9   :  { %2678 = vrot.lane.b32.xlu1 %v2496_v35, %s5513_s21  ;;  %v2663_v62 = vor.u32 1.1754944e-38, %v2662_v17  ;;  %vm2661_vm5 = vcmp.eq.f32.partialorder %v2660_v55, 8.507059e+37 }
 0xbba   :  { %v4862_v44 = vmul.f32 -1.442695, %v2508_v54 }
 0xbbc   :  { %v5266_v16 = vpop.eup %5265 }
 0xbbd   :  { %v2562_v53 = vmul.f32 %v5266_v16, %v2539_v28  ;;  %v5268_v25 = vpop.eup %5267  ;;  %vm2567_vm11 = vweird.f32 %v5266_v16  ;;  %v4865_v28 = vmul.f32 -1.442695, %v2511_v26 }
 0xbbe   :  { %v2652_v59 = vmul.f32 %v5268_v25, %v2545_v13  ;;  %vm2657_vm10 = vweird.f32 %v5268_v25  ;;  %vm2568_vm0 = vmor %vm2566_vm9, %vm2567_vm11  ;;  %v5270_v29 = vpop.eup %5269 }
 0xbbf   :  { %v2563_v5 = vsub.f32 1.0, %v2562_v53  ;;  %vm2658_vm7 = vmor %vm2656_vm6, %vm2657_vm10  ;;  %v2541_v3 = vadd.f32 1.0, %v5270_v29 }
 0xbc0   :  { %v2653_v12 = vsub.f32 1.0, %v2652_v59 }
 0xbc1   :  { %v2564_v52 = vmul.f32 %v5266_v16, %v2563_v5  ;;  %5271 = vrcp.f32 %v2541_v3  ;;  %v2602_v42 = vand.u32 2147483648, %v2541_v3  ;;  %vm2596_vm11 = vweird.f32 %v2541_v3 }
 0xbc2   :  { %v2654_v19 = vmul.f32 %v5268_v25, %v2653_v12  ;;  %5273 = vpow2.f32 %v4862_v44  ;;  %v2600_v5 = vand.u32 2147483647, %v2541_v3 }
 0xbc3   :  { %v2565_v61 = vadd.f32 %v5266_v16, %v2564_v52  ;;  %5275 = vpow2.f32 %v4860_v14  ;;  %v2603_v12 = vor.u32 1.1754944e-38, %v2602_v42 }
 0xbc4   :  { %v2655_v41 = vadd.f32 %v5268_v25, %v2654_v19  ;;  %5277 = vpow2.f32 %v4865_v28  ;;  %vm2601_vm10 = vcmp.eq.f32.partialorder %v2600_v5, 8.507059e+37 }
 0xbc5   :  { %v2569_v47 = vsel %vm2568_vm0, %v5266_v16, %v2565_v61  ;;  %5279 = vpow2.f32 %v4864_v18 }
 0xbc6   :  { %v2659_v49 = vsel %vm2658_vm7, %v5268_v25, %v2655_v41  ;;  %v6906_v34 = vsel %vm2571_vm1, %v2573_v20, %v2569_v47 }
 0xbc7   :  { %v6911_v51 = vsel %vm2661_vm5, %v2663_v62, %v2659_v49  ;;  %v6914_v2 = vmul.f32 %v2803_v58, %v6906_v34  ;;  %v5272_v43 = vpop.eup %5271 }
 0xbc8   :  { %v6918_v6 = vmul.f32 %v2809_v46, %v6911_v51  ;;  %v2592_v37 = vmul.f32 %v5272_v43, %v2541_v3  ;;  %v5274_v16 = vpop.eup %5273  ;;  %vm2597_vm8 = vweird.f32 %v5272_v43 }
 0xbc9   :  { %v5276_v31 = vpop.eup %5275  ;;  %v6929_v9 = vadd.f32 1.0, %v5274_v16  ;;  %vm2598_vm9 = vmor %vm2596_vm11, %vm2597_vm8 }
 0xbca   :  { %v2593_v7 = vsub.f32 1.0, %v2592_v37  ;;  %v6931_v25 = vadd.f32 1.0, %v5276_v31  ;;  %v5278_v52 = vpop.eup %5277 }
 0xbcb   :  { %5281 = vrcp.f32 %v6929_v9  ;;  %v5280_v35 = vpop.eup %5279  ;;  %v6937_v63 = vadd.f32 1.0, %v5278_v52  ;;  %vm2581_vm7 = vweird.f32 %v6929_v9  ;;  %v2585_v36 = vand.u32 2147483647, %v6929_v9 }
 0xbcc   :  { %v2594_v13 = vmul.f32 %v5272_v43, %v2593_v7  ;;  %5283 = vrcp.f32 %v6931_v25  ;;  %v6940_v41 = vadd.f32 1.0, %v5280_v35  ;;  %v2557_v16 = vand.u32 2147483648, %v6931_v25 }
 0xbcd   :  { %5285 = vpow2.f32 %v4866_v27  ;;  %vm2551_vm5 = vweird.f32 %v6931_v25  ;;  %vm2586_vm11 = vcmp.eq.f32.partialorder %v2585_v36, 8.507059e+37 }
 0xbce   :  { %v2595_v53 = vadd.f32 %v5272_v43, %v2594_v13  ;;  %5287 = vrcp.f32 %v6937_v63  ;;  %v2587_v13 = vand.u32 2147483648, %v6929_v9  ;;  %v2558_v35 = vor.u32 1.1754944e-38, %v2557_v16 }
 0xbcf   :  { %5289 = vrcp.f32 %v6940_v41 }
 0xbd0   :  { %v2599_v59 = vsel %vm2598_vm9, %v5272_v43, %v2595_v53  ;;  %v2555_v53 = vand.u32 2147483647, %v6931_v25 }
 0xbd1   :  { %v6935_v61 = vsel %vm2601_vm10, %v2603_v12, %v2599_v59  ;;  %v5282_v17 = vpop.eup %5281  ;;  %v2588_v12 = vor.u32 1.1754944e-38, %v2587_v13 }
 0xbd2   :  { %v5284_v47 = vpop.eup %5283  ;;  %v2577_v20 = vmul.f32 %v5282_v17, %v6929_v9  ;;  %vm2582_vm0 = vweird.f32 %v5282_v17  ;;  %vm2556_vm9 = vcmp.eq.f32.partialorder %v2555_v53, 8.507059e+37 }
 0xbd3   :  { %v5286_v55 = vpop.eup %5285  ;;  %v2547_v49 = vmul.f32 %v5284_v47, %v6931_v25  ;;  %vm2552_vm6 = vweird.f32 %v5284_v47  ;;  %vm6967_vm1 = vmor %vm2581_vm7, %vm2582_vm0 }
 0xbd4   :  { %v6948_v58 = vadd.f32 1.0, %v5286_v55  ;;  %v6950_v46 = vpop.eup %5287  ;;  %v2578_v8 = vsub.f32 1.0, %v2577_v20  ;;  %vm2553_vm8 = vmor %vm2551_vm5, %vm2552_vm6  ;;  %vm2626_vm6 = vweird.f32 %v6937_v63 }
 0xbd5   :  { %v2548_v29 = vsub.f32 1.0, %v2547_v49  ;;  %v6953_v3 = vpop.eup %5289  ;;  %v2622_v54 = vmul.f32 %v6950_v46, %v6937_v63  ;;  %vm2627_vm10 = vweird.f32 %v6950_v46 }
 0xbd6   :  { %5291 = vrcp.f32 %v6948_v58  ;;  %v2579_v38 = vmul.f32 %v5282_v17, %v2578_v8  ;;  %v2607_v44 = vmul.f32 %v6953_v3, %v6940_v41  ;;  %vm2612_vm0 = vweird.f32 %v6953_v3  ;;  %vm2628_vm7 = vmor %vm2626_vm6, %vm2627_vm10 }
 0xbd7   :  { %v2549_v43 = vmul.f32 %v5284_v47, %v2548_v29  ;;  %v2623_v26 = vsub.f32 1.0, %v2622_v54  ;;  %v2630_v8 = vand.u32 2147483647, %v6937_v63  ;;  %v2615_v29 = vand.u32 2147483647, %v6940_v41 }
 0xbd8   :  { %v2580_v50 = vadd.f32 %v5282_v17, %v2579_v38  ;;  %v2608_v28 = vsub.f32 1.0, %v2607_v44  ;;  %vm2641_vm10 = vweird.f32 %v6948_v58 }
 0xbd9   :  { %v2550_v7 = vadd.f32 %v5284_v47, %v2549_v43  ;;  %v2624_v42 = vmul.f32 %v6950_v46, %v2623_v26 }
 0xbda   :  { %v2584_v5 = vsel %vm6967_vm1, %v5282_v17, %v2580_v50  ;;  %v2609_v59 = vmul.f32 %v6953_v3, %v2608_v28  ;;  %vm2611_vm1 = vweird.f32 %v6940_v41  ;;  %v2645_v28 = vand.u32 2147483647, %v6948_v58 }
 0xbdb   :  { %v2554_v27 = vsel %vm2553_vm8, %v5284_v47, %v2550_v7  ;;  %v6981_v25 = vsel %vm2586_vm11, %v2588_v12, %v2584_v5  ;;  %v2625_v17 = vadd.f32 %v6950_v46, %v2624_v42  ;;  %vm2613_vm5 = vmor %vm2611_vm1, %vm2612_vm0  ;;  %vm2631_vm8 = vcmp.eq.f32.partialorder %v2630_v8, 8.507059e+37 }
 0xbdc   :  { %v6962_v18 = vpop.eup %5291  ;;  %v2610_v20 = vadd.f32 %v6953_v3, %v2609_v59  ;;  %vm2616_vm11 = vcmp.eq.f32.partialorder %v2615_v29, 8.507059e+37  ;;  %vm2646_vm6 = vcmp.eq.f32.partialorder %v2645_v28, 8.507059e+37 }
 0xbdd   :  { %v2637_v52 = vmul.f32 %v6962_v18, %v6948_v58  ;;  %v2629_v54 = vsel %vm2628_vm7, %v6950_v46, %v2625_v17  ;;  %vm8139_vm7 = vcmask 261120  }
 0xbde   :  { %v2614_v38 = vsel %vm2613_vm5, %v6953_v3, %v2610_v20  ;;  %v2647_v3 = vand.u32 2147483648, %v6948_v58 }
 0xbdf   :  { %v2638_v49 = vsub.f32 1.0, %v2637_v52 }
 0xbe0   :  { %v2648_v16 = vor.u32 1.1754944e-38, %v2647_v3 }
 0xbe1   :  { %v2639_v43 = vmul.f32 %v6962_v18, %v2638_v49 }
 0xbe3   :  { %v2640_v46 = vadd.f32 %v6962_v18, %v2639_v43 }
 0xc01   :  { %v2673_v19 = vpop.permute.xlu2 %2672 }
 0xc02   :  { %v2693_v21 = vmul.f32 %v2673_v19, %v6935_v61 }
 0xc04   :  { %2712 = vrot.lane.b32.xlu1 %v2693_v21, %s5513_s21  ;;  %v6983_v21 = vsel %vm2556_vm9, %v2558_v35, %v2554_v27  ;;  %vm2642_vm9 = vweird.f32 %v6962_v18 }
 0xc05   :  { %vm2643_vm0 = vmor %vm2641_vm10, %vm2642_vm9 }
 0xc06   :  { %v2644_v13 = vsel %vm2643_vm0, %v6962_v18, %v2640_v46 }
 0xc07   :  { %v7017_v31 = vsel %vm2646_vm6, %v2648_v16, %v2644_v13 }
 0xc09   :  { %v2669_v62 = vpop.permute.xlu2 %2668 }
 0xc0a   :  { %v2691_v0 = vmul.f32 %v2669_v62, %v6906_v34  ;;  %v2632_v62 = vand.u32 2147483648, %v6937_v63 }
 0xc0c   :  { %2708 = vrot.lane.b32.xlu1 %v2691_v0, %s5513_s21  ;;  %v2617_v0 = vand.u32 2147483648, %v6940_v41  ;;  %v2633_v44 = vor.u32 1.1754944e-38, %v2632_v62 }
 0xc11   :  { %v2681_v14 = vpop.permute.xlu2 %2680 }
 0xc12   :  { %v2697_v37 = vmul.f32 %v2681_v14, %v6911_v51  ;;  %v2618_v14 = vor.u32 1.1754944e-38, %v2617_v0 }
 0xc14   :  { %2720 = vrot.lane.b32.xlu1 %v2697_v37, %s5513_s21  ;;  %v7003_v37 = vsel %vm2631_vm8, %v2633_v44, %v2629_v54  ;;  %v7005_v50 = vsel %vm2616_vm11, %v2618_v14, %v2614_v38 }
 0xc1b   :  { %v2671_v9 = vpop.permute.xlu0 %2670  ;;  %v2667_v19 = vpop.permute.xlu1 %2666 }
 0xc1c   :  { %v2692_v47 = vmul.f32 %v2671_v9, %v6981_v25  ;;  %v2690_v55 = vmul.f32 %v2667_v19, %v6983_v21 }
 0xc1e   :  { %2710 = vrot.lane.b32.xlu2 %v2692_v47, %s5513_s21  ;;  %2706 = vrot.lane.b32.xlu0 %v2690_v55, %s5513_s21 }
 0xc23   :  { %v2677_v26 = vpop.permute.xlu0 %2676  ;;  %v2675_v63 = vpop.permute.xlu1 %2674 }
 0xc24   :  { %v2695_v7 = vmul.f32 %v2677_v26, %v7003_v37  ;;  %v2694_v41 = vmul.f32 %v2675_v63, %v7005_v50  ;;  %v2748_v26 = vsub.f32 1.0, %v6981_v25  ;;  %v2746_v63 = vsub.f32 1.0, %v6983_v21 }
 0xc26   :  { %2716 = vrot.lane.b32.xlu2 %v2695_v7, %s5513_s21  ;;  %2714 = vrot.lane.b32.xlu0 %v2694_v41, %s5513_s21  ;;  %v2802_v7 = vrot.slane %v6824_v48, 7  ;;  %v2804_v41 = vrot.slane %v6818_v56, 7 }
 0xc28   :  { %v2818_v13 = vmul.f32 %v2802_v7, %v6983_v21  ;;  %v2821_v21 = vmul.f32 %v2805_v57, %v6935_v61 }
 0xc2b   :  { %v2679_v36 = vpop.permute.xlu1 %2678 }
 0xc2c   :  { %v2696_v53 = vmul.f32 %v2679_v36, %v7017_v31  ;;  %v2820_v36 = vmul.f32 %v2804_v41, %v6981_v25 }
 0xc2e   :  { %2718 = vrot.lane.b32.xlu0 %v2696_v53, %s5513_s21  ;;  %v2749_v53 = vsub.f32 1.0, %v6935_v61 }
 0xc76   :  { %v2713_v42 = vpop.permute.xlu1 %2712 }
 0xc77   :  { %v2733_v5 = vadd.f32 %v2713_v42, %v6259_v24 }
 0xc78   :  { %v2711_v27 = vpop.permute.xlu2 %2710 }
 0xc79   :  { %5293 = vtanh.f32 %v2733_v5  ;;  %v2732_v59 = vadd.f32 %v2711_v27, %v6253_v22 }
 0xc7b   :  { %5295 = vtanh.f32 %v2732_v59  ;;  %v2747_v59 = vsub.f32 1.0, %v6906_v34 }
 0xc7e   :  { %v2709_v58 = vpop.permute.xlu1 %2708 }
 0xc7f   :  { %v5294_v52 = vpop.eup %5293  ;;  %v2731_v18 = vadd.f32 %v2709_v58, %v6212_v30  ;;  %v2807_v58 = vrot.slane %v6835_v4, 7  ;;  %v2808_v4 = vrot.slane %v6857_v33, 7 }
 0xc80   :  { %v2717_v12 = vpop.permute.xlu2 %2716  ;;  %2768 = vrot.lane.b32.xlu0 %v5294_v52, %s5514_s1  ;;  %v2751_v52 = vsub.f32 1.0, %v7003_v37 }
 0xc81   :  { %v5296_v35 = vpop.eup %5295  ;;  %5297 = vtanh.f32 %v2731_v18  ;;  %v2735_v9 = vadd.f32 %v2717_v12, %v6271_v15  ;;  %v2806_v18 = vrot.slane %v6839_v60, 7  ;;  %v2823_v34 = vmul.f32 %v2807_v58, %v7003_v37 }
 0xc82   :  { %2766 = vrot.lane.b32.xlu1 %v5296_v35, %s5514_s1  ;;  %v2752_v37 = vsub.f32 1.0, %v7017_v31 }
 0xc83   :  { %5299 = vtanh.f32 %v2735_v9  ;;  %v2750_v9 = vsub.f32 1.0, %v7005_v50  ;;  %v2822_v61 = vmul.f32 %v2806_v18, %v7005_v50  ;;  %v2824_v50 = vmul.f32 %v2808_v4, %v7017_v31 }
 0xc86   :  { %v2721_v19 = vpop.permute.xlu1 %2720 }
 0xc87   :  { %v5298_v17 = vpop.eup %5297  ;;  %v2737_v47 = vadd.f32 %v2721_v19, %v6290_v45 }
 0xc88   :  { %2764 = vrot.lane.b32.xlu0 %v5298_v17, %s5514_s1 }
 0xc89   :  { %v5300_v55 = vpop.eup %5299  ;;  %5301 = vtanh.f32 %v2737_v47 }
 0xc8a   :  { %2772 = vrot.lane.b32.xlu1 %v5300_v55, %s5514_s1  ;;  %v2753_v55 = vsub.f32 1.0, %v6911_v51 }
 0xc8f   :  { %v5302_v20 = vpop.eup %5301 }
 0xc90   :  { %2776 = vrot.lane.b32.xlu0 %v5302_v20, %s5514_s1  ;;  %v2707_v49 = vpop.permute.xlu0 %2706 }
 0xc91   :  { %v2730_v62 = vadd.f32 %v2707_v49, %v6197_v11 }
 0xc93   :  { %5303 = vtanh.f32 %v2730_v62 }
 0xc98   :  { %v2715_v0 = vpop.permute.xlu0 %2714 }
 0xc99   :  { %v5304_v8 = vpop.eup %5303  ;;  %v2734_v29 = vadd.f32 %v2715_v0, %v6265_v39 }
 0xc9a   :  { %2762 = vrot.lane.b32.xlu2 %v5304_v8, %s5514_s1 }
 0xc9b   :  { %5305 = vtanh.f32 %v2734_v29 }
 0xca0   :  { %v2719_v54 = vpop.permute.xlu0 %2718 }
 0xca1   :  { %v5306_v38 = vpop.eup %5305  ;;  %v2736_v43 = vadd.f32 %v2719_v54, %v6277_v32 }
 0xca2   :  { %2770 = vrot.lane.b32.xlu2 %v5306_v38, %s5514_s1 }
 0xca3   :  { %5307 = vtanh.f32 %v2736_v43 }
 0xca9   :  { %v5308_v44 = vpop.eup %5307 }
 0xcaa   :  { %2774 = vrot.lane.b32.xlu2 %v5308_v44, %s5514_s1 }
 0xcf2   :  { %v2769_v14 = vpop.permute.xlu0 %2768 }
 0xcf3   :  { %v2789_v27 = vmul.f32 %v2769_v14, %v2749_v53 }
 0xcf4   :  { %v2767_v46 = vpop.permute.xlu1 %2766  ;;  %v2763_v3 = vpop.permute.xlu2 %2762 }
 0xcf5   :  { %v2788_v28 = vmul.f32 %v2767_v46, %v2748_v26  ;;  %v2786_v16 = vmul.f32 %v2763_v3, %v2746_v63  ;;  %v7062_v17 = vadd.f32 %v2821_v21, %v2789_v27 }
 0xcf7   :  { %v7044_v42 = vadd.f32 %v2818_v13, %v2786_v16  ;;  %v7046_v5 = vadd.f32 %v2820_v36, %v2788_v28  ;;  %v2837_v51 = vpack.c.bf16 %v7062_v17, %v7062_v17 }
 0xcf9   :  { %v2834_v56 = vpack.c.bf16 %v7044_v42, %v7044_v42  ;;  %v2836_v12 = vpack.c.bf16 %v7046_v5, %v7046_v5  ;;  %v4484_v20 = vrot.slane %v7044_v42, 3  ;;  %v4487_v0 = vrot.slane %v7046_v5, 1 }
 0xcfa   :  { %v2765_v48 = vpop.permute.xlu0 %2764  ;;  %v2853_v53 = vunpack.c.l.b16 %v2837_v51 }
 0xcfb   :  { %v2787_v25 = vmul.f32 %v2765_v48, %v2747_v59  ;;  %v2850_v60 = vunpack.c.l.b16 %v2834_v56 }
 0xcfc   :  { %v2773_v35 = vpop.permute.xlu1 %2772  ;;  %v2771_v19 = vpop.permute.xlu2 %2770 }
 0xcfd   :  { %v7065_v1 = vadd.f32 %v6914_v2, %v2787_v25  ;;  %v2791_v57 = vmul.f32 %v2773_v35, %v2751_v52  ;;  %v2790_v47 = vmul.f32 %v2771_v19, %v2750_v9  ;;  %v2852_v2 = vunpack.c.l.b16 %v2836_v12 }
 0xcfe   :  { %v2858_v43 = vrot.slane %v2850_v60, 3 }
 0xcff   :  { %v2835_v49 = vpack.c.bf16 %v7065_v1, %v7065_v1  ;;  %v4485_v33 = vrot.slane %v7065_v1, 2  ;;  %v7074_v62 = vadd.f32 %v2823_v34, %v2791_v57  ;;  %v7077_v8 = vadd.f32 %v2822_v61, %v2790_v47 }
 0xd00   :  { %v2861_v3 = vrot.slane %v2852_v2, 1 }
 0xd01   :  { %v2851_v29 = vunpack.c.l.b16 %v2835_v49  ;;  %v4486_v54 = vsel %vm1078_vm12, %v4485_v33, %v4484_v20  ;;  %v2839_v38 = vpack.c.bf16 %v7074_v62, %v7074_v62  ;;  %v2838_v44 = vpack.c.bf16 %v7077_v8, %v7077_v8 }
 0xd02   :  { %v3207_v14 = vrot.slane %v7077_v8, 7  ;;  %v4488_v26 = vsel %vm1080_vm13, %v4487_v0, %v4486_v54  ;;  %v2777_v63 = vpop.permute.xlu0 %2776  ;;  %v4491_v28 = vrot.slane %v7074_v62, 6  ;;  %v7123_v0 = vld [vmem:[%s8120_s11] ss:$0 sm:$0xff] }
 0xd03   :  { %v2859_v7 = vrot.slane %v2851_v29, 2  ;;  %v2855_v31 = vunpack.c.l.b16 %v2839_v38  ;;  %v4489_v41 = vsel %vm1082_vm14, %v7062_v17, %v4488_v26  ;;  %v2793_v46 = vmul.f32 %v2777_v63, %v2753_v55 }
 0xd04   :  { %v2854_v13 = vunpack.c.l.b16 %v2838_v44  ;;  %v4490_v16 = vsel %vm1084_vm15, %v3207_v14, %v4489_v41  ;;  %v2775_v36 = vpop.permute.xlu2 %2774 }
 0xd05   :  { %v2860_v27 = vsel %vm1078_vm12, %v2859_v7, %v2858_v43  ;;  %v7097_v59 = vadd.f32 %v6918_v6, %v2793_v46  ;;  %v2792_v56 = vmul.f32 %v2775_v36, %v2752_v37  ;;  %v4492_v21 = vsel %vm1086_vm2, %v4491_v28, %v4490_v16 }
 0xd06   :  { %v2862_v48 = vsel %vm1080_vm13, %v2861_v3, %v2860_v27  ;;  %v2864_v58 = vrot.slane %v2854_v13, 7  ;;  %v2866_v25 = vrot.slane %v2855_v31, 6 }
 0xd07   :  { %v2863_v52 = vsel %vm1082_vm14, %v2853_v53, %v2862_v48  ;;  %v2841_v18 = vpack.c.bf16 %v7097_v59, %v7097_v59  ;;  %v7104_v12 = vadd.f32 %v2824_v50, %v2792_v56  ;;  %v4495_v4 = vrot.slane %v7097_v59, 4 }
 0xd08   :  { %v2865_v34 = vsel %vm1084_vm15, %v2864_v58, %v2863_v52 }
 0xd09   :  { %v2840_v6 = vpack.c.bf16 %v7104_v12, %v7104_v12  ;;  %v4493_v35 = vrot.slane %v7104_v12, 5  ;;  %v2867_v9 = vsel %vm1086_vm2, %v2866_v25, %v2865_v34  ;;  %v2857_v19 = vunpack.c.l.b16 %v2841_v18 }
 0xd0b   :  { %v2856_v57 = vunpack.c.l.b16 %v2840_v6  ;;  %v4494_v61 = vsel %vm1088_vm3, %v4493_v35, %v4492_v21  ;;  %v2870_v55 = vrot.slane %v2857_v19, 4 }
 0xd0c   :  { %v7114_v60 = vsel %vm1090_vm4, %v4495_v4, %v4494_v61 }
 0xd0d   :  { %v2868_v47 = vrot.slane %v2856_v57, 5 }
 0xd0f   :  { %v2869_v37 = vsel %vm1088_vm3, %v2868_v47, %v2867_v9 }
 0xd10   :  { %v2871_v20 = vsel %vm1090_vm4, %v2870_v55, %v2869_v37  ;;  %v3203_v37 = vrot.slane %v7044_v42, 7 }
 0xd11   :  { %v2872_v49 = vpack.c.b16 %v2871_v20, %v2871_v20  ;;  %v3206_v20 = vrot.slane %v7062_v17, 7 }
 0xd13   :  { %2873 = vrot.lane.b32.xlu1 %v2872_v49, %s5514_s1 }
 0xd85   :  { %v2874_v33 = vpop.permute.xlu1 %2873 }
 0xd86   :  { %4868 = vmatmul.msk.bf16.vlgmr.msrb.gmra.mxu0 %vm8139_vm7, %v2874_v33 }
 0xe03   :  { %v2887_v2 = vpop.f32.mrf.mxu0 }
 0xe04   :  { %v7126_v50 = vadd.f32 %v7123_v0, %v2887_v2 }
 0xe06   :  { %v2894_v51 = vrot.slane %v7126_v50, 6  ;;  %v2893_v29 = vrot.slane %v7126_v50, 5  ;;  %v2892_v54 = vrot.slane %v7126_v50, 4  ;;  %v2895_v38 = vrot.slane %v7126_v50, 7 }
 0xe07   :  { %v2896_v31 = vrot.slane %v7126_v50, 1  ;;  %v2898_v28 = vrot.slane %v7126_v50, 3  ;;  %v2897_v16 = vrot.slane %v7126_v50, 2  ;;  %v2911_v17 = vadd.f32 %v7126_v50, %v6265_v39 }
 0xe08   :  { %3071 = vrot.lane.b32.xlu1 %v2894_v51, %s5513_s21  ;;  %3069 = vrot.lane.b32.xlu0 %v2893_v29, %s5513_s21  ;;  %v2907_v43 = vadd.f32 %v2892_v54, %v6197_v11  ;;  %v2910_v44 = vadd.f32 %v2895_v38, %v6259_v24 }
 0xe09   :  { %3067 = vrot.lane.b32.xlu2 %v2892_v54, %s5513_s21  ;;  %v2913_v2 = vadd.f32 %v2897_v16, %v6277_v32  ;;  %v2912_v42 = vadd.f32 %v2896_v31, %v6271_v15 }
 0xe0a   :  { %v4869_v26 = vmul.f32 -1.442695, %v2907_v43  ;;  %v4872_v7 = vmul.f32 -1.442695, %v2910_v44  ;;  %v2908_v43 = vadd.f32 %v2893_v29, %v6212_v30 }
 0xe0b   :  { %v2889_v63 = vpop.f32.mrf.mxu0  ;;  %v4875_v54 = vmul.f32 -1.442695, %v2913_v2 }
 0xe0c   :  { %5309 = vpow2.f32 %v4869_v26  ;;  %v4870_v26 = vmul.f32 -1.442695, %v2908_v43 }
 0xe0d   :  { %5311 = vpow2.f32 %v4872_v7 }
 0xe10   :  { %3075 = vrot.lane.b32.xlu1 %v7126_v50, %s5513_s21  ;;  %3077 = vrot.lane.b32.xlu0 %v2896_v31, %s5513_s21 }
 0xe11   :  { %3073 = vrot.lane.b32.xlu2 %v2895_v38, %s5513_s21  ;;  %v2909_v38 = vadd.f32 %v2894_v51, %v6253_v22  ;;  %v2914_v51 = vadd.f32 %v2898_v28, %v6290_v45 }
 0xe12   :  { %v5310_v41 = vpop.eup %5309 }
 0xe13   :  { %v2939_v46 = vadd.f32 1.0, %v5310_v41  ;;  %v5312_v3 = vpop.eup %5311  ;;  %v4871_v44 = vmul.f32 -1.442695, %v2909_v38  ;;  %v4874_v41 = vmul.f32 -1.442695, %v2912_v42 }
 0xe14   :  { %v2942_v13 = vadd.f32 1.0, %v5312_v3 }
 0xe15   :  { %5313 = vrcp.f32 %v2939_v46  ;;  %v2958_v18 = vand.u32 2147483648, %v2939_v46  ;;  %vm2952_vm8 = vweird.f32 %v2939_v46  ;;  %v2956_v6 = vand.u32 2147483647, %v2939_v46 }
 0xe16   :  { %5315 = vrcp.f32 %v2942_v13  ;;  %v3003_v35 = vand.u32 2147483648, %v2942_v13  ;;  %vm2997_vm9 = vweird.f32 %v2942_v13  ;;  %v3001_v9 = vand.u32 2147483647, %v2942_v13 }
 0xe17   :  { %v2959_v4 = vor.u32 1.1754944e-38, %v2958_v18  ;;  %vm2957_vm0 = vcmp.eq.f32.partialorder %v2956_v6, 8.507059e+37  ;;  %5317 = vpow2.f32 %v4875_v54 }
 0xe18   :  { %3081 = vrot.lane.b32.xlu0 %v2898_v28, %s5513_s21  ;;  %v3004_v61 = vor.u32 1.1754944e-38, %v3003_v35  ;;  %vm3002_vm6 = vcmp.eq.f32.partialorder %v3001_v9, 8.507059e+37  ;;  %5319 = vpow2.f32 %v4871_v44 }
 0xe19   :  { %3079 = vrot.lane.b32.xlu2 %v2897_v16, %s5513_s21  ;;  %5321 = vpow2.f32 %v4870_v26 }
 0xe1b   :  { %v5314_v36 = vpop.eup %5313 }
 0xe1c   :  { %v2948_v53 = vmul.f32 %v5314_v36, %v2939_v46  ;;  %v5316_v27 = vpop.eup %5315  ;;  %vm2953_vm1 = vweird.f32 %v5314_v36  ;;  %v4873_v46 = vmul.f32 -1.442695, %v2911_v17 }
 0xe1d   :  { %v2993_v48 = vmul.f32 %v5316_v27, %v2942_v13  ;;  %vm2998_vm5 = vweird.f32 %v5316_v27  ;;  %vm2954_vm11 = vmor %vm2952_vm8, %vm2953_vm1  ;;  %v5318_v63 = vpop.eup %5317 }
 0xe1e   :  { %v2949_v56 = vsub.f32 1.0, %v2948_v53  ;;  %vm2999_vm10 = vmor %vm2997_vm9, %vm2998_vm5  ;;  %v2945_v7 = vadd.f32 1.0, %v5318_v63  ;;  %v5320_v3 = vpop.eup %5319 }
 0xe1f   :  { %v2994_v21 = vsub.f32 1.0, %v2993_v48  ;;  %v5322_v13 = vpop.eup %5321  ;;  %v7165_v29 = vadd.f32 1.0, %v5320_v3 }
 0xe20   :  { %v2950_v58 = vmul.f32 %v5314_v36, %v2949_v56  ;;  %5323 = vrcp.f32 %v2945_v7  ;;  %v7167_v16 = vadd.f32 1.0, %v5322_v13  ;;  %v3048_v54 = vand.u32 2147483648, %v2945_v7 }
 0xe21   :  { %v2995_v25 = vmul.f32 %v5316_v27, %v2994_v21  ;;  %5325 = vpow2.f32 %v4874_v41  ;;  %vm3042_vm1 = vweird.f32 %v2945_v7  ;;  %v3046_v38 = vand.u32 2147483647, %v2945_v7 }
 0xe22   :  { %v2951_v52 = vadd.f32 %v5314_v36, %v2950_v58  ;;  %5327 = vpow2.f32 %v4873_v46  ;;  %v3049_v17 = vor.u32 1.1754944e-38, %v3048_v54  ;;  %v2988_v41 = vand.u32 2147483648, %v7165_v29 }
 0xe23   :  { %v2996_v34 = vadd.f32 %v5316_v27, %v2995_v25  ;;  %5329 = vrcp.f32 %v7165_v29  ;;  %vm3047_vm8 = vcmp.eq.f32.partialorder %v3046_v38, 8.507059e+37 }
 0xe24   :  { %v2955_v19 = vsel %vm2954_vm11, %v5314_v36, %v2951_v52  ;;  %v4876_v36 = vmul.f32 -1.442695, %v2914_v51  ;;  %5331 = vrcp.f32 %v7167_v16 }
 0xe25   :  { %v3000_v57 = vsel %vm2999_vm10, %v5316_v27, %v2996_v34  ;;  %v7146_v47 = vsel %vm2957_vm0, %v2959_v4, %v2955_v19  ;;  %vm2982_vm10 = vweird.f32 %v7165_v29 }
 0xe26   :  { %v7148_v55 = vsel %vm3002_vm6, %v3004_v61, %v3000_v57  ;;  %v7153_v49 = vmul.f32 %v3203_v37, %v7146_v47  ;;  %v5324_v31 = vpop.eup %5323  ;;  %5333 = vpow2.f32 %v4876_v36  ;;  %vm2967_vm6 = vweird.f32 %v7167_v16 }
 0xe27   :  { %v7156_v33 = vmul.f32 %v3206_v20, %v7148_v55  ;;  %v5326_v53 = vpop.eup %5325  ;;  %v3038_v27 = vmul.f32 %v5324_v31, %v2945_v7  ;;  %vm3043_vm7 = vweird.f32 %v5324_v31 }
 0xe28   :  { %v5328_v50 = vpop.eup %5327  ;;  %v7171_v56 = vadd.f32 1.0, %v5326_v53  ;;  %vm3044_vm5 = vmor %vm3042_vm1, %vm3043_vm7 }
 0xe29   :  { %v7173_v48 = vadd.f32 1.0, %v5328_v50  ;;  %v7175_v28 = vpop.eup %5329  ;;  %v3039_v52 = vsub.f32 1.0, %v3038_v27  ;;  %v2986_v50 = vand.u32 2147483647, %v7165_v29  ;;  %v2973_v27 = vand.u32 2147483648, %v7167_v16 }
 0xe2a   :  { %v7177_v21 = vpop.eup %5331  ;;  %5335 = vrcp.f32 %v7171_v56  ;;  %v2978_v34 = vmul.f32 %v7175_v28, %v7165_v29  ;;  %vm2983_vm11 = vweird.f32 %v7175_v28 }
 0xe2b   :  { %5337 = vrcp.f32 %v7173_v48  ;;  %v2963_v6 = vmul.f32 %v7177_v21, %v7167_v16  ;;  %v3040_v35 = vmul.f32 %v5324_v31, %v3039_v52  ;;  %vm2968_vm9 = vweird.f32 %v7177_v21  ;;  %vm2984_vm0 = vmor %vm2982_vm10, %vm2983_vm11 }
 0xe2c   :  { %v5334_v18 = vpop.eup %5333  ;;  %v2979_v19 = vsub.f32 1.0, %v2978_v34  ;;  %vm2969_vm7 = vmor %vm2967_vm6, %vm2968_vm9  ;;  %vm2987_vm1 = vcmp.eq.f32.partialorder %v2986_v50, 8.507059e+37  ;;  %vm3012_vm9 = vweird.f32 %v7173_v48  ;;  %v3018_v38 = vand.u32 2147483648, %v7173_v48 }
 0xe2d   :  { %v7187_v9 = vadd.f32 1.0, %v5334_v18  ;;  %v2964_v61 = vsub.f32 1.0, %v2963_v6  ;;  %v3041_v2 = vadd.f32 %v5324_v31, %v3040_v35  ;;  %v2989_v18 = vor.u32 1.1754944e-38, %v2988_v41 }
 0xe2e   :  { %v2980_v43 = vmul.f32 %v7175_v28, %v2979_v19  ;;  %v2974_v35 = vor.u32 1.1754944e-38, %v2973_v27  ;;  %v3019_v41 = vor.u32 1.1754944e-38, %v3018_v38 }
 0xe2f   :  { %5339 = vrcp.f32 %v7187_v9  ;;  %v2965_v26 = vmul.f32 %v7177_v21, %v2964_v61  ;;  %v3045_v42 = vsel %vm3044_vm5, %v5324_v31, %v3041_v2 }
 0xe30   :  { %v7189_v4 = vpop.eup %5335  ;;  %v2981_v46 = vadd.f32 %v7175_v28, %v2980_v43  ;;  %v7207_v13 = vsel %vm3047_vm8, %v3049_v17, %v3045_v42  ;;  %v3033_v43 = vand.u32 2147483648, %v7171_v56 }
 0xe31   :  { %v7191_v37 = vpop.eup %5337  ;;  %v3023_v44 = vmul.f32 %v7189_v4, %v7171_v56  ;;  %v2966_v36 = vadd.f32 %v7177_v21, %v2965_v26  ;;  %vm3028_vm11 = vweird.f32 %v7189_v4  ;;  %v3031_v26 = vand.u32 2147483647, %v7171_v56 }
 0xe32   :  { %v3008_v63 = vmul.f32 %v7191_v37, %v7173_v48  ;;  %vm3013_vm8 = vweird.f32 %v7191_v37 }
 0xe33   :  { %v3024_v7 = vsub.f32 1.0, %v3023_v44  ;;  %v2970_v34 = vsel %vm2969_vm7, %v7177_v21, %v2966_v36  ;;  %vm3014_vm10 = vmor %vm3012_vm9, %vm3013_vm8  ;;  %v3016_v44 = vand.u32 2147483647, %v7173_v48  ;;  %vm3057_vm8 = vweird.f32 %v7187_v9 }
 0xe34   :  { %v3009_v53 = vsub.f32 1.0, %v3008_v63 }
 0xe35   :  { %v7205_v3 = vpop.eup %5339  ;;  %v3025_v52 = vmul.f32 %v7189_v4, %v3024_v7  ;;  %vm3017_vm7 = vcmp.eq.f32.partialorder %v3016_v44, 8.507059e+37 }
 0xe36   :  { %v3010_v6 = vmul.f32 %v7191_v37, %v3009_v53  ;;  %v3053_v29 = vmul.f32 %v7205_v3, %v7187_v9 }
 0xe38   :  { %v3011_v2 = vadd.f32 %v7191_v37, %v3010_v6  ;;  %v3054_v54 = vsub.f32 1.0, %v3053_v29 }
 0xe3a   :  { %v3015_v63 = vsel %vm3014_vm10, %v7191_v37, %v3011_v2  ;;  %v3055_v17 = vmul.f32 %v7205_v3, %v3054_v54  ;;  %vm8140_vm10 = vcmask 261120  }
 0xe3b   :  { %v7245_v7 = vsel %vm3017_vm7, %v3019_v41, %v3015_v63 }
 0xe3c   :  { %v3056_v37 = vadd.f32 %v7205_v3, %v3055_v17 }
 0xe63   :  { %v3068_v58 = vpop.permute.xlu2 %3067 }
 0xe64   :  { %v3091_v25 = vmul.f32 %v3068_v58, %v7146_v47  ;;  %v2971_v58 = vand.u32 2147483647, %v7167_v16 }
 0xe66   :  { %3107 = vrot.lane.b32.xlu1 %v3091_v25, %s5513_s21  ;;  %v2985_v25 = vsel %vm2984_vm0, %v7175_v28, %v2981_v46  ;;  %vm2972_vm5 = vcmp.eq.f32.partialorder %v2971_v58, 8.507059e+37  ;;  %v3026_v28 = vadd.f32 %v7189_v4, %v3025_v52  ;;  %vm3027_vm0 = vweird.f32 %v7171_v56 }
 0xe67   :  { %v7224_v19 = vsel %vm2987_vm1, %v2989_v18, %v2985_v25  ;;  %v7226_v61 = vsel %vm2972_vm5, %v2974_v35, %v2970_v34  ;;  %vm3029_vm6 = vmor %vm3027_vm0, %vm3028_vm11  ;;  %v3034_v46 = vor.u32 1.1754944e-38, %v3033_v43  ;;  %vm3032_vm1 = vcmp.eq.f32.partialorder %v3031_v26, 8.507059e+37 }
 0xe68   :  { %v3030_v42 = vsel %vm3029_vm6, %v7189_v4, %v3026_v28  ;;  %vm3058_vm5 = vweird.f32 %v7205_v3  ;;  %v3063_v4 = vand.u32 2147483648, %v7187_v9 }
 0xe69   :  { %v7247_v36 = vsel %vm3032_vm1, %v3034_v46, %v3030_v42  ;;  %vm3059_vm11 = vmor %vm3057_vm8, %vm3058_vm5 }
 0xe6a   :  { %v3060_v50 = vsel %vm3059_vm11, %v7205_v3, %v3056_v37  ;;  %v3064_v27 = vor.u32 1.1754944e-38, %v3063_v4  ;;  %v3204_v37 = vrot.slane %v7065_v1, 7 }
 0xe6b   :  { %v3074_v57 = vpop.permute.xlu2 %3073 }
 0xe6c   :  { %v3094_v20 = vmul.f32 %v3074_v57, %v7148_v55 }
 0xe6e   :  { %3113 = vrot.lane.b32.xlu1 %v3094_v20, %s5513_s21 }
 0xe73   :  { %v3080_v51 = vpop.permute.xlu2 %3079 }
 0xe74   :  { %v3097_v31 = vmul.f32 %v3080_v51, %v7207_v13 }
 0xe76   :  { %3119 = vrot.lane.b32.xlu1 %v3097_v31, %s5513_s21  ;;  %v3061_v31 = vand.u32 2147483647, %v7187_v9 }
 0xe78   :  { %vm3062_vm9 = vcmp.eq.f32.partialorder %v3061_v31, 8.507059e+37  ;;  %v3147_v31 = vsub.f32 1.0, %v7146_v47 }
 0xe79   :  { %v7259_v58 = vsel %vm3062_vm9, %v3064_v27, %v3060_v50 }
 0xe7a   :  { %v3072_v16 = vpop.permute.xlu1 %3071  ;;  %v3070_v57 = vpop.permute.xlu0 %3069 }
 0xe7b   :  { %v3093_v21 = vmul.f32 %v3072_v16, %v7224_v19  ;;  %v3092_v20 = vmul.f32 %v3070_v57, %v7226_v61 }
 0xe7d   :  { %3111 = vrot.lane.b32.xlu0 %v3093_v21, %s5513_s21  ;;  %3109 = vrot.lane.b32.xlu2 %v3092_v20, %s5513_s21 }
 0xe82   :  { %v3076_v51 = vpop.permute.xlu1 %3075  ;;  %v3078_v48 = vpop.permute.xlu0 %3077 }
 0xe83   :  { %v3095_v53 = vmul.f32 %v3076_v51, %v7245_v7  ;;  %v3096_v56 = vmul.f32 %v3078_v48, %v7247_v36  ;;  %v3149_v48 = vsub.f32 1.0, %v7224_v19 }
 0xe85   :  { %3115 = vrot.lane.b32.xlu0 %v3095_v53, %s5513_s21  ;;  %3117 = vrot.lane.b32.xlu2 %v3096_v56, %s5513_s21  ;;  %v3205_v53 = vrot.slane %v7046_v5, 7  ;;  %v3148_v56 = vsub.f32 1.0, %v7226_v61 }
 0xe87   :  { %v3221_v27 = vmul.f32 %v3205_v53, %v7224_v19 }
 0xe8a   :  { %v3082_v25 = vpop.permute.xlu0 %3081 }
 0xe8b   :  { %v3098_v52 = vmul.f32 %v3082_v25, %v7259_v58 }
 0xe8d   :  { %3121 = vrot.lane.b32.xlu2 %v3098_v52, %s5513_s21 }
 0xed7   :  { %v3110_v18 = vpop.permute.xlu2 %3109 }
 0xed8   :  { %v3132_v34 = vadd.f32 %v3110_v18, %v6212_v30  ;;  %v3108_v6 = vpop.permute.xlu1 %3107  ;;  %v3220_v18 = vmul.f32 %v3204_v37, %v7226_v61 }
 0xed9   :  { %v3131_v29 = vadd.f32 %v3108_v6, %v6197_v11 }
 0xeda   :  { %5341 = vtanh.f32 %v3132_v34 }
 0xedb   :  { %5343 = vtanh.f32 %v3131_v29 }
 0xedf   :  { %v3118_v9 = vpop.permute.xlu2 %3117 }
 0xee0   :  { %v5342_v35 = vpop.eup %5341  ;;  %v3136_v3 = vadd.f32 %v3118_v9, %v6271_v15  ;;  %v3114_v16 = vpop.permute.xlu1 %3113 }
 0xee1   :  { %v5344_v57 = vpop.eup %5343  ;;  %v3134_v28 = vadd.f32 %v3114_v16, %v6259_v24  ;;  %3165 = vrot.lane.b32.xlu1 %v5342_v35, %s5514_s1  ;;  %v3208_v16 = vrot.slane %v7074_v62, 7 }
 0xee2   :  { %5345 = vtanh.f32 %v3136_v3  ;;  %3163 = vrot.lane.b32.xlu0 %v5344_v57, %s5514_s1 }
 0xee3   :  { %5347 = vtanh.f32 %v3134_v28  ;;  %v3151_v28 = vsub.f32 1.0, %v7245_v7 }
 0xee7   :  { %v3122_v21 = vpop.permute.xlu2 %3121 }
 0xee8   :  { %v5346_v20 = vpop.eup %5345  ;;  %v3138_v2 = vadd.f32 %v3122_v21, %v6290_v45  ;;  %v3120_v54 = vpop.permute.xlu1 %3119  ;;  %v3150_v21 = vsub.f32 1.0, %v7148_v55  ;;  %v3224_v55 = vmul.f32 %v3208_v16, %v7247_v36 }
 0xee9   :  { %v5348_v38 = vpop.eup %5347  ;;  %v3137_v43 = vadd.f32 %v3120_v54, %v6277_v32  ;;  %3173 = vrot.lane.b32.xlu1 %v5346_v20, %s5514_s1  ;;  %v3223_v54 = vmul.f32 %v3207_v14, %v7245_v7 }
 0xeea   :  { %5349 = vtanh.f32 %v3138_v2  ;;  %3169 = vrot.lane.b32.xlu0 %v5348_v38, %s5514_s1 }
 0xeeb   :  { %5351 = vtanh.f32 %v3137_v43  ;;  %v3152_v43 = vsub.f32 1.0, %v7247_v36 }
 0xeef   :  { %v3112_v44 = vpop.permute.xlu0 %3111 }
 0xef0   :  { %v5350_v26 = vpop.eup %5349  ;;  %v3133_v63 = vadd.f32 %v3112_v44, %v6253_v22 }
 0xef1   :  { %v5352_v42 = vpop.eup %5351  ;;  %3177 = vrot.lane.b32.xlu1 %v5350_v26, %s5514_s1 }
 0xef2   :  { %5353 = vtanh.f32 %v3133_v63  ;;  %3175 = vrot.lane.b32.xlu0 %v5352_v42, %s5514_s1 }
 0xef7   :  { %v3116_v17 = vpop.permute.xlu0 %3115 }
 0xef8   :  { %v5354_v41 = vpop.eup %5353  ;;  %v3135_v46 = vadd.f32 %v3116_v17, %v6265_v39 }
 0xef9   :  { %3167 = vrot.lane.b32.xlu2 %v5354_v41, %s5514_s1 }
 0xefa   :  { %5355 = vtanh.f32 %v3135_v46 }
 0xf00   :  { %v5356_v51 = vpop.eup %5355 }
 0xf01   :  { %3171 = vrot.lane.b32.xlu2 %v5356_v51, %s5514_s1 }
 0xf53   :  { %v3168_v4 = vpop.permute.xlu2 %3167  ;;  %v3166_v50 = vpop.permute.xlu1 %3165 }
 0xf54   :  { %v3189_v25 = vmul.f32 %v3168_v4, %v3149_v48  ;;  %v3164_v52 = vpop.permute.xlu0 %3163  ;;  %v3188_v34 = vmul.f32 %v3166_v50, %v3148_v56  ;;  %v3210_v50 = vrot.slane %v7097_v59, 7 }
 0xf55   :  { %v3187_v6 = vmul.f32 %v3164_v52, %v3147_v31  ;;  %v3209_v31 = vrot.slane %v7104_v12, 7 }
 0xf56   :  { %v7286_v29 = vadd.f32 %v3221_v27, %v3189_v25  ;;  %v7288_v9 = vadd.f32 %v3220_v18, %v3188_v34  ;;  %v3153_v18 = vsub.f32 1.0, %v7207_v13 }
 0xf57   :  { %v7291_v5 = vadd.f32 %v7153_v49, %v3187_v6  ;;  %v3225_v12 = vmul.f32 %v3209_v31, %v7207_v13 }
 0xf58   :  { %v3237_v1 = vpack.c.bf16 %v7286_v29, %v7286_v29  ;;  %v4503_v47 = vrot.slane %v7286_v29, 2  ;;  %v3236_v19 = vpack.c.bf16 %v7288_v9, %v7288_v9  ;;  %v4501_v35 = vrot.slane %v7288_v9, 3 }
 0xf59   :  { %v3235_v61 = vpack.c.bf16 %v7291_v5, %v7291_v5  ;;  %v4500_v3 = vrot.slane %v7291_v5, 4 }
 0xf5a   :  { %v3253_v57 = vunpack.c.l.b16 %v3237_v1  ;;  %v3252_v49 = vunpack.c.l.b16 %v3236_v19 }
 0xf5b   :  { %v3251_v20 = vunpack.c.l.b16 %v3235_v61  ;;  %v4502_v2 = vsel %vm1078_vm12, %v4501_v35, %v4500_v3  ;;  %v3172_v38 = vpop.permute.xlu2 %3171  ;;  %v3174_v44 = vpop.permute.xlu1 %3173 }
 0xf5c   :  { %v3262_v26 = vrot.slane %v3253_v57, 2  ;;  %v3260_v63 = vrot.slane %v3252_v49, 3  ;;  %v3191_v62 = vmul.f32 %v3172_v38, %v3151_v28  ;;  %v3170_v42 = vpop.permute.xlu0 %3169  ;;  %v4504_v17 = vsel %vm1080_vm13, %v4503_v47, %v4502_v2 }
 0xf5d   :  { %v3259_v41 = vrot.slane %v3251_v20, 4  ;;  %v3190_v46 = vmul.f32 %v3170_v42, %v3150_v21  ;;  %v3192_v51 = vmul.f32 %v3174_v44, %v3152_v43  ;;  %v3226_v47 = vmul.f32 %v3210_v50, %v7259_v58 }
 0xf5e   :  { %v7312_v48 = vadd.f32 %v3223_v54, %v3191_v62 }
 0xf5f   :  { %v3261_v8 = vsel %vm1078_vm12, %v3260_v63, %v3259_v41  ;;  %v7316_v14 = vadd.f32 %v7156_v33, %v3190_v46  ;;  %v7318_v7 = vadd.f32 %v3224_v55, %v3192_v51  ;;  %v3154_v33 = vsub.f32 1.0, %v7259_v58 }
 0xf60   :  { %v3263_v53 = vsel %vm1080_vm13, %v3262_v26, %v3261_v8  ;;  %v3239_v4 = vpack.c.bf16 %v7312_v48, %v7312_v48 }
 0xf61   :  { %v3238_v56 = vpack.c.bf16 %v7316_v14, %v7316_v14  ;;  %v4505_v37 = vrot.slane %v7316_v14, 1  ;;  %v3240_v36 = vpack.c.bf16 %v7318_v7, %v7318_v7  ;;  %v3609_v28 = vrot.slane %v7318_v7, 7 }
 0xf62   :  { %v3255_v3 = vunpack.c.l.b16 %v3239_v4 }
 0xf63   :  { %v3254_v27 = vunpack.c.l.b16 %v3238_v56  ;;  %v4506_v25 = vsel %vm1082_vm14, %v4505_v37, %v4504_v17  ;;  %v3256_v52 = vunpack.c.l.b16 %v3240_v36  ;;  %v3178_v34 = vpop.permute.xlu1 %3177 }
 0xf64   :  { %v4507_v6 = vsel %vm1084_vm15, %v7312_v48, %v4506_v25  ;;  %v3176_v1 = vpop.permute.xlu0 %3175  ;;  %v3194_v19 = vmul.f32 %v3178_v34, %v3154_v33 }
 0xf65   :  { %v3264_v35 = vrot.slane %v3254_v27, 1  ;;  %v3193_v61 = vmul.f32 %v3176_v1, %v3153_v18  ;;  %v3267_v57 = vrot.slane %v3256_v52, 7  ;;  %v4508_v38 = vsel %vm1086_vm2, %v3609_v28, %v4507_v6 }
 0xf66   :  { %v7337_v59 = vadd.f32 %v3226_v47, %v3194_v19 }
 0xf67   :  { %v3265_v16 = vsel %vm1082_vm14, %v3264_v35, %v3263_v53  ;;  %v7340_v49 = vadd.f32 %v3225_v12, %v3193_v61 }
 0xf68   :  { %v3242_v21 = vpack.c.bf16 %v7337_v59, %v7337_v59  ;;  %v4511_v58 = vrot.slane %v7337_v59, 5  ;;  %v3266_v20 = vsel %vm1084_vm15, %v3255_v3, %v3265_v16 }
 0xf69   :  { %v3241_v13 = vpack.c.bf16 %v7340_v49, %v7340_v49  ;;  %v4509_v2 = vrot.slane %v7340_v49, 6  ;;  %v3268_v54 = vsel %vm1086_vm2, %v3267_v57, %v3266_v20 }
 0xf6a   :  { %v3258_v43 = vunpack.c.l.b16 %v3242_v21 }
 0xf6b   :  { %v3257_v44 = vunpack.c.l.b16 %v3241_v13  ;;  %v4510_v26 = vsel %vm1088_vm3, %v4509_v2, %v4508_v38 }
 0xf6c   :  { %v3271_v63 = vrot.slane %v3258_v43, 5  ;;  %v7356_v62 = vsel %vm1090_vm4, %v4511_v58, %v4510_v26 }
 0xf6d   :  { %v3269_v42 = vrot.slane %v3257_v44, 6  ;;  %v5044_v17 = vpack.i.bf16 %v6399_v23, %v7356_v62  ;;  %v4988_v23 = vld [vmem:[%s8123_s12 + $0x20] sm:$0xff] }
 0xf6f   :  { %v3270_v41 = vsel %vm1088_vm3, %v3269_v42, %v3268_v54 }
 0xf70   :  { %v3272_v46 = vsel %vm1090_vm4, %v3271_v63, %v3270_v41  ;;  %v3606_v41 = vrot.slane %v7286_v29, 7 }
 0xf71   :  { %v3273_v55 = vpack.c.b16 %v3272_v46, %v3272_v46 }
 0xf73   :  { %3274 = vrot.lane.b32.xlu2 %v3273_v55, %s5514_s1 }
 0xfcd   :  { %v3275_v51 = vpop.permute.xlu2 %3274 }
 0xfce   :  { %4877 = vmatmul.msk.bf16.vlgmr.msra.gmra.mxu1 %vm8140_vm10, %v3275_v51  ;;  %v3610_v51 = vrot.slane %v7340_v49, 7 }
0x104b   :  { %v3288_v8 = vpop.f32.mrf.mxu1 }
0x104c   :  { %v7365_v53 = vadd.f32 %v7123_v0, %v3288_v8 }
0x104e   :  { %v3295_v56 = vrot.slane %v7365_v53, 5  ;;  %v3294_v37 = vrot.slane %v7365_v53, 4  ;;  %v3293_v36 = vrot.slane %v7365_v53, 3  ;;  %v3298_v4 = vrot.slane %v7365_v53, 1 }
0x104f   :  { %v3297_v25 = vrot.slane %v7365_v53, 7  ;;  %v3296_v52 = vrot.slane %v7365_v53, 6  ;;  %v3299_v47 = vrot.slane %v7365_v53, 2 }
0x1050   :  { %3472 = vrot.lane.b32.xlu2 %v3295_v56, %s5513_s21  ;;  %v3310_v31 = vadd.f32 %v3295_v56, %v6253_v22  ;;  %3470 = vrot.lane.b32.xlu1 %v3294_v37, %s5513_s21  ;;  %v3314_v33 = vadd.f32 %v3298_v4, %v6277_v32  ;;  %v3309_v56 = vadd.f32 %v3294_v37, %v6212_v30 }
0x1051   :  { %3468 = vrot.lane.b32.xlu0 %v3293_v36, %s5513_s21  ;;  %v3312_v29 = vadd.f32 %v3297_v25, %v6265_v39  ;;  %v3315_v49 = vadd.f32 %v3299_v47, %v6290_v45  ;;  %v3313_v37 = vadd.f32 %v7365_v53, %v6271_v15 }
0x1052   :  { %v4880_v0 = vmul.f32 -1.442695, %v3310_v31  ;;  %v4884_v27 = vmul.f32 -1.442695, %v3314_v33  ;;  %v4879_v31 = vmul.f32 -1.442695, %v3309_v56 }
0x1053   :  { %v3290_v50 = vpop.f32.mrf.mxu1 }
0x1054   :  { %5357 = vpow2.f32 %v4880_v0  ;;  %v3311_v0 = vadd.f32 %v3296_v52, %v6259_v24  ;;  %v4882_v50 = vmul.f32 -1.442695, %v3312_v29 }
0x1055   :  { %5359 = vpow2.f32 %v4884_v27 }
0x1056   :  { %v4881_v27 = vmul.f32 -1.442695, %v3311_v0 }
0x1058   :  { %3480 = vrot.lane.b32.xlu2 %v3298_v4, %s5513_s21  ;;  %3476 = vrot.lane.b32.xlu1 %v3297_v25, %s5513_s21  ;;  %v3308_v4 = vadd.f32 %v3293_v36, %v6197_v11  ;;  %v4883_v25 = vmul.f32 -1.442695, %v3313_v37 }
0x1059   :  { %3474 = vrot.lane.b32.xlu0 %v3296_v52, %s5513_s21 }
0x105a   :  { %v5358_v18 = vpop.eup %5357  ;;  %v4878_v33 = vmul.f32 -1.442695, %v3308_v4 }
0x105b   :  { %v3342_v34 = vadd.f32 1.0, %v5358_v18  ;;  %v5360_v6 = vpop.eup %5359 }
0x105c   :  { %v3346_v1 = vadd.f32 1.0, %v5360_v6 }
0x105d   :  { %5361 = vrcp.f32 %v3342_v34  ;;  %v3389_v58 = vand.u32 2147483648, %v3342_v34  ;;  %vm3383_vm6 = vweird.f32 %v3342_v34  ;;  %v3387_v13 = vand.u32 2147483647, %v3342_v34 }
0x105e   :  { %5363 = vrcp.f32 %v3346_v1  ;;  %v3449_v38 = vand.u32 2147483648, %v3346_v1  ;;  %vm3443_vm5 = vweird.f32 %v3346_v1  ;;  %v3447_v44 = vand.u32 2147483647, %v3346_v1 }
0x105f   :  { %v3390_v43 = vor.u32 1.1754944e-38, %v3389_v58  ;;  %vm3388_vm8 = vcmp.eq.f32.partialorder %v3387_v13, 8.507059e+37  ;;  %5365 = vpow2.f32 %v4879_v31 }
0x1060   :  { %3482 = vrot.lane.b32.xlu1 %v3299_v47, %s5513_s21  ;;  %v3450_v42 = vor.u32 1.1754944e-38, %v3449_v38  ;;  %vm3448_vm9 = vcmp.eq.f32.partialorder %v3447_v44, 8.507059e+37  ;;  %5367 = vpow2.f32 %v4878_v33 }
0x1061   :  { %3478 = vrot.lane.b32.xlu0 %v7365_v53, %s5513_s21  ;;  %5369 = vpow2.f32 %v4882_v50 }
0x1062   :  { %5371 = vpow2.f32 %v4881_v27 }
0x1063   :  { %v5362_v19 = vpop.eup %5361 }
0x1064   :  { %v3379_v35 = vmul.f32 %v5362_v19, %v3342_v34  ;;  %v5364_v12 = vpop.eup %5363  ;;  %vm3384_vm0 = vweird.f32 %v5362_v19 }
0x1065   :  { %v3439_v3 = vmul.f32 %v5364_v12, %v3346_v1  ;;  %vm3385_vm7 = vmor %vm3383_vm6, %vm3384_vm0  ;;  %vm3444_vm1 = vweird.f32 %v5364_v12  ;;  %v5366_v18 = vpop.eup %5365  ;;  %v4885_v1 = vmul.f32 -1.442695, %v3315_v49 }
0x1066   :  { %v3380_v61 = vsub.f32 1.0, %v3379_v35  ;;  %vm3445_vm11 = vmor %vm3443_vm5, %vm3444_vm1  ;;  %v5368_v34 = vpop.eup %5367  ;;  %v7402_v6 = vadd.f32 1.0, %v5366_v18 }
0x1067   :  { %v3440_v57 = vsub.f32 1.0, %v3439_v3  ;;  %v7406_v36 = vadd.f32 1.0, %v5368_v34  ;;  %v5370_v52 = vpop.eup %5369 }
0x1068   :  { %v3381_v16 = vmul.f32 %v5362_v19, %v3380_v61  ;;  %5373 = vrcp.f32 %v7402_v6  ;;  %v7410_v35 = vadd.f32 1.0, %v5370_v52  ;;  %v3374_v29 = vand.u32 2147483648, %v7402_v6 }
0x1069   :  { %v3441_v20 = vmul.f32 %v5364_v12, %v3440_v57  ;;  %5375 = vrcp.f32 %v7406_v36  ;;  %vm3368_vm6 = vweird.f32 %v7402_v6  ;;  %v3372_v18 = vand.u32 2147483647, %v7402_v6 }
0x106a   :  { %v3382_v21 = vadd.f32 %v5362_v19, %v3381_v16  ;;  %5377 = vpow2.f32 %v4885_v1  ;;  %v3359_v34 = vand.u32 2147483648, %v7406_v36  ;;  %vm3353_vm1 = vweird.f32 %v7406_v36 }
0x106b   :  { %v3442_v2 = vadd.f32 %v5364_v12, %v3441_v20  ;;  %5379 = vpow2.f32 %v4883_v25  ;;  %v3357_v49 = vand.u32 2147483647, %v7406_v36 }
0x106c   :  { %v3386_v54 = vsel %vm3385_vm7, %v5362_v19, %v3382_v21  ;;  %v5372_v19 = vpop.eup %5371  ;;  %5381 = vrcp.f32 %v7410_v35 }
0x106d   :  { %v7385_v26 = vsel %vm3388_vm8, %v3390_v43, %v3386_v54  ;;  %v3446_v63 = vsel %vm3445_vm11, %v5364_v12, %v3442_v2  ;;  %v7412_v12 = vadd.f32 1.0, %v5372_v19  ;;  %v3375_v19 = vor.u32 1.1754944e-38, %v3374_v29 }
0x106e   :  { %v7388_v46 = vsel %vm3448_vm9, %v3450_v42, %v3446_v63  ;;  %v7391_v55 = vmul.f32 %v3606_v41, %v7385_v26  ;;  %v5374_v53 = vpop.eup %5373  ;;  %vm3373_vm8 = vcmp.eq.f32.partialorder %v3372_v18, 8.507059e+37  ;;  %vm3358_vm11 = vcmp.eq.f32.partialorder %v3357_v49, 8.507059e+37 }
0x106f   :  { %v7395_v8 = vmul.f32 %v3610_v51, %v7388_v46  ;;  %v5376_v3 = vpop.eup %5375  ;;  %5383 = vrcp.f32 %v7412_v12  ;;  %v3364_v57 = vmul.f32 %v5374_v53, %v7402_v6  ;;  %vm3369_vm10 = vweird.f32 %v5374_v53 }
0x1070   :  { %v5378_v16 = vpop.eup %5377  ;;  %v3349_v58 = vmul.f32 %v5376_v3, %v7406_v36  ;;  %vm3354_vm0 = vweird.f32 %v5376_v3  ;;  %vm3370_vm7 = vmor %vm3368_vm6, %vm3369_vm10  ;;  %v3360_v36 = vor.u32 1.1754944e-38, %v3359_v34 }
0x1071   :  { %v5380_v21 = vpop.eup %5379  ;;  %v7420_v20 = vadd.f32 1.0, %v5378_v16  ;;  %v3365_v54 = vsub.f32 1.0, %v3364_v57  ;;  %vm7446_vm5 = vmor %vm3353_vm1, %vm3354_vm0  ;;  %v3419_v57 = vand.u32 2147483648, %v7410_v35  ;;  %vm3413_vm0 = vweird.f32 %v7410_v35 }
0x1072   :  { %v7423_v38 = vadd.f32 1.0, %v5380_v21  ;;  %v7425_v43 = vpop.eup %5381  ;;  %v3350_v44 = vsub.f32 1.0, %v3349_v58 }
0x1073   :  { %5385 = vrcp.f32 %v7420_v20  ;;  %v3366_v42 = vmul.f32 %v5374_v53, %v3365_v54  ;;  %v3409_v41 = vmul.f32 %v7425_v43, %v7410_v35  ;;  %vm3414_vm9 = vweird.f32 %v7425_v43 }
0x1074   :  { %5387 = vrcp.f32 %v7423_v38  ;;  %v3351_v51 = vmul.f32 %v5376_v3, %v3350_v44  ;;  %vm3415_vm6 = vmor %vm3413_vm0, %vm3414_vm9  ;;  %v3420_v29 = vor.u32 1.1754944e-38, %v3419_v57 }
0x1075   :  { %v7427_v63 = vpop.eup %5383  ;;  %v3367_v4 = vadd.f32 %v5374_v53, %v3366_v42  ;;  %v3410_v31 = vsub.f32 1.0, %v3409_v41  ;;  %v3417_v41 = vand.u32 2147483647, %v7410_v35 }
0x1076   :  { %v3394_v56 = vmul.f32 %v7427_v63, %v7412_v12  ;;  %v3352_v0 = vadd.f32 %v5376_v3, %v3351_v51  ;;  %vm3399_vm10 = vweird.f32 %v7427_v63  ;;  %v3404_v51 = vand.u32 2147483648, %v7412_v12 }
0x1077   :  { %v3371_v37 = vsel %vm3370_vm7, %v5374_v53, %v3367_v4  ;;  %v3411_v25 = vmul.f32 %v7425_v43, %v3410_v31  ;;  %vm3398_vm7 = vweird.f32 %v7412_v12 }
0x1078   :  { %v3395_v50 = vsub.f32 1.0, %v3394_v56  ;;  %v3356_v6 = vsel %vm7446_vm5, %v5376_v3, %v3352_v0  ;;  %v7458_v16 = vsel %vm3373_vm8, %v3375_v19, %v3371_v37  ;;  %v3402_v56 = vand.u32 2147483647, %v7412_v12  ;;  %vm3400_vm1 = vmor %vm3398_vm7, %vm3399_vm10 }
0x1079   :  { %v7436_v33 = vpop.eup %5385  ;;  %v3412_v3 = vadd.f32 %v7425_v43, %v3411_v25  ;;  %vm3418_vm5 = vcmp.eq.f32.partialorder %v3417_v41, 8.507059e+37  ;;  %vm3458_vm10 = vweird.f32 %v7420_v20  ;;  %v3434_v19 = vand.u32 2147483648, %v7423_v38 }
0x107a   :  { %v7439_v27 = vpop.eup %5387  ;;  %v3454_v52 = vmul.f32 %v7436_v33, %v7420_v20  ;;  %vm3403_vm8 = vcmp.eq.f32.partialorder %v3402_v56, 8.507059e+37 }
0x107b   :  { %v3416_v4 = vsel %vm3415_vm6, %v7425_v43, %v3412_v3  ;;  %vm3429_vm9 = vweird.f32 %v7439_v27  ;;  %vm3428_vm6 = vweird.f32 %v7423_v38 }
0x107c   :  { %v7482_v18 = vsel %vm3418_vm5, %v3420_v29, %v3416_v4  ;;  %vm3430_vm7 = vmor %vm3428_vm6, %vm3429_vm9 }
0x10aa   :  { %v3473_v47 = vpop.permute.xlu2 %3472 }
0x10ab   :  { %v3494_v61 = vmul.f32 %v3473_v47, %v7385_v26  ;;  %v3396_v47 = vmul.f32 %v7427_v63, %v3395_v50  ;;  %v3405_v50 = vor.u32 1.1754944e-38, %v3404_v51 }
0x10ad   :  { %3512 = vrot.lane.b32.xlu1 %v3494_v61, %s5513_s21  ;;  %v3424_v61 = vmul.f32 %v7439_v27, %v7423_v38  ;;  %v3397_v44 = vadd.f32 %v7427_v63, %v3396_v47 }
0x10af   :  { %v3425_v42 = vsub.f32 1.0, %v3424_v61  ;;  %v3401_v0 = vsel %vm3400_vm1, %v7427_v63, %v3397_v44  ;;  %v3464_v63 = vand.u32 2147483648, %v7420_v20 }
0x10b0   :  { %v7485_v37 = vsel %vm3403_vm8, %v3405_v50, %v3401_v0  ;;  %vm8143_vm8 = vcmask 261120  }
0x10b1   :  { %v3426_v35 = vmul.f32 %v7439_v27, %v3425_v42  ;;  %v3465_v61 = vor.u32 1.1754944e-38, %v3464_v63 }
0x10b2   :  { %v3481_v13 = vpop.permute.xlu2 %3480 }
0x10b3   :  { %v3498_v2 = vmul.f32 %v3481_v13, %v7388_v46  ;;  %v7463_v13 = vsel %vm3358_vm11, %v3360_v36, %v3356_v6  ;;  %vm3459_vm11 = vweird.f32 %v7436_v33  ;;  %v3427_v25 = vadd.f32 %v7439_v27, %v3426_v35 }
0x10b4   :  { %vm3460_vm0 = vmor %vm3458_vm10, %vm3459_vm11  ;;  %v3432_v6 = vand.u32 2147483647, %v7423_v38 }
0x10b5   :  { %3520 = vrot.lane.b32.xlu1 %v3498_v2, %s5513_s21  ;;  %v3455_v2 = vsub.f32 1.0, %v3454_v52  ;;  %v3462_v52 = vand.u32 2147483647, %v7420_v20  ;;  %v3431_v36 = vsel %vm3430_vm7, %v7439_v27, %v3427_v25 }
0x10b6   :  { %vm3433_vm5 = vcmp.eq.f32.partialorder %v3432_v6, 8.507059e+37  ;;  %v3550_v6 = vsub.f32 1.0, %v7385_v26 }
0x10b7   :  { %v3456_v31 = vmul.f32 %v7436_v33, %v3455_v2  ;;  %vm3463_vm1 = vcmp.eq.f32.partialorder %v3462_v52, 8.507059e+37 }
0x10b9   :  { %v3457_v43 = vadd.f32 %v7436_v33, %v3456_v31 }
0x10bb   :  { %v3461_v47 = vsel %vm3460_vm0, %v7436_v33, %v3457_v43 }
0x10bc   :  { %v7502_v57 = vsel %vm3463_vm1, %v3465_v61, %v3461_v47  ;;  %v3549_v47 = vsub.f32 1.0, %v7458_v16  ;;  %v3605_v61 = vrot.slane %v7288_v9, 7 }
0x10c2   :  { %v3471_v53 = vpop.permute.xlu1 %3470 }
0x10c3   :  { %v3493_v21 = vmul.f32 %v3471_v53, %v7458_v16  ;;  %v3469_v58 = vpop.permute.xlu0 %3468  ;;  %v3435_v53 = vor.u32 1.1754944e-38, %v3434_v19 }
0x10c4   :  { %v3492_v54 = vmul.f32 %v3469_v58, %v7463_v13 }
0x10c5   :  { %3510 = vrot.lane.b32.xlu0 %v3493_v21, %s5513_s21  ;;  %v7505_v58 = vsel %vm3433_vm5, %v3435_v53, %v3431_v36  ;;  %v3548_v53 = vsub.f32 1.0, %v7463_v13 }
0x10c6   :  { %3508 = vrot.lane.b32.xlu2 %v3492_v54, %s5513_s21 }
0x10ca   :  { %v3477_v34 = vpop.permute.xlu1 %3476 }
0x10cb   :  { %v3496_v49 = vmul.f32 %v3477_v34, %v7482_v18  ;;  %v3475_v12 = vpop.permute.xlu0 %3474 }
0x10cc   :  { %v3495_v1 = vmul.f32 %v3475_v12, %v7485_v37 }
0x10cd   :  { %3516 = vrot.lane.b32.xlu0 %v3496_v49, %s5513_s21 }
0x10ce   :  { %3514 = vrot.lane.b32.xlu2 %v3495_v1, %s5513_s21 }
0x10d2   :  { %v3483_v20 = vpop.permute.xlu1 %3482 }
0x10d3   :  { %v3499_v21 = vmul.f32 %v3483_v20, %v7502_v57  ;;  %v3479_v3 = vpop.permute.xlu0 %3478  ;;  %v3604_v20 = vrot.slane %v7291_v5, 7 }
0x10d4   :  { %v3497_v2 = vmul.f32 %v3479_v3, %v7505_v58 }
0x10d5   :  { %3522 = vrot.lane.b32.xlu0 %v3499_v21, %s5513_s21 }
0x10d6   :  { %3518 = vrot.lane.b32.xlu2 %v3497_v2, %s5513_s21 }
0x111f   :  { %v3513_v38 = vpop.permute.xlu1 %3512 }
0x1120   :  { %v3534_v33 = vadd.f32 %v3513_v38, %v6253_v22  ;;  %v3509_v27 = vpop.permute.xlu2 %3508  ;;  %v3621_v38 = vmul.f32 %v3605_v61, %v7458_v16  ;;  %v3608_v16 = vrot.slane %v7312_v48, 7  ;;  %v3551_v48 = vsub.f32 1.0, %v7485_v37 }
0x1121   :  { %v3532_v54 = vadd.f32 %v3509_v27, %v6197_v11  ;;  %v3620_v27 = vmul.f32 %v3604_v20, %v7463_v13 }
0x1122   :  { %5389 = vtanh.f32 %v3534_v33 }
0x1123   :  { %5391 = vtanh.f32 %v3532_v54 }
0x1127   :  { %v3521_v44 = vpop.permute.xlu1 %3520 }
0x1128   :  { %v5390_v42 = vpop.eup %5389  ;;  %v3538_v41 = vadd.f32 %v3521_v44, %v6277_v32  ;;  %v3515_v51 = vpop.permute.xlu2 %3514 }
0x1129   :  { %v5392_v56 = vpop.eup %5391  ;;  %v3535_v4 = vadd.f32 %v3515_v51, %v6259_v24  ;;  %3568 = vrot.lane.b32.xlu0 %v5390_v42, %s5514_s1 }
0x112a   :  { %5393 = vtanh.f32 %v3538_v41  ;;  %3564 = vrot.lane.b32.xlu1 %v5392_v56, %s5514_s1  ;;  %v3607_v56 = vrot.slane %v7316_v14, 7 }
0x112b   :  { %5395 = vtanh.f32 %v3535_v4 }
0x1130   :  { %v5394_v31 = vpop.eup %5393  ;;  %v3519_v29 = vpop.permute.xlu2 %3518 }
0x1131   :  { %v5396_v0 = vpop.eup %5395  ;;  %v3537_v35 = vadd.f32 %v3519_v29, %v6271_v15  ;;  %3576 = vrot.lane.b32.xlu0 %v5394_v31, %s5514_s1  ;;  %v3554_v29 = vsub.f32 1.0, %v7388_v46 }
0x1132   :  { %3570 = vrot.lane.b32.xlu1 %v5396_v0, %s5514_s1  ;;  %v3552_v0 = vsub.f32 1.0, %v7482_v18 }
0x1133   :  { %5397 = vtanh.f32 %v3537_v35 }
0x1137   :  { %v3511_v50 = vpop.permute.xlu0 %3510 }
0x1138   :  { %v3533_v34 = vadd.f32 %v3511_v50, %v6212_v30 }
0x1139   :  { %v5398_v49 = vpop.eup %5397 }
0x113a   :  { %5399 = vtanh.f32 %v3533_v34  ;;  %3574 = vrot.lane.b32.xlu1 %v5398_v49, %s5514_s1  ;;  %v3624_v49 = vmul.f32 %v3608_v16, %v7482_v18 }
0x113f   :  { %v3517_v12 = vpop.permute.xlu0 %3516 }
0x1140   :  { %v5400_v43 = vpop.eup %5399  ;;  %v3536_v1 = vadd.f32 %v3517_v12, %v6265_v39 }
0x1141   :  { %3566 = vrot.lane.b32.xlu2 %v5400_v43, %s5514_s1 }
0x1142   :  { %5401 = vtanh.f32 %v3536_v1 }
0x1147   :  { %v3523_v63 = vpop.permute.xlu0 %3522 }
0x1148   :  { %v5402_v25 = vpop.eup %5401  ;;  %v3539_v52 = vadd.f32 %v3523_v63, %v6290_v45 }
0x1149   :  { %3572 = vrot.lane.b32.xlu2 %v5402_v25, %s5514_s1 }
0x114a   :  { %5403 = vtanh.f32 %v3539_v52 }
0x1150   :  { %v5404_v19 = vpop.eup %5403 }
0x1151   :  { %3578 = vrot.lane.b32.xlu2 %v5404_v19, %s5514_s1  ;;  %v3623_v19 = vmul.f32 %v3607_v56, %v7485_v37  ;;  %v3625_v56 = vmul.f32 %v3609_v28, %v7505_v58 }
0x119b   :  { %v3569_v36 = vpop.permute.xlu0 %3568  ;;  %v3567_v21 = vpop.permute.xlu2 %3566 }
0x119c   :  { %v3590_v3 = vmul.f32 %v3569_v36, %v3550_v6  ;;  %v3565_v2 = vpop.permute.xlu1 %3564  ;;  %v3589_v33 = vmul.f32 %v3567_v21, %v3549_v47 }
0x119d   :  { %v3588_v54 = vmul.f32 %v3565_v2, %v3548_v53 }
0x119e   :  { %v7534_v26 = vadd.f32 %v7391_v55, %v3590_v3  ;;  %v7536_v44 = vadd.f32 %v3621_v38, %v3589_v33  ;;  %v3555_v38 = vsub.f32 1.0, %v7502_v57 }
0x119f   :  { %v7538_v9 = vadd.f32 %v3620_v27, %v3588_v54  ;;  %v3553_v27 = vsub.f32 1.0, %v7505_v58 }
0x11a0   :  { %v3638_v42 = vpack.c.bf16 %v7534_v26, %v7534_v26  ;;  %v3637_v5 = vpack.c.bf16 %v7536_v44, %v7536_v44  ;;  %v4517_v41 = vrot.slane %v7536_v44, 4  ;;  %v4519_v13 = vrot.slane %v7534_v26, 3 }
0x11a1   :  { %v3636_v55 = vpack.c.bf16 %v7538_v9, %v7538_v9  ;;  %v4516_v51 = vrot.slane %v7538_v9, 5 }
0x11a2   :  { %v3654_v4 = vunpack.c.l.b16 %v3638_v42  ;;  %v3653_v31 = vunpack.c.l.b16 %v3637_v5 }
0x11a3   :  { %v3652_v35 = vunpack.c.l.b16 %v3636_v55  ;;  %v4518_v50 = vsel %vm1078_vm12, %v4517_v41, %v4516_v51  ;;  %v3577_v34 = vpop.permute.xlu0 %3576  ;;  %v3573_v12 = vpop.permute.xlu2 %3572 }
0x11a4   :  { %v3663_v43 = vrot.slane %v3654_v4, 3  ;;  %v3661_v1 = vrot.slane %v3653_v31, 4  ;;  %v3594_v63 = vmul.f32 %v3577_v34, %v3554_v29  ;;  %v3571_v25 = vpop.permute.xlu1 %3570  ;;  %v3592_v14 = vmul.f32 %v3573_v12, %v3552_v0 }
0x11a5   :  { %v3660_v52 = vrot.slane %v3652_v35, 5  ;;  %v3591_v46 = vmul.f32 %v3571_v25, %v3551_v48  ;;  %v4520_v6 = vsel %vm1080_vm13, %v4519_v13, %v4518_v50 }
0x11a6   :  { %v7559_v47 = vadd.f32 %v7395_v8, %v3594_v63  ;;  %v7561_v61 = vadd.f32 %v3624_v49, %v3592_v14  ;;  %v3611_v8 = vrot.slane %v7337_v59, 7 }
0x11a7   :  { %v3662_v36 = vsel %vm1078_vm12, %v3661_v1, %v3660_v52  ;;  %v7564_v18 = vadd.f32 %v3623_v19, %v3591_v46 }
0x11a8   :  { %v3664_v53 = vsel %vm1080_vm13, %v3663_v43, %v3662_v36  ;;  %v3640_v20 = vpack.c.bf16 %v7561_v61, %v7561_v61  ;;  %v4523_v3 = vrot.slane %v7561_v61, 1  ;;  %v3627_v42 = vmul.f32 %v3611_v8, %v7502_v57  ;;  %v7612_v36 = vld [vmem:[%s8120_s11] ss:$0 sm:$0xff] }
0x11a9   :  { %v3639_v37 = vpack.c.bf16 %v7564_v18, %v7564_v18  ;;  %v4521_v21 = vrot.slane %v7564_v18, 2  ;;  %v3642_v41 = vpack.c.bf16 %v7559_v47, %v7559_v47  ;;  %v4011_v29 = vrot.slane %v7559_v47, 7 }
0x11aa   :  { %v3656_v2 = vunpack.c.l.b16 %v3640_v20 }
0x11ab   :  { %v3655_v33 = vunpack.c.l.b16 %v3639_v37  ;;  %v4522_v54 = vsel %vm1082_vm14, %v4521_v21, %v4520_v6  ;;  %v3579_v5 = vpop.permute.xlu2 %3578  ;;  %v3658_v35 = vunpack.c.l.b16 %v3642_v41 }
0x11ac   :  { %v3667_v16 = vrot.slane %v3656_v2, 1  ;;  %v3575_v13 = vpop.permute.xlu1 %3574  ;;  %v4524_v55 = vsel %vm1084_vm15, %v4523_v3, %v4522_v54  ;;  %v3595_v51 = vmul.f32 %v3579_v5, %v3555_v38 }
0x11ad   :  { %v3665_v59 = vrot.slane %v3655_v33, 2  ;;  %v3593_v4 = vmul.f32 %v3575_v13, %v3553_v27  ;;  %v3670_v1 = vrot.slane %v3658_v35, 7 }
0x11ae   :  { %v7584_v31 = vadd.f32 %v3627_v42, %v3595_v51 }
0x11af   :  { %v3666_v57 = vsel %vm1082_vm14, %v3665_v59, %v3664_v53  ;;  %v7588_v0 = vadd.f32 %v3625_v56, %v3593_v4 }
0x11b0   :  { %v3668_v50 = vsel %vm1084_vm15, %v3667_v16, %v3666_v57  ;;  %v3643_v34 = vpack.c.bf16 %v7584_v31, %v7584_v31  ;;  %v4527_v48 = vrot.slane %v7584_v31, 6 }
0x11b1   :  { %v3641_v7 = vpack.c.bf16 %v7588_v0, %v7588_v0  ;;  %v4525_v28 = vsel %vm1086_vm2, %v7588_v0, %v4524_v55 }
0x11b2   :  { %v3659_v58 = vunpack.c.l.b16 %v3643_v34  ;;  %v4526_v49 = vsel %vm1088_vm3, %v4011_v29, %v4525_v28 }
0x11b3   :  { %v3657_v12 = vunpack.c.l.b16 %v3641_v7  ;;  %v7602_v43 = vsel %vm1090_vm4, %v4527_v48, %v4526_v49 }
0x11b4   :  { %v3672_v63 = vrot.slane %v3659_v58, 6 }
0x11b5   :  { %v3669_v25 = vsel %vm1086_vm2, %v3657_v12, %v3668_v50 }
0x11b6   :  { %v3671_v14 = vsel %vm1088_vm3, %v3670_v1, %v3669_v25 }
0x11b7   :  { %v3673_v52 = vsel %vm1090_vm4, %v3672_v63, %v3671_v14 }
0x11b8   :  { %v3674_v19 = vpack.c.b16 %v3673_v52, %v3673_v52 }
0x11ba   :  { %3675 = vrot.lane.b32.xlu0 %v3674_v19, %s5514_s1  ;;  %v4006_v19 = vrot.slane %v7536_v44, 7 }
0x122c   :  { %v3676_v46 = vpop.permute.xlu0 %3675 }
0x122d   :  { %4886 = vmatmul.msk.bf16.vlgmr.msrb.gmra.mxu3 %vm8143_vm8, %v3676_v46 }
0x12b0   :  { %v3689_v6 = vpop.f32.mrf.mxu3 }
0x12b1   :  { %v7615_v53 = vadd.f32 %v7612_v36, %v3689_v6 }
0x12b3   :  { %v3696_v20 = vrot.slane %v7615_v53, 4  ;;  %v3695_v37 = vrot.slane %v7615_v53, 3  ;;  %v3694_v21 = vrot.slane %v7615_v53, 2  ;;  %v3698_v3 = vrot.slane %v7615_v53, 6 }
0x12b4   :  { %v3699_v54 = vrot.slane %v7615_v53, 7  ;;  %v3697_v42 = vrot.slane %v7615_v53, 5  ;;  %v3700_v55 = vrot.slane %v7615_v53, 1 }
0x12b5   :  { %3873 = vrot.lane.b32.xlu0 %v3696_v20, %s5513_s21  ;;  %3871 = vrot.lane.b32.xlu2 %v3695_v37, %s5513_s21  ;;  %v3710_v8 = vadd.f32 %v3695_v37, %v6212_v30  ;;  %v3713_v2 = vadd.f32 %v3698_v3, %v6265_v39  ;;  %v4009_v37 = vrot.slane %v7561_v61, 7 }
0x12b6   :  { %3869 = vrot.lane.b32.xlu1 %v3694_v21, %s5513_s21  ;;  %v3712_v61 = vadd.f32 %v3697_v42, %v6259_v24 }
0x12b7   :  { %v4888_v38 = vmul.f32 -1.442695, %v3710_v8  ;;  %v4891_v27 = vmul.f32 -1.442695, %v3713_v2  ;;  %v3715_v8 = vadd.f32 %v7615_v53, %v6277_v32 }
0x12b8   :  { %v3691_v33 = vpop.f32.mrf.mxu3 }
0x12b9   :  { %5405 = vpow2.f32 %v4888_v38  ;;  %v4893_v2 = vmul.f32 -1.442695, %v3715_v8  ;;  %v3711_v38 = vadd.f32 %v3696_v20, %v6253_v22  ;;  %v3709_v33 = vadd.f32 %v3694_v21, %v6197_v11 }
0x12ba   :  { %5407 = vpow2.f32 %v4891_v27  ;;  %v3716_v20 = vadd.f32 %v3700_v55, %v6290_v45 }
0x12bb   :  { %v4889_v44 = vmul.f32 -1.442695, %v3711_v38  ;;  %v4887_v27 = vmul.f32 -1.442695, %v3709_v33 }
0x12bd   :  { %3879 = vrot.lane.b32.xlu0 %v3699_v54, %s5513_s21  ;;  %3877 = vrot.lane.b32.xlu2 %v3698_v3, %s5513_s21 }
0x12be   :  { %3875 = vrot.lane.b32.xlu1 %v3697_v42, %s5513_s21 }
0x12bf   :  { %v5406_v5 = vpop.eup %5405 }
0x12c0   :  { %v3742_v41 = vadd.f32 1.0, %v5406_v5  ;;  %v5408_v16 = vpop.eup %5407 }
0x12c1   :  { %v3745_v13 = vadd.f32 1.0, %v5408_v16 }
0x12c2   :  { %5409 = vrcp.f32 %v3742_v41  ;;  %v3775_v7 = vand.u32 2147483648, %v3742_v41  ;;  %vm3769_vm9 = vweird.f32 %v3742_v41  ;;  %v3773_v28 = vand.u32 2147483647, %v3742_v41 }
0x12c3   :  { %5411 = vrcp.f32 %v3745_v13  ;;  %v3820_v49 = vand.u32 2147483648, %v3745_v13  ;;  %vm3814_vm6 = vweird.f32 %v3745_v13  ;;  %v3818_v1 = vand.u32 2147483647, %v3745_v13 }
0x12c4   :  { %v3776_v63 = vor.u32 1.1754944e-38, %v3775_v7  ;;  %vm3774_vm1 = vcmp.eq.f32.partialorder %v3773_v28, 8.507059e+37  ;;  %5413 = vpow2.f32 %v4893_v2 }
0x12c5   :  { %3881 = vrot.lane.b32.xlu2 %v7615_v53, %s5513_s21  ;;  %v3821_v52 = vor.u32 1.1754944e-38, %v3820_v49  ;;  %vm3819_vm5 = vcmp.eq.f32.partialorder %v3818_v1, 8.507059e+37  ;;  %5415 = vpow2.f32 %v4889_v44 }
0x12c6   :  { %3883 = vrot.lane.b32.xlu1 %v3700_v55, %s5513_s21  ;;  %5417 = vpow2.f32 %v4887_v27 }
0x12c8   :  { %v5410_v51 = vpop.eup %5409 }
0x12c9   :  { %v3765_v59 = vmul.f32 %v5410_v51, %v3742_v41  ;;  %v5412_v56 = vpop.eup %5411  ;;  %vm3770_vm11 = vweird.f32 %v5410_v51  ;;  %v3714_v41 = vadd.f32 %v3699_v54, %v6271_v15 }
0x12ca   :  { %v3810_v57 = vmul.f32 %v5412_v56, %v3745_v13  ;;  %vm3815_vm10 = vweird.f32 %v5412_v56  ;;  %vm3771_vm0 = vmor %vm3769_vm9, %vm3770_vm11  ;;  %v5414_v5 = vpop.eup %5413 }
0x12cb   :  { %v3766_v4 = vsub.f32 1.0, %v3765_v59  ;;  %vm3816_vm7 = vmor %vm3814_vm6, %vm3815_vm10  ;;  %v3747_v16 = vadd.f32 1.0, %v5414_v5  ;;  %v4892_v13 = vmul.f32 -1.442695, %v3714_v41  ;;  %v5416_v53 = vpop.eup %5415 }
0x12cc   :  { %v3811_v50 = vsub.f32 1.0, %v3810_v57  ;;  %v5418_v59 = vpop.eup %5417  ;;  %v4894_v57 = vmul.f32 -1.442695, %v3716_v20 }
0x12cd   :  { %v3767_v35 = vmul.f32 %v5410_v51, %v3766_v4  ;;  %5419 = vrcp.f32 %v3747_v16  ;;  %v7656_v21 = vadd.f32 1.0, %v5418_v59  ;;  %v3850_v38 = vand.u32 2147483648, %v3747_v16 }
0x12ce   :  { %v3812_v34 = vmul.f32 %v5412_v56, %v3811_v50  ;;  %5421 = vpow2.f32 %v4892_v13  ;;  %vm3844_vm11 = vweird.f32 %v3747_v16  ;;  %v3848_v27 = vand.u32 2147483647, %v3747_v16 }
0x12cf   :  { %v3768_v48 = vadd.f32 %v5410_v51, %v3767_v35  ;;  %v3851_v13 = vor.u32 1.1754944e-38, %v3850_v38 }
0x12d0   :  { %v3813_v58 = vadd.f32 %v5412_v56, %v3812_v34  ;;  %vm3849_vm10 = vcmp.eq.f32.partialorder %v3848_v27, 8.507059e+37 }
0x12d1   :  { %v3772_v12 = vsel %vm3771_vm0, %v5410_v51, %v3768_v48  ;;  %v4890_v51 = vmul.f32 -1.442695, %v3712_v61 }
0x12d2   :  { %v3817_v25 = vsel %vm3816_vm7, %v5412_v56, %v3813_v58  ;;  %v7635_v14 = vsel %vm3774_vm1, %v3776_v63, %v3772_v12  ;;  %v7654_v56 = vadd.f32 1.0, %v5416_v53 }
0x12d3   :  { %v7638_v46 = vsel %vm3819_vm5, %v3821_v52, %v3817_v25  ;;  %v7641_v6 = vmul.f32 %v4006_v19, %v7635_v14  ;;  %5423 = vpow2.f32 %v4890_v51  ;;  %v5420_v4 = vpop.eup %5419  ;;  %vm3754_vm5 = vweird.f32 %v7656_v21 }
0x12d4   :  { %v7645_v3 = vmul.f32 %v4009_v37, %v7638_v46  ;;  %5425 = vrcp.f32 %v7654_v56  ;;  %v5422_v54 = vpop.eup %5421  ;;  %v3840_v42 = vmul.f32 %v5420_v4, %v3747_v16  ;;  %vm3845_vm8 = vweird.f32 %v5420_v4 }
0x12d5   :  { %5427 = vrcp.f32 %v7656_v21  ;;  %v7660_v50 = vadd.f32 1.0, %v5422_v54  ;;  %vm3846_vm9 = vmor %vm3844_vm11, %vm3845_vm8  ;;  %vm3784_vm7 = vweird.f32 %v7654_v56 }
0x12d6   :  { %5429 = vpow2.f32 %v4894_v57  ;;  %v3841_v7 = vsub.f32 1.0, %v3840_v42 }
0x12d7   :  { %5431 = vrcp.f32 %v7660_v50  ;;  %v3835_v27 = vand.u32 2147483648, %v7660_v50 }
0x12d8   :  { %v3842_v12 = vmul.f32 %v5420_v4, %v3841_v7  ;;  %v3760_v7 = vand.u32 2147483648, %v7656_v21 }
0x12d9   :  { %v5424_v35 = vpop.eup %5423 }
0x12da   :  { %v7662_v48 = vadd.f32 1.0, %v5424_v35  ;;  %v5426_v28 = vpop.eup %5425  ;;  %v3843_v37 = vadd.f32 %v5420_v4, %v3842_v12 }
0x12db   :  { %v7665_v58 = vpop.eup %5427  ;;  %v3780_v1 = vmul.f32 %v5426_v28, %v7654_v56  ;;  %vm3785_vm0 = vweird.f32 %v5426_v28 }
0x12dc   :  { %v5430_v49 = vpop.eup %5429  ;;  %5433 = vrcp.f32 %v7662_v48  ;;  %v3750_v63 = vmul.f32 %v7665_v58, %v7656_v21  ;;  %v3847_v5 = vsel %vm3846_vm9, %v5420_v4, %v3843_v37  ;;  %v3790_v4 = vand.u32 2147483648, %v7654_v56  ;;  %vm3786_vm1 = vmor %vm3784_vm7, %vm3785_vm0 }
0x12dd   :  { %v7673_v25 = vadd.f32 1.0, %v5430_v49  ;;  %v3781_v8 = vsub.f32 1.0, %v3780_v1  ;;  %v7676_v2 = vpop.eup %5431  ;;  %v7687_v59 = vsel %vm3849_vm10, %v3851_v13, %v3847_v5  ;;  %vm3755_vm6 = vweird.f32 %v7665_v58 }
0x12de   :  { %v3751_v33 = vsub.f32 1.0, %v3750_v63  ;;  %v3825_v61 = vmul.f32 %v7676_v2, %v7660_v50  ;;  %v3758_v49 = vand.u32 2147483647, %v7656_v21  ;;  %vm3756_vm8 = vmor %vm3754_vm5, %vm3755_vm6  ;;  %v3791_v63 = vor.u32 1.1754944e-38, %v3790_v4 }
0x12df   :  { %5435 = vrcp.f32 %v7673_v25  ;;  %v3782_v41 = vmul.f32 %v5426_v28, %v3781_v8  ;;  %vm3830_vm10 = vweird.f32 %v7676_v2  ;;  %vm3829_vm6 = vweird.f32 %v7660_v50 }
0x12e0   :  { %v3752_v51 = vmul.f32 %v7665_v58, %v3751_v33  ;;  %v3826_v54 = vsub.f32 1.0, %v3825_v61  ;;  %vm3759_vm9 = vcmp.eq.f32.partialorder %v3758_v49, 8.507059e+37  ;;  %v3833_v13 = vand.u32 2147483647, %v7660_v50  ;;  %vm3831_vm7 = vmor %vm3829_vm6, %vm3830_vm10 }
0x12e1   :  { %v3783_v57 = vadd.f32 %v5426_v28, %v3782_v41  ;;  %vm3859_vm10 = vweird.f32 %v7673_v25  ;;  %v3863_v49 = vand.u32 2147483647, %v7673_v25 }
0x12e2   :  { %v7678_v44 = vpop.eup %5433  ;;  %v3753_v42 = vadd.f32 %v7665_v58, %v3752_v51  ;;  %v3827_v1 = vmul.f32 %v7676_v2, %v3826_v54  ;;  %v3805_v51 = vand.u32 2147483648, %v7662_v48 }
0x12e3   :  { %v3795_v53 = vmul.f32 %v7678_v44, %v7662_v48  ;;  %v3787_v12 = vsel %vm3786_vm1, %v5426_v28, %v3783_v57  ;;  %vm3800_vm0 = vweird.f32 %v7678_v44  ;;  %vm3799_vm1 = vweird.f32 %v7662_v48 }
0x12e4   :  { %vm3801_vm5 = vmor %vm3799_vm1, %vm3800_vm0  ;;  %v3806_v50 = vor.u32 1.1754944e-38, %v3805_v51  ;;  %vm3864_vm6 = vcmp.eq.f32.partialorder %v3863_v49, 8.507059e+37 }
0x12e5   :  { %v3796_v35 = vsub.f32 1.0, %v3795_v53  ;;  %v3803_v53 = vand.u32 2147483647, %v7662_v48 }
0x130f   :  { %v3872_v34 = vpop.permute.xlu2 %3871 }
0x1310   :  { %v3894_v55 = vmul.f32 %v3872_v34, %v7635_v14  ;;  %v7693_v34 = vpop.eup %5435 }
0x1311   :  { %v3855_v37 = vmul.f32 %v7693_v34, %v7673_v25 }
0x1312   :  { %3911 = vrot.lane.b32.xlu1 %v3894_v55, %s5513_s21  ;;  %v3788_v55 = vand.u32 2147483647, %v7654_v56  ;;  %v3761_v56 = vor.u32 1.1754944e-38, %v3760_v7 }
0x1313   :  { %v3856_v61 = vsub.f32 1.0, %v3855_v37 }
0x1314   :  { %vm3789_vm11 = vcmp.eq.f32.partialorder %v3788_v55, 8.507059e+37 }
0x1315   :  { %v7706_v38 = vsel %vm3789_vm11, %v3791_v63, %v3787_v12  ;;  %v3857_v54 = vmul.f32 %v7693_v34, %v3856_v61  ;;  %vm3804_vm11 = vcmp.eq.f32.partialorder %v3803_v53, 8.507059e+37 }
0x1317   :  { %v3878_v52 = vpop.permute.xlu2 %3877 }
0x1318   :  { %v3897_v19 = vmul.f32 %v3878_v52, %v7638_v46  ;;  %v3757_v52 = vsel %vm3756_vm8, %v7665_v58, %v3753_v42  ;;  %v3828_v58 = vadd.f32 %v7676_v2, %v3827_v1  ;;  %vm3834_vm8 = vcmp.eq.f32.partialorder %v3833_v13, 8.507059e+37 }
0x1319   :  { %v7710_v33 = vsel %vm3759_vm9, %v3761_v56, %v3757_v52  ;;  %vm3860_vm9 = vweird.f32 %v7693_v34 }
0x131a   :  { %3917 = vrot.lane.b32.xlu1 %v3897_v19, %s5513_s21  ;;  %v3797_v19 = vmul.f32 %v7678_v44, %v3796_v35  ;;  %vm3861_vm0 = vmor %vm3859_vm10, %vm3860_vm9 }
0x131c   :  { %v3798_v41 = vadd.f32 %v7678_v44, %v3797_v19 }
0x131e   :  { %v3802_v57 = vsel %vm3801_vm5, %v7678_v44, %v3798_v41  ;;  %v3865_v44 = vand.u32 2147483648, %v7673_v25 }
0x131f   :  { %v3882_v20 = vpop.permute.xlu2 %3881  ;;  %v7732_v55 = vsel %vm3804_vm11, %v3806_v50, %v3802_v57 }
0x1320   :  { %v3899_v16 = vmul.f32 %v3882_v20, %v7687_v59  ;;  %v3832_v20 = vsel %vm3831_vm7, %v7676_v2, %v3828_v58  ;;  %v3858_v2 = vadd.f32 %v7693_v34, %v3857_v54  ;;  %v3866_v1 = vor.u32 1.1754944e-38, %v3865_v44 }
0x1321   :  { %v4007_v44 = vrot.slane %v7534_v26, 7  ;;  %vm8144_vm7 = vcmask 261120  }
0x1322   :  { %3921 = vrot.lane.b32.xlu1 %v3899_v16, %s5513_s21  ;;  %v3836_v16 = vor.u32 1.1754944e-38, %v3835_v27  ;;  %v3862_v12 = vsel %vm3861_vm0, %v7693_v34, %v3858_v2  ;;  %v3951_v2 = vsub.f32 1.0, %v7706_v38 }
0x1323   :  { %v7743_v63 = vsel %vm3864_vm6, %v3866_v1, %v3862_v12  ;;  %v3949_v12 = vsub.f32 1.0, %v7710_v33  ;;  %v4005_v1 = vrot.slane %v7538_v9, 7 }
0x1324   :  { %v7729_v4 = vsel %vm3834_vm8, %v3836_v16, %v3832_v20 }
0x1327   :  { %v3874_v8 = vpop.permute.xlu0 %3873 }
0x1328   :  { %v3895_v21 = vmul.f32 %v3874_v8, %v7706_v38  ;;  %v3870_v28 = vpop.permute.xlu1 %3869 }
0x1329   :  { %v3893_v5 = vmul.f32 %v3870_v28, %v7710_v33 }
0x132a   :  { %3913 = vrot.lane.b32.xlu2 %v3895_v21, %s5513_s21 }
0x132b   :  { %3909 = vrot.lane.b32.xlu0 %v3893_v5, %s5513_s21 }
0x132f   :  { %v3880_v42 = vpop.permute.xlu0 %3879 }
0x1330   :  { %v3898_v35 = vmul.f32 %v3880_v42, %v7729_v4  ;;  %v3876_v7 = vpop.permute.xlu1 %3875 }
0x1331   :  { %v3896_v48 = vmul.f32 %v3876_v7, %v7732_v55 }
0x1332   :  { %3919 = vrot.lane.b32.xlu2 %v3898_v35, %s5513_s21 }
0x1333   :  { %3915 = vrot.lane.b32.xlu0 %v3896_v48, %s5513_s21 }
0x1338   :  { %v3884_v52 = vpop.permute.xlu1 %3883 }
0x1339   :  { %v3900_v19 = vmul.f32 %v3884_v52, %v7743_v63  ;;  %v3950_v52 = vsub.f32 1.0, %v7635_v14 }
0x133b   :  { %3923 = vrot.lane.b32.xlu0 %v3900_v19, %s5513_s21  ;;  %v4023_v19 = vmul.f32 %v4007_v44, %v7706_v38  ;;  %v4010_v38 = vrot.slane %v7588_v0, 7 }
0x1384   :  { %v3914_v37 = vpop.permute.xlu2 %3913  ;;  %v3912_v56 = vpop.permute.xlu1 %3911 }
0x1385   :  { %v3935_v8 = vadd.f32 %v3914_v37, %v6253_v22  ;;  %v3934_v21 = vadd.f32 %v3912_v56, %v6212_v30 }
0x1387   :  { %5437 = vtanh.f32 %v3935_v8 }
0x1388   :  { %5439 = vtanh.f32 %v3934_v21  ;;  %v4021_v21 = vmul.f32 %v4005_v1, %v7710_v33 }
0x138c   :  { %v3920_v25 = vpop.permute.xlu2 %3919  ;;  %v3918_v28 = vpop.permute.xlu1 %3917 }
0x138d   :  { %v5438_v34 = vpop.eup %5437  ;;  %v3938_v58 = vadd.f32 %v3920_v25, %v6271_v15  ;;  %v3937_v27 = vadd.f32 %v3918_v28, %v6265_v39 }
0x138e   :  { %v5440_v5 = vpop.eup %5439  ;;  %3969 = vrot.lane.b32.xlu1 %v5438_v34, %s5514_s1 }
0x138f   :  { %5441 = vtanh.f32 %v3938_v58  ;;  %3967 = vrot.lane.b32.xlu0 %v5440_v5, %s5514_s1 }
0x1390   :  { %5443 = vtanh.f32 %v3937_v27  ;;  %v4008_v27 = vrot.slane %v7564_v18, 7 }
0x1394   :  { %v3922_v41 = vpop.permute.xlu1 %3921 }
0x1395   :  { %v5442_v61 = vpop.eup %5441  ;;  %v3939_v13 = vadd.f32 %v3922_v41, %v6277_v32 }
0x1396   :  { %v5444_v51 = vpop.eup %5443  ;;  %3975 = vrot.lane.b32.xlu1 %v5442_v61, %s5514_s1 }
0x1397   :  { %5445 = vtanh.f32 %v3939_v13  ;;  %3973 = vrot.lane.b32.xlu0 %v5444_v51, %s5514_s1  ;;  %v3954_v13 = vsub.f32 1.0, %v7729_v4  ;;  %v4026_v51 = vmul.f32 %v4010_v38, %v7729_v4 }
0x139d   :  { %v5446_v53 = vpop.eup %5445  ;;  %v3910_v20 = vpop.permute.xlu0 %3909 }
0x139e   :  { %v3933_v16 = vadd.f32 %v3910_v20, %v6197_v11 }
0x139f   :  { %3977 = vrot.lane.b32.xlu0 %v5446_v53, %s5514_s1  ;;  %v3952_v53 = vsub.f32 1.0, %v7732_v55 }
0x13a0   :  { %5447 = vtanh.f32 %v3933_v16 }
0x13a5   :  { %v3916_v57 = vpop.permute.xlu0 %3915 }
0x13a6   :  { %v5448_v54 = vpop.eup %5447  ;;  %v3936_v50 = vadd.f32 %v3916_v57, %v6259_v24  ;;  %v3953_v57 = vsub.f32 1.0, %v7638_v46 }
0x13a7   :  { %3965 = vrot.lane.b32.xlu2 %v5448_v54, %s5514_s1 }
0x13a8   :  { %5449 = vtanh.f32 %v3936_v50 }
0x13ad   :  { %v3924_v42 = vpop.permute.xlu0 %3923 }
0x13ae   :  { %v5450_v35 = vpop.eup %5449  ;;  %v3940_v7 = vadd.f32 %v3924_v42, %v6290_v45  ;;  %v4024_v42 = vmul.f32 %v4008_v27, %v7732_v55 }
0x13af   :  { %3971 = vrot.lane.b32.xlu2 %v5450_v35, %s5514_s1 }
0x13b0   :  { %5451 = vtanh.f32 %v3940_v7 }
0x13b6   :  { %v5452_v48 = vpop.eup %5451 }
0x13b7   :  { %3979 = vrot.lane.b32.xlu2 %v5452_v48, %s5514_s1 }
0x1400   :  { %v3970_v49 = vpop.permute.xlu1 %3969 }
0x1401   :  { %v3991_v37 = vmul.f32 %v3970_v49, %v3951_v2  ;;  %v3966_v56 = vpop.permute.xlu2 %3965  ;;  %v3968_v8 = vpop.permute.xlu0 %3967 }
0x1402   :  { %v3989_v25 = vmul.f32 %v3966_v56, %v3949_v12  ;;  %v3990_v28 = vmul.f32 %v3968_v8, %v3950_v52 }
0x1403   :  { %v7770_v34 = vadd.f32 %v4023_v19, %v3991_v37 }
0x1404   :  { %v7772_v58 = vadd.f32 %v4021_v21, %v3989_v25  ;;  %v7775_v26 = vadd.f32 %v7641_v6, %v3990_v28  ;;  %v3956_v25 = vsub.f32 1.0, %v7743_v63  ;;  %v3955_v28 = vsub.f32 1.0, %v7687_v59 }
0x1405   :  { %v4039_v9 = vpack.c.bf16 %v7770_v34, %v7770_v34  ;;  %v4533_v14 = vrot.slane %v7770_v34, 4 }
0x1406   :  { %v4037_v33 = vpack.c.bf16 %v7772_v58, %v7772_v58  ;;  %v4530_v5 = vrot.slane %v7772_v58, 6  ;;  %v4038_v41 = vpack.c.bf16 %v7775_v26, %v7775_v26  ;;  %v4531_v6 = vrot.slane %v7775_v26, 5 }
0x1407   :  { %v4055_v61 = vunpack.c.l.b16 %v4039_v9 }
0x1408   :  { %v4053_v0 = vunpack.c.l.b16 %v4037_v33  ;;  %v4054_v20 = vunpack.c.l.b16 %v4038_v41  ;;  %v4532_v18 = vsel %vm1078_vm12, %v4531_v6, %v4530_v5  ;;  %v3976_v16 = vpop.permute.xlu1 %3975  ;;  %v4027_v6 = vmul.f32 %v4011_v29, %v7687_v59 }
0x1409   :  { %v4064_v54 = vrot.slane %v4055_v61, 4  ;;  %v3994_v50 = vmul.f32 %v3976_v16, %v3954_v13  ;;  %v3972_v35 = vpop.permute.xlu2 %3971  ;;  %v4534_v7 = vsel %vm1080_vm13, %v4533_v14, %v4532_v18  ;;  %v3974_v48 = vpop.permute.xlu0 %3973 }
0x140a   :  { %v4061_v2 = vrot.slane %v4053_v0, 6  ;;  %v4062_v44 = vrot.slane %v4054_v20, 5  ;;  %v3992_v4 = vmul.f32 %v3972_v35, %v3952_v53  ;;  %v3993_v49 = vmul.f32 %v3974_v48, %v3953_v57 }
0x140b   :  { %v7795_v12 = vadd.f32 %v4026_v51, %v3994_v50 }
0x140c   :  { %v4063_v1 = vsel %vm1078_vm12, %v4062_v44, %v4061_v2  ;;  %v7798_v52 = vadd.f32 %v4024_v42, %v3992_v4  ;;  %v7801_v46 = vadd.f32 %v7645_v3, %v3993_v49  ;;  %v4012_v3 = vrot.slane %v7584_v31, 7 }
0x140d   :  { %v4042_v55 = vpack.c.bf16 %v7795_v12, %v7795_v12  ;;  %v4065_v19 = vsel %vm1080_vm13, %v4064_v54, %v4063_v1  ;;  %v4539_v33 = vrot.slane %v7795_v12, 1 }
0x140e   :  { %v4040_v37 = vpack.c.bf16 %v7798_v52, %v7798_v52  ;;  %v4535_v56 = vrot.slane %v7798_v52, 3  ;;  %v4041_v8 = vpack.c.bf16 %v7801_v46, %v7801_v46  ;;  %v4537_v21 = vrot.slane %v7801_v46, 2 }
0x140f   :  { %v4058_v9 = vunpack.c.l.b16 %v4042_v55  ;;  %v4028_v5 = vmul.f32 %v4012_v3, %v7743_v63 }
0x1410   :  { %v4056_v14 = vunpack.c.l.b16 %v4040_v37  ;;  %v4536_v38 = vsel %vm1082_vm14, %v4535_v56, %v4534_v7  ;;  %v4057_v27 = vunpack.c.l.b16 %v4041_v8 }
0x1411   :  { %v3980_v41 = vpop.permute.xlu2 %3979  ;;  %v3978_v61 = vpop.permute.xlu0 %3977  ;;  %v4538_v13 = vsel %vm1084_vm15, %v4537_v21, %v4536_v38  ;;  %v4070_v18 = vrot.slane %v4058_v9, 1 }
0x1412   :  { %v4066_v31 = vrot.slane %v4056_v14, 3  ;;  %v4068_v51 = vrot.slane %v4057_v27, 2  ;;  %v3996_v53 = vmul.f32 %v3980_v41, %v3956_v25  ;;  %v3995_v0 = vmul.f32 %v3978_v61, %v3955_v28 }
0x1413   :  { %v4540_v20 = vsel %vm1086_vm2, %v4539_v33, %v4538_v13 }
0x1414   :  { %v4067_v16 = vsel %vm1082_vm14, %v4066_v31, %v4065_v19  ;;  %v7824_v57 = vadd.f32 %v4028_v5, %v3996_v53  ;;  %v7826_v63 = vadd.f32 %v4027_v6, %v3995_v0 }
0x1415   :  { %v4069_v54 = vsel %vm1084_vm15, %v4068_v51, %v4067_v16 }
0x1416   :  { %v4044_v47 = vpack.c.bf16 %v7824_v57, %v7824_v57  ;;  %v4043_v29 = vpack.c.bf16 %v7826_v63, %v7826_v63  ;;  %v4071_v59 = vsel %vm1086_vm2, %v4070_v18, %v4069_v54  ;;  %v7836_v50 = vsel %vm1088_vm3, %v7826_v63, %v4540_v20 }
0x1418   :  { %v4060_v42 = vunpack.c.l.b16 %v4044_v47  ;;  %v4059_v35 = vunpack.c.l.b16 %v4043_v29 }
0x141a   :  { %v4073_v7 = vrot.slane %v4060_v42, 7  ;;  %v4072_v48 = vsel %vm1088_vm3, %v4059_v35, %v4071_v59 }
0x141c   :  { %v4074_v2 = vsel %vm1090_vm4, %v4073_v7, %v4072_v48 }
0x141d   :  { %v4075_v44 = vpack.c.b16 %v4074_v2, %v4074_v2  ;;  %v4406_v2 = vrot.slane %v7772_v58, 7 }
0x141f   :  { %4076 = vrot.lane.b32.xlu1 %v4075_v44, %s5514_s1 }
0x1491   :  { %v4077_v4 = vpop.permute.xlu1 %4076 }
0x1492   :  { %4895 = vmatmul.msk.bf16.vlgmr.msra.gmra.mxu0 %vm8144_vm7, %v4077_v4 }
0x150f   :  { %v4090_v49 = vpop.f32.mrf.mxu0 }
0x1510   :  { %v7843_v1 = vadd.f32 %v7612_v36, %v4090_v49  ;;  %v4409_v49 = vrot.slane %v7798_v52, 7 }
0x1512   :  { %v4097_v55 = vrot.slane %v7843_v1, 3  ;;  %v4096_v19 = vrot.slane %v7843_v1, 2  ;;  %v4095_v37 = vrot.slane %v7843_v1, 1  ;;  %v4098_v56 = vrot.slane %v7843_v1, 4 }
0x1513   :  { %v4100_v28 = vrot.slane %v7843_v1, 6  ;;  %v4099_v9 = vrot.slane %v7843_v1, 5  ;;  %v4101_v33 = vrot.slane %v7843_v1, 7 }
0x1514   :  { %4274 = vrot.lane.b32.xlu1 %v4097_v55, %s5513_s21  ;;  %4272 = vrot.lane.b32.xlu0 %v4096_v19, %s5513_s21  ;;  %v4110_v8 = vadd.f32 %v4095_v37, %v6197_v11  ;;  %v4113_v21 = vadd.f32 %v4098_v56, %v6259_v24 }
0x1515   :  { %4270 = vrot.lane.b32.xlu2 %v4095_v37, %s5513_s21  ;;  %v4114_v52 = vadd.f32 %v4099_v9, %v6265_v39 }
0x1516   :  { %v4896_v36 = vmul.f32 -1.442695, %v4110_v8  ;;  %v4899_v3 = vmul.f32 -1.442695, %v4113_v21  ;;  %v4112_v21 = vadd.f32 %v4097_v55, %v6253_v22 }
0x1517   :  { %v4092_v25 = vpop.f32.mrf.mxu0 }
0x1518   :  { %5453 = vpow2.f32 %v4896_v36  ;;  %v4111_v36 = vadd.f32 %v4096_v19, %v6212_v30  ;;  %v4898_v25 = vmul.f32 -1.442695, %v4112_v21  ;;  %v4117_v19 = vadd.f32 %v7843_v1, %v6290_v45 }
0x1519   :  { %5455 = vpow2.f32 %v4899_v3 }
0x151a   :  { %v4897_v58 = vmul.f32 -1.442695, %v4111_v36 }
0x151c   :  { %4280 = vrot.lane.b32.xlu1 %v4100_v28, %s5513_s21  ;;  %4278 = vrot.lane.b32.xlu0 %v4099_v9, %s5513_s21 }
0x151d   :  { %4276 = vrot.lane.b32.xlu2 %v4098_v56, %s5513_s21  ;;  %v4116_v56 = vadd.f32 %v4101_v33, %v6277_v32 }
0x151e   :  { %v5454_v14 = vpop.eup %5453 }
0x151f   :  { %v4142_v38 = vadd.f32 1.0, %v5454_v14  ;;  %v5456_v27 = vpop.eup %5455  ;;  %v4902_v8 = vmul.f32 -1.442695, %v4116_v56  ;;  %v4115_v14 = vadd.f32 %v4100_v28, %v6271_v15  ;;  %v4903_v28 = vmul.f32 -1.442695, %v4117_v19 }
0x1520   :  { %v4145_v5 = vadd.f32 1.0, %v5456_v27 }
0x1521   :  { %5457 = vrcp.f32 %v4142_v38  ;;  %v4161_v20 = vand.u32 2147483648, %v4142_v38  ;;  %vm4155_vm5 = vweird.f32 %v4142_v38  ;;  %v4159_v16 = vand.u32 2147483647, %v4142_v38 }
0x1522   :  { %5459 = vrcp.f32 %v4145_v5  ;;  %v4206_v47 = vand.u32 2147483648, %v4145_v5  ;;  %vm4200_vm9 = vweird.f32 %v4145_v5  ;;  %v4204_v59 = vand.u32 2147483647, %v4145_v5 }
0x1523   :  { %v4162_v42 = vor.u32 1.1754944e-38, %v4161_v20  ;;  %vm4160_vm0 = vcmp.eq.f32.partialorder %v4159_v16, 8.507059e+37  ;;  %5461 = vpow2.f32 %v4902_v8  ;;  %v4901_v27 = vmul.f32 -1.442695, %v4115_v14 }
0x1524   :  { %4284 = vrot.lane.b32.xlu0 %v7843_v1, %s5513_s21  ;;  %v4207_v48 = vor.u32 1.1754944e-38, %v4206_v47  ;;  %vm4205_vm6 = vcmp.eq.f32.partialorder %v4204_v59, 8.507059e+37  ;;  %5463 = vpow2.f32 %v4898_v25 }
0x1525   :  { %4282 = vrot.lane.b32.xlu2 %v4101_v33, %s5513_s21  ;;  %5465 = vpow2.f32 %v4897_v58 }
0x1527   :  { %v5458_v41 = vpop.eup %5457 }
0x1528   :  { %v4151_v6 = vmul.f32 %v5458_v41, %v4142_v38  ;;  %v5460_v61 = vpop.eup %5459  ;;  %vm4156_vm1 = vweird.f32 %v5458_v41 }
0x1529   :  { %v4196_v31 = vmul.f32 %v5460_v61, %v4145_v5  ;;  %vm4201_vm8 = vweird.f32 %v5460_v61  ;;  %vm4157_vm11 = vmor %vm4155_vm5, %vm4156_vm1  ;;  %v5462_v3 = vpop.eup %5461  ;;  %v4900_v5 = vmul.f32 -1.442695, %v4114_v52 }
0x152a   :  { %v4152_v13 = vsub.f32 1.0, %v4151_v6  ;;  %vm4202_vm10 = vmor %vm4200_vm9, %vm4201_vm8  ;;  %v4148_v38 = vadd.f32 1.0, %v5462_v3 }
0x152b   :  { %v4197_v53 = vsub.f32 1.0, %v4196_v31 }
0x152c   :  { %v4153_v51 = vmul.f32 %v5458_v41, %v4152_v13  ;;  %5467 = vrcp.f32 %v4148_v38  ;;  %v4251_v36 = vand.u32 2147483648, %v4148_v38  ;;  %vm4245_vm1 = vweird.f32 %v4148_v38 }
0x152d   :  { %v4198_v18 = vmul.f32 %v5460_v61, %v4197_v53  ;;  %5469 = vpow2.f32 %v4901_v27  ;;  %v4249_v25 = vand.u32 2147483647, %v4148_v38 }
0x152e   :  { %v4154_v0 = vadd.f32 %v5458_v41, %v4153_v51  ;;  %5471 = vpow2.f32 %v4900_v5  ;;  %v4252_v5 = vor.u32 1.1754944e-38, %v4251_v36 }
0x152f   :  { %v4199_v54 = vadd.f32 %v5460_v61, %v4198_v18  ;;  %vm4250_vm8 = vcmp.eq.f32.partialorder %v4249_v25, 8.507059e+37 }
0x1530   :  { %v4158_v29 = vsel %vm4157_vm11, %v5458_v41, %v4154_v0  ;;  %v5464_v41 = vpop.eup %5463 }
0x1531   :  { %v4203_v35 = vsel %vm4202_vm10, %v5460_v61, %v4199_v54  ;;  %v7863_v7 = vsel %vm4160_vm0, %v4162_v42, %v4158_v29  ;;  %v5466_v33 = vpop.eup %5465  ;;  %v7880_v55 = vadd.f32 1.0, %v5464_v41 }
0x1532   :  { %v7866_v44 = vsel %vm4205_vm6, %v4207_v48, %v4203_v35  ;;  %v7869_v4 = vmul.f32 %v4406_v2, %v7863_v7  ;;  %v7884_v6 = vadd.f32 1.0, %v5466_v33  ;;  %v5468_v61 = vpop.eup %5467 }
0x1533   :  { %v7873_v37 = vmul.f32 %v4409_v49, %v7866_v44  ;;  %5473 = vrcp.f32 %v7880_v55  ;;  %v5470_v9 = vpop.eup %5469  ;;  %v4241_v31 = vmul.f32 %v5468_v61, %v4148_v38  ;;  %vm4246_vm7 = vweird.f32 %v5468_v61 }
0x1534   :  { %5475 = vrcp.f32 %v7884_v6  ;;  %v5472_v13 = vpop.eup %5471  ;;  %v7888_v51 = vadd.f32 1.0, %v5470_v9  ;;  %vm4247_vm5 = vmor %vm4245_vm1, %vm4246_vm7  ;;  %vm4185_vm10 = vweird.f32 %v7880_v55  ;;  %vm4170_vm6 = vweird.f32 %v7884_v6 }
0x1535   :  { %5477 = vpow2.f32 %v4903_v28  ;;  %v7890_v53 = vadd.f32 1.0, %v5472_v13  ;;  %v4242_v16 = vsub.f32 1.0, %v4241_v31 }
0x1536   :  { %5479 = vrcp.f32 %v7888_v51 }
0x1537   :  { %5481 = vrcp.f32 %v7890_v53  ;;  %v4243_v59 = vmul.f32 %v5468_v61, %v4242_v16  ;;  %v4189_v16 = vand.u32 2147483647, %v7880_v55 }
0x1539   :  { %v7892_v0 = vpop.eup %5473  ;;  %v4244_v21 = vadd.f32 %v5468_v61, %v4243_v59  ;;  %vm4190_vm1 = vcmp.eq.f32.partialorder %v4189_v16, 8.507059e+37 }
0x153a   :  { %v7894_v1 = vpop.eup %5475  ;;  %v4181_v47 = vmul.f32 %v7892_v0, %v7880_v55  ;;  %vm4186_vm11 = vweird.f32 %v7892_v0 }
0x153b   :  { %v5478_v54 = vpop.eup %5477  ;;  %v4166_v29 = vmul.f32 %v7894_v1, %v7884_v6  ;;  %v4248_v27 = vsel %vm4247_vm5, %v5468_v61, %v4244_v21  ;;  %vm4171_vm9 = vweird.f32 %v7894_v1  ;;  %v4191_v61 = vand.u32 2147483648, %v7880_v55  ;;  %vm7931_vm0 = vmor %vm4185_vm10, %vm4186_vm11 }
0x153c   :  { %v7904_v42 = vadd.f32 1.0, %v5478_v54  ;;  %v7906_v35 = vpop.eup %5479  ;;  %v4182_v2 = vsub.f32 1.0, %v4181_v47  ;;  %v7921_v41 = vsel %vm4250_vm8, %v4252_v5, %v4248_v27  ;;  %v4174_v54 = vand.u32 2147483647, %v7884_v6  ;;  %vm4172_vm7 = vmor %vm4170_vm6, %vm4171_vm9 }
0x153d   :  { %v4167_v49 = vsub.f32 1.0, %v4166_v29  ;;  %v7908_v56 = vpop.eup %5481  ;;  %v4226_v58 = vmul.f32 %v7906_v35, %v7888_v51  ;;  %vm4231_vm8 = vweird.f32 %v7906_v35  ;;  %vm4230_vm9 = vweird.f32 %v7888_v51 }
0x153e   :  { %5483 = vrcp.f32 %v7904_v42  ;;  %v4183_v3 = vmul.f32 %v7892_v0, %v4182_v2  ;;  %v4211_v52 = vmul.f32 %v7908_v56, %v7890_v53  ;;  %v4192_v2 = vor.u32 1.1754944e-38, %v4191_v61  ;;  %vm4232_vm10 = vmor %vm4230_vm9, %vm4231_vm8 }
0x153f   :  { %v4168_v14 = vmul.f32 %v7894_v1, %v4167_v49  ;;  %v4227_v38 = vsub.f32 1.0, %v4226_v58  ;;  %vm4175_vm5 = vcmp.eq.f32.partialorder %v4174_v54, 8.507059e+37  ;;  %vm4216_vm11 = vweird.f32 %v7908_v56 }
0x1540   :  { %v4184_v19 = vadd.f32 %v7892_v0, %v4183_v3  ;;  %v4212_v9 = vsub.f32 1.0, %v4211_v52  ;;  %v4221_v52 = vand.u32 2147483648, %v7890_v53  ;;  %v4234_v27 = vand.u32 2147483647, %v7888_v51 }
0x1541   :  { %v4169_v28 = vadd.f32 %v7894_v1, %v4168_v14  ;;  %v4228_v47 = vmul.f32 %v7906_v35, %v4227_v38  ;;  %v4236_v14 = vand.u32 2147483648, %v7888_v51  ;;  %v4219_v5 = vand.u32 2147483647, %v7890_v53 }
0x1542   :  { %v4188_v29 = vsel %vm7931_vm0, %v7892_v0, %v4184_v19  ;;  %vm4215_vm0 = vweird.f32 %v7890_v53  ;;  %vm4260_vm8 = vweird.f32 %v7904_v42  ;;  %v4264_v16 = vand.u32 2147483647, %v7904_v42 }
0x1543   :  { %v4173_v59 = vsel %vm4172_vm7, %v7894_v1, %v4169_v28  ;;  %v4229_v0 = vadd.f32 %v7906_v35, %v4228_v47  ;;  %vm4217_vm6 = vmor %vm4215_vm0, %vm4216_vm11  ;;  %v4237_v28 = vor.u32 1.1754944e-38, %v4236_v14  ;;  %vm4235_vm7 = vcmp.eq.f32.partialorder %v4234_v27, 8.507059e+37 }
0x1544   :  { %v7925_v13 = vpop.eup %5483  ;;  %vm4265_vm9 = vcmp.eq.f32.partialorder %v4264_v16, 8.507059e+37 }
0x1545   :  { %v4256_v55 = vmul.f32 %v7925_v13, %v7904_v42  ;;  %v4233_v38 = vsel %vm4232_vm10, %v7906_v35, %v4229_v0 }
0x1547   :  { %v4257_v3 = vsub.f32 1.0, %v4256_v55 }
0x1549   :  { %v4258_v19 = vmul.f32 %v7925_v13, %v4257_v3 }
0x154b   :  { %v4259_v35 = vadd.f32 %v7925_v13, %v4258_v19 }
0x156f   :  { %v4271_v20 = vpop.permute.xlu2 %4270 }
0x1570   :  { %v4294_v18 = vmul.f32 %v4271_v20, %v7863_v7  ;;  %v4176_v20 = vand.u32 2147483648, %v7884_v6 }
0x1572   :  { %4310 = vrot.lane.b32.xlu1 %v4294_v18, %s5513_s21  ;;  %v4177_v6 = vor.u32 1.1754944e-38, %v4176_v20 }
0x1574   :  { %v7952_v36 = vsel %vm4175_vm5, %v4177_v6, %v4173_v59  ;;  %vm4261_vm5 = vweird.f32 %v7925_v13 }
0x1575   :  { %vm4262_vm11 = vmor %vm4260_vm8, %vm4261_vm5 }
0x1576   :  { %v4263_v54 = vsel %vm4262_vm11, %v7925_v13, %v4259_v35 }
0x1577   :  { %v4277_v48 = vpop.permute.xlu2 %4276 }
0x1578   :  { %v4297_v8 = vmul.f32 %v4277_v48, %v7866_v44  ;;  %v4213_v48 = vmul.f32 %v7908_v56, %v4212_v9  ;;  %v4222_v9 = vor.u32 1.1754944e-38, %v4221_v52 }
0x157a   :  { %4316 = vrot.lane.b32.xlu1 %v4297_v8, %s5513_s21  ;;  %v7950_v8 = vsel %vm4190_vm1, %v4192_v2, %v4188_v29  ;;  %v4214_v58 = vadd.f32 %v7908_v56, %v4213_v48  ;;  %vm4220_vm1 = vcmp.eq.f32.partialorder %v4219_v5, 8.507059e+37 }
0x157b   :  { %v4352_v62 = vsub.f32 1.0, %v7950_v8 }
0x157f   :  { %v4283_v33 = vpop.permute.xlu2 %4282 }
0x1580   :  { %v4300_v31 = vmul.f32 %v4283_v33, %v7921_v41  ;;  %v4218_v33 = vsel %vm4217_vm6, %v7908_v56, %v4214_v58  ;;  %v4266_v56 = vand.u32 2147483648, %v7904_v42 }
0x1581   :  { %v7974_v20 = vsel %vm4220_vm1, %v4222_v9, %v4218_v33  ;;  %v4407_v9 = vrot.slane %v7775_v26, 7  ;;  %v4985_v26 = vld [vmem:[%s8123_s12 + $0x8] sm:$0xff] }
0x1582   :  { %4322 = vrot.lane.b32.xlu1 %v4300_v31, %s5513_s21  ;;  %v7972_v31 = vsel %vm4235_vm7, %v4237_v28, %v4233_v38  ;;  %v4267_v47 = vor.u32 1.1754944e-38, %v4266_v56  ;;  %v4351_v28 = vsub.f32 1.0, %v7952_v36 }
0x1584   :  { %v7986_v29 = vsel %vm4265_vm9, %v4267_v47, %v4263_v54  ;;  %v4423_v54 = vmul.f32 %v4407_v9, %v7952_v36 }
0x1586   :  { %v4275_v49 = vpop.permute.xlu1 %4274  ;;  %v4273_v21 = vpop.permute.xlu0 %4272 }
0x1587   :  { %v4296_v1 = vmul.f32 %v4275_v49, %v7950_v8  ;;  %v4295_v25 = vmul.f32 %v4273_v21, %v7952_v36  ;;  %v4355_v36 = vsub.f32 1.0, %v7972_v31 }
0x1589   :  { %4314 = vrot.lane.b32.xlu0 %v4296_v1, %s5513_s21  ;;  %4312 = vrot.lane.b32.xlu2 %v4295_v25, %s5513_s21 }
0x158e   :  { %v4281_v61 = vpop.permute.xlu1 %4280  ;;  %v4279_v51 = vpop.permute.xlu0 %4278 }
0x158f   :  { %v4299_v18 = vmul.f32 %v4281_v61, %v7972_v31  ;;  %v4298_v53 = vmul.f32 %v4279_v51, %v7974_v20  ;;  %v4986_v61 = vld [vmem:[%s8123_s12 + $0x10] sm:$0xff] }
0x1591   :  { %4320 = vrot.lane.b32.xlu0 %v4299_v18, %s5513_s21  ;;  %4318 = vrot.lane.b32.xlu2 %v4298_v53, %s5513_s21  ;;  %v4350_v18 = vsub.f32 1.0, %v7863_v7 }
0x1596   :  { %v4285_v59 = vpop.permute.xlu0 %4284 }
0x1597   :  { %v4301_v48 = vmul.f32 %v4285_v59, %v7986_v29 }
0x1599   :  { %4324 = vrot.lane.b32.xlu2 %v4301_v48, %s5513_s21 }
0x15e3   :  { %v4313_v55 = vpop.permute.xlu2 %4312 }
0x15e4   :  { %v4335_v2 = vadd.f32 %v4313_v55, %v6212_v30  ;;  %v4311_v6 = vpop.permute.xlu1 %4310 }
0x15e5   :  { %v4334_v49 = vadd.f32 %v4311_v6, %v6197_v11 }
0x15e6   :  { %5485 = vtanh.f32 %v4335_v2 }
0x15e7   :  { %5487 = vtanh.f32 %v4334_v49  ;;  %v4354_v49 = vsub.f32 1.0, %v7974_v20 }
0x15eb   :  { %v4319_v42 = vpop.permute.xlu2 %4318 }
0x15ec   :  { %v5486_v21 = vpop.eup %5485  ;;  %v4338_v13 = vadd.f32 %v4319_v42, %v6265_v39  ;;  %v4317_v0 = vpop.permute.xlu1 %4316  ;;  %v4410_v42 = vrot.slane %v7801_v46, 7 }
0x15ed   :  { %v5488_v1 = vpop.eup %5487  ;;  %v4337_v25 = vadd.f32 %v4317_v0, %v6259_v24  ;;  %4368 = vrot.lane.b32.xlu1 %v5486_v21, %s5514_s1  ;;  %v4984_v21 = vld [vmem:[%s8123_s12] sm:$0xff]  ;;  %v4411_v0 = vrot.slane %v7795_v12, 7  ;;  %v4997_v12 = vld [vmem:[%s8123_s12 + $0x68] sm:$0xff] }
0x15ee   :  { %5489 = vtanh.f32 %v4338_v13  ;;  %4366 = vrot.lane.b32.xlu0 %v5488_v1, %s5514_s1 }
0x15ef   :  { %5491 = vtanh.f32 %v4337_v25  ;;  %v4353_v25 = vsub.f32 1.0, %v7866_v44 }
0x15f3   :  { %v4325_v30 = vpop.permute.xlu2 %4324 }
0x15f4   :  { %v5490_v58 = vpop.eup %5489  ;;  %v4341_v11 = vadd.f32 %v4325_v30, %v6290_v45  ;;  %v4323_v3 = vpop.permute.xlu1 %4322  ;;  %v4413_v45 = vrot.slane %v7824_v57, 7  ;;  %v4993_v57 = vld [vmem:[%s8123_s12 + $0x48] sm:$0xff] }
0x15f5   :  { %v5492_v14 = vpop.eup %5491  ;;  %v4340_v52 = vadd.f32 %v4323_v3, %v6277_v32  ;;  %4374 = vrot.lane.b32.xlu1 %v5490_v58, %s5514_s1  ;;  %v4426_v3 = vmul.f32 %v4410_v42, %v7974_v20  ;;  %v4996_v20 = vld [vmem:[%s8123_s12 + $0x60] sm:$0xff] }
0x15f6   :  { %5493 = vtanh.f32 %v4341_v11  ;;  %4372 = vrot.lane.b32.xlu0 %v5492_v14, %s5514_s1  ;;  %v4542_v19 = vsel %vm1090_vm4, %v4413_v45, %v7836_v50  ;;  %v4990_v50 = vld [vmem:[%s8123_s12 + $0x30] sm:$0xff] }
0x15f7   :  { %5495 = vtanh.f32 %v4340_v52  ;;  %v4427_v52 = vmul.f32 %v4411_v0, %v7972_v31 }
0x15fb   :  { %v4315_v24 = vpop.permute.xlu0 %4314 }
0x15fc   :  { %v5494_v39 = vpop.eup %5493  ;;  %v4336_v27 = vadd.f32 %v4315_v24, %v6253_v22 }
0x15fd   :  { %v5496_v5 = vpop.eup %5495  ;;  %4380 = vrot.lane.b32.xlu1 %v5494_v39, %s5514_s1 }
0x15fe   :  { %5497 = vtanh.f32 %v4336_v27  ;;  %4378 = vrot.lane.b32.xlu0 %v5496_v5, %s5514_s1 }
0x1603   :  { %v4321_v38 = vpop.permute.xlu0 %4320 }
0x1604   :  { %v5498_v32 = vpop.eup %5497  ;;  %v4339_v33 = vadd.f32 %v4321_v38, %v6271_v15  ;;  %v4991_v15 = vld [vmem:[%s8123_s12 + $0x38] sm:$0xff] }
0x1605   :  { %4370 = vrot.lane.b32.xlu2 %v5498_v32, %s5514_s1  ;;  %4713 = vmatpush.bf16.msrb.mxu1 %v4991_v15 }
0x1606   :  { %5499 = vtanh.f32 %v4339_v33  ;;  %4543 = vrot.lane.b32.xlu0 %v4542_v19, %s5506_s26  ;;  %v4356_v19 = vsub.f32 1.0, %v7921_v41 }
0x1609   :  { %4714 = vmatpush.bf16.msrb.mxu1 %v4990_v50 }
0x160c   :  { %v5500_v22 = vpop.eup %5499 }
0x160d   :  { %4376 = vrot.lane.b32.xlu2 %v5500_v22, %s5514_s1  ;;  %v4412_v22 = vrot.slane %v7826_v63, 7  ;;  %v4995_v63 = vld [vmem:[%s8123_s12 + $0x58] sm:$0xff] }
0x160e   :  { %4497 = vrot.lane.b32.xlu0 %v7114_v60, %s5513_s21  ;;  %v4989_v60 = vld [vmem:[%s8123_s12 + $0x28] sm:$0xff] }
0x160f   :  { %4715 = vmatpush.bf16.msrb.mxu1 %v4989_v60 }
0x1613   :  { %4716 = vmatpush.bf16.msrb.mxu1 %v4988_v23  ;;  %v4357_v23 = vsub.f32 1.0, %v7986_v29 }
0x1615   :  { %5045 = vrot.lane.b32.xlu2 %v5044_v17, %s5514_s1  ;;  %v4408_v17 = vrot.slane %v7770_v34, 7 }
0x1617   :  { %v4424_v35 = vmul.f32 %v4408_v17, %v7950_v8  ;;  %v4999_v8 = vld [vmem:[%s8123_s12 + $0x78] sm:$0xff] }
0x1618   :  { %4726 = vmatpush.bf16.msra.mxu2 %v4999_v8 }
0x161d   :  { %4481 = vrot.lane.b32.xlu2 %v6875_v10, %s5506_s26  ;;  %v4987_v10 = vld [vmem:[%s8123_s12 + $0x18] sm:$0xff] }
0x161e   :  { %4717 = vmatpush.bf16.msrb.mxu1 %v4987_v10  ;;  %v4428_v10 = vmul.f32 %v4412_v22, %v7921_v41  ;;  %v4994_v41 = vld [vmem:[%s8123_s12 + $0x50] sm:$0xff] }
0x1622   :  { %4718 = vmatpush.bf16.msrb.mxu1 %v4986_v61 }
0x1626   :  { %4719 = vmatpush.bf16.msrb.mxu1 %v4985_v26 }
0x162a   :  { %4720 = vmatpush.bf16.msrb.mxu1 %v4984_v21 }
0x165f   :  { %v4371_v51 = vpop.permute.xlu2 %4370  ;;  %v4369_v53 = vpop.permute.xlu1 %4368 }
0x1660   :  { %v4392_v56 = vmul.f32 %v4371_v51, %v4352_v62  ;;  %v4367_v16 = vpop.permute.xlu0 %4366  ;;  %v4391_v34 = vmul.f32 %v4369_v53, %v4351_v28  ;;  %v4429_v51 = vmul.f32 %v4413_v45, %v7986_v29 }
0x1661   :  { %v4390_v47 = vmul.f32 %v4367_v16, %v4350_v18 }
0x1662   :  { %v4432_v59 = vadd.f32 %v4424_v35, %v4392_v56  ;;  %v4431_v48 = vadd.f32 %v4423_v54, %v4391_v34  ;;  %v4992_v54 = vld [vmem:[%s8123_s12 + $0x40] sm:$0xff] }
0x1663   :  { %v4430_v55 = vadd.f32 %v7869_v4, %v4390_v47  ;;  %v4998_v4 = vld [vmem:[%s8123_s12 + $0x70] sm:$0xff] }
0x1664   :  { %v4557_v2 = vrot.slane %v4432_v59, 5  ;;  %v4555_v7 = vrot.slane %v4431_v48, 6  ;;  %4727 = vmatpush.bf16.msra.mxu2 %v4998_v4 }
0x1665   :  { %v4554_v6 = vrot.slane %v4430_v55, 7 }
0x1667   :  { %v4556_v13 = vsel %vm1078_vm12, %v4555_v7, %v4554_v6  ;;  %v4377_v1 = vpop.permute.xlu2 %4376  ;;  %v4375_v30 = vpop.permute.xlu1 %4374  ;;  %vm8147_vm12 = vcmask 261120  }
0x1668   :  { %v4395_v58 = vmul.f32 %v4377_v1, %v4355_v36  ;;  %v4373_v46 = vpop.permute.xlu0 %4372  ;;  %v4558_v11 = vsel %vm1080_vm13, %v4557_v2, %v4556_v13  ;;  %v4394_v14 = vmul.f32 %v4375_v30, %v4354_v49  ;;  %4728 = vmatpush.bf16.msra.mxu2 %v4997_v12  ;;  %vm4572_vm13 = vcmask 523264   ;;  %v5052_v36 = vld [vmem:[%s8124_s13] ss:$0 sm:$0xff] }
0x1669   :  { %v4393_v24 = vmul.f32 %v4373_v46, %v4353_v25 }
0x166a   :  { %v4434_v39 = vadd.f32 %v4426_v3, %v4394_v14  ;;  %v4435_v27 = vadd.f32 %v4427_v52, %v4395_v58 }
0x166b   :  { %v4433_v44 = vadd.f32 %v7873_v37, %v4393_v24 }
0x166c   :  { %v4561_v5 = vrot.slane %v4434_v39, 3  ;;  %v4563_v32 = vrot.slane %v4435_v27, 2  ;;  %4729 = vmatpush.bf16.msra.mxu2 %v4996_v20 }
0x166d   :  { %v4559_v38 = vrot.slane %v4433_v44, 4 }
0x166f   :  { %v4560_v31 = vsel %vm1082_vm14, %v4559_v38, %v4558_v11  ;;  %v5046_v33 = vpop.permute.xlu2 %5045  ;;  %v4381_v15 = vpop.permute.xlu1 %4380  ;;  %vm4574_vm14 = vcmask 785408  }
0x1670   :  { %v4562_v50 = vsel %vm1084_vm15, %v4561_v5, %v4560_v31  ;;  %v5047_v60 = vunpack.i.l.bf16 %v5046_v33  ;;  %v4379_v37 = vpop.permute.xlu0 %4378  ;;  %v4397_v28 = vmul.f32 %v4381_v15, %v4357_v23  ;;  %4730 = vmatpush.bf16.msra.mxu2 %v4995_v63  ;;  %v5048_v29 = vunpack.i.h.bf16 %v5046_v33  ;;  %vm8148_vm15 = vmmov %vm8147_vm12 }
0x1671   :  { %v4396_v62 = vmul.f32 %v4379_v37, %v4356_v19  ;;  %v4564_v17 = vsel %vm1086_vm2, %v4563_v32, %v4562_v50  ;;  %vm4740_vm2 = vcmask 64512  }
0x1672   :  { %v4576_v9 = vsel %vm8147_vm12, %v5047_v60, %v7602_v43  ;;  %v4437_v53 = vadd.f32 %v4429_v51, %v4397_v28  ;;  %v4571_v34 = vsel %vm8148_vm15, %v5048_v29, %v6634_v40 }
0x1673   :  { %v4436_v61 = vadd.f32 %v4428_v10, %v4396_v62 }
0x1674   :  { %4731 = vmatpush.bf16.msra.mxu2 %v4994_v41 }
0x1675   :  { %v4565_v18 = vrot.slane %v4436_v61, 1 }
0x1677   :  { %v4566_v43 = vsel %vm1088_vm3, %v4565_v18, %v4564_v17  ;;  %v4482_v45 = vpop.permute.xlu2 %4481 }
0x1678   :  { %v4544_v35 = vpop.permute.xlu0 %4543  ;;  %v4567_v56 = vsel %vm1090_vm4, %v4437_v53, %v4566_v43  ;;  %4732 = vmatpush.bf16.msra.mxu2 %v4993_v57  ;;  %v4573_v47 = vsel %vm4572_vm13, %v4571_v34, %v4482_v45 }
0x1679   :  { %v4577_v16 = vsel %vm4572_vm13, %v4576_v9, %v4544_v35  ;;  %4568 = vrot.lane.b32.xlu1 %v4567_v56, %s5513_s21 }
0x167c   :  { %4733 = vmatpush.bf16.msra.mxu2 %v4992_v54 }
0x1680   :  { %v4498_v59 = vpop.permute.xlu0 %4497 }
0x1681   :  { %v4575_v48 = vsel %vm4574_vm14, %v4573_v47, %v4498_v59 }
0x1682   :  { %v4579_v26 = vpack.c.bf16 %v4575_v48, %v4575_v48 }
0x1684   :  { %4721 = vmatmul.bf16.vlgmr.msrb.gmra.mxu1 %v4579_v26 }
0x16eb   :  { %v4569_v55 = vpop.permute.xlu1 %4568 }
0x16ec   :  { %v4578_v2 = vsel %vm4574_vm14, %v4577_v16, %v4569_v55 }
0x16ed   :  { %v4580_v7 = vpack.c.bf16 %v4578_v2, %v4578_v2 }
0x16ef   :  { %4734 = vmatmul.bf16.vlgmr.msra.gmra.mxu2 %v4580_v7 }
0x1701   :  { %v4722_v8 = vpop.f32.mrf.mxu1 }
0x1702   :  { %v4723_v49 = vadd.f32 %v5052_v36, %v4722_v8 }
0x1709   :  { %v4724_v6 = vpop.f32.mrf.mxu1 }
0x1772   :  { %v4735_v42 = vpop.f32.mrf.mxu2 }
0x1773   :  { %v4736_v40 = vadd.f32 %v4735_v42, %v4723_v49 }
0x1775   :  { %v4739_v21 = vmax.f32 %v4736_v40, 0.0 }
0x1777   :  { %4741 = vst.msk [vmem:[%s8125_s14] sm:$0xff] %vm4740_vm2, %v4739_v21 }
0x177a   :  { %v4737_v4 = vpop.f32.mrf.mxu2 }

</bundles_post_ra>
